<compile_context>
chip_gen: v7x
topology: tpu7x:2x2x1
jax: 0.10.0
libtpu: 0.0.40
codegen_flags: <defaults>
</compile_context>

<pallas_src>
import math
import functools

import jax
import jax.numpy as jnp
import numpy as np
from jax import lax
from jax.experimental import pallas as pl
from jax.experimental.pallas import tpu as pltpu


NEG_BIG = -1e30  # finite "-inf": masked keys get exactly-zero probability, no inf-inf NaN risk


# ----------------------------- fused MHA kernel -----------------------------

def _fused_mha_kernel(qp_ref, kv_ref, wq_ref, bq_ref, wkv_ref, bkv_ref,
                      wo_ref, bo_ref, bias_ref, out_ref, w_ref, *, L, scale):
    S, N, E2 = kv_ref.shape
    E = E2 // 2                 # embedding width == number of heads (head_dim == 1)
    f32 = jnp.float32

    # ---- Q projection, lane-packed over the L query positions (one MXU matmul) ----
    # qp_ref[b, l*E + e] = q[l, b, e]; wq_ref = blockdiag(Wq^T x L)
    q_packed = jnp.dot(qp_ref[...], wq_ref[...], preferred_element_type=f32) + bq_ref[...]
    if scale != 1.0:            # head_dim == 1 -> scale == 1.0, skipped at trace time
        q_packed = q_packed * scale                        # (N, L*E)

    # ---- fused K/V projection: one 128-wide MXU matmul ----
    kv_p = (jnp.dot(kv_ref[...].reshape(S * N, E2), wkv_ref[...],
                    preferred_element_type=f32) + bkv_ref[...]).reshape(S, N, E2)
    k_p = kv_p[:, :, :E]                                   # (S, N, E)
    v_p = kv_p[:, :, E:]                                   # (S, N, E)
    kh = jnp.concatenate([k_p] * L, axis=-1)               # (S, N, L*E)  lane-duplicated
    vh = jnp.concatenate([v_p] * L, axis=-1)               # (S, N, L*E)

    bias = bias_ref[...][:, :, None]                       # (S, N, 1) -> free lane broadcast

    # ---- scores + softmax, both query positions packed on the 128-lane axis ----
    # head_dim == 1: QK^T is an outer product -> pure VPU broadcast multiply
    scores = q_packed[None, :, :] * kh + bias              # (S, N, L*E)
    m = jnp.max(scores, axis=0, keepdims=True)             # (1, N, L*E)
    e = jnp.exp(scores - m)                                # EUP
    denom = jnp.sum(e, axis=0, keepdims=True)              # (1, N, L*E)
    inv = 1.0 / denom                                      # one-vreg divide off the hot chain
    p = e * inv                                            # broadcast multiply

    # ---- PV (head_dim == 1): elementwise multiply + reduce over S ----
    ctx_packed = jnp.sum(p * vh, axis=0)                   # (N, L*E)

    # ---- head-averaged attention weights: one lane-dense (N, L*S) store ----
    w_cat = jnp.concatenate(
        [jnp.sum(p[:, :, l * E:(l + 1) * E], axis=-1) for l in range(L)], axis=0)   # (L*S, N)
    row = lax.broadcasted_iota(jnp.int32, (N, N), 0)
    col = lax.broadcasted_iota(jnp.int32, (N, N), 1)
    eye_n = (row == col).astype(f32)
    w_ns = lax.dot_general(eye_n, w_cat,
                           dimension_numbers=(((1,), (1,)), ((), ())),
                           preferred_element_type=f32)     # (N, L*S): transpose on the MXU
    w_ref[...] = (w_ns * (1.0 / E)).astype(w_ref.dtype)

    # ---- out-projection: restack the L lane-blocks onto rows, one MXU matmul ----
    ctx = jnp.concatenate([ctx_packed[:, l * E:(l + 1) * E] for l in range(L)], axis=0)  # (L*N, E)
    out = jnp.dot(ctx, wo_ref[...], preferred_element_type=f32) + bo_ref[...]
    out_ref[...] = out.astype(out_ref.dtype)               # (L*N, E)


# ----------------------------- wrapper -----------------------------

def _block_diag(*mats):
    rows = sum(m.shape[0] for m in mats)
    cols = sum(m.shape[1] for m in mats)
    out = jnp.zeros((rows, cols), mats[0].dtype)
    r = c = 0
    for m in mats:
        out = out.at[r:r + m.shape[0], c:c + m.shape[1]].set(m)
        r += m.shape[0]
        c += m.shape[1]
    return out


@functools.partial(jax.jit, static_argnums=(5,))
def multihead_attention(q, k, v, key_padding_mask, params, num_heads):
    L, N, E = q.shape
    S = k.shape[0]
    Dh = E // num_heads
    assert Dh * num_heads == E and Dh == 1, "fused kernel is specialized to head_dim == 1"

    in_w, in_b = params["in_proj_weight"], params["in_proj_bias"]
    out_w, out_b = params["out_proj_weight"], params["out_proj_bias"]
    wq_t, wk_t, wv_t = in_w[:E].T, in_w[E:2 * E].T, in_w[2 * E:].T
    bq = in_b[:E].reshape(1, E)
    bk = in_b[E:2 * E].reshape(1, E)
    bv = in_b[2 * E:].reshape(1, E)
    wo_t = out_w.T
    bo = out_b.reshape(1, E)

    # lane-pack the L query positions: (L, N, E) -> (N, L*E)
    q_packed_in = q.transpose(1, 0, 2).reshape(N, L * E)
    wq_blk = _block_diag(*([wq_t] * L))                     # (L*E, L*E)
    bq_dup = jnp.tile(bq, (1, L))                           # (1, L*E)

    # fuse K and V projections into one 128-wide matmul
    kv_in = jnp.concatenate([k, v], axis=-1)                # (S, N, 2E) lane-dense
    wkv_blk = _block_diag(wk_t, wv_t)                       # (2E, 2E)
    bkv = jnp.concatenate([bk, bv], axis=-1)                # (1, 2E)

    if key_padding_mask is None:
        bias = jnp.zeros((S, N), jnp.float32)
    else:
        bias = jnp.where(key_padding_mask, NEG_BIG, 0.0).astype(jnp.float32).T   # (S, N)

    kernel = functools.partial(_fused_mha_kernel, L=L, scale=1.0 / math.sqrt(Dh))

    out2d, w2d = pl.pallas_call(
        kernel,
        grid=(1,),
        in_specs=[
            pl.BlockSpec((N, L * E), lambda i: (0, 0)),
            pl.BlockSpec((S, N, 2 * E), lambda i: (0, 0, 0)),
            pl.BlockSpec((L * E, L * E), lambda i: (0, 0)),
            pl.BlockSpec((1, L * E), lambda i: (0, 0)),
            pl.BlockSpec((2 * E, 2 * E), lambda i: (0, 0)),
            pl.BlockSpec((1, 2 * E), lambda i: (0, 0)),
            pl.BlockSpec((E, E), lambda i: (0, 0)),
            pl.BlockSpec((1, E), lambda i: (0, 0)),
            pl.BlockSpec((S, N), lambda i: (0, 0)),
        ],
        out_specs=(
            pl.BlockSpec((L * N, E), lambda i: (0, 0)),
            pl.BlockSpec((N, L * S), lambda i: (0, 0)),
        ),
        out_shape=(
            jax.ShapeDtypeStruct((L * N, E), jnp.float32),
            jax.ShapeDtypeStruct((N, L * S), jnp.float32),
        ),
        compiler_params=pltpu.CompilerParams(dimension_semantics=("arbitrary",)),
    )(q_packed_in, kv_in, wq_blk, bq_dup, wkv_blk, bkv, wo_t, bo, bias)

    # free reshapes only — kernel already produced the final data layout
    return out2d.reshape(L, N, E), w2d.reshape(N, L, S)


# ----------------------------- pure-JAX reference for validation -----------------------------

def reference_mha(q, k, v, key_padding_mask, params, H):
    L, N, E = q.shape
    S = k.shape[0]
    Dh = E // H
    in_w, in_b = params["in_proj_weight"], params["in_proj_bias"]
    out_w, out_b = params["out_proj_weight"], params["out_proj_bias"]
    wq, wk, wv = in_w[:E], in_w[E:2 * E], in_w[2 * E:]
    bq, bk, bv = in_b[:E], in_b[E:2 * E], in_b[2 * E:]

    q_p = q @ wq.T + bq
    k_p = k @ wk.T + bk
    v_p = v @ wv.T + bv
    qh = q_p.reshape(L, N, H, Dh).transpose(1, 2, 0, 3)
    kh = k_p.reshape(S, N, H, Dh).transpose(1, 2, 0, 3)
    vh = v_p.reshape(S, N, H, Dh).transpose(1, 2, 0, 3)
    scores = jnp.einsum("bhld,bhsd->bhls", qh, kh) / math.sqrt(Dh)
    if key_padding_mask is not None:
        scores = scores + jnp.where(key_padding_mask, -jnp.inf, 0.0)[:, None, None, :]
    p = jax.nn.softmax(scores, axis=-1)
    ctx = jnp.einsum("bhls,bhsd->bhld", p, vh)
    attn_w = p.mean(axis=1)
    out = ctx.transpose(2, 0, 1, 3).reshape(L, N, E) @ out_w.T + out_b
    return out, attn_w


# ----------------------------- deterministic parameter init -----------------------------

def init_params(key, E):
    k1, k2 = jax.random.split(key)
    bound_in = math.sqrt(6.0 / (E + 3 * E))        # xavier_uniform on in_proj_weight
    in_proj_weight = jax.random.uniform(k1, (3 * E, E), jnp.float32, -bound_in, bound_in)
    in_proj_bias = jnp.zeros((3 * E,), jnp.float32)
    bound_out = 1.0 / math.sqrt(E)
    out_proj_weight = jax.random.uniform(k2, (E, E), jnp.float32, -bound_out, bound_out)
    out_proj_bias = jnp.zeros((E,), jnp.float32)   # torch zeroes out_proj.bias
    return {
        "in_proj_weight": in_proj_weight,
        "in_proj_bias": in_proj_bias,
        "out_proj_weight": out_proj_weight,
        "out_proj_bias": out_proj_bias,
    }


if __name__ == "__main__":
    d_model, nhead = 64, 64          # matches the module globals (head_dim = 1)
    L, N, S = 2, 8, 64               # q: (2, 8, 64); k, v: (64, 8, 64)

    root = jax.random.PRNGKey(0)
    kq, kk, kv, kp, km = jax.random.split(root, 5)
    q = jax.random.normal(kq, (L, N, d_model), jnp.float32)
    k = jax.random.normal(kk, (S, N, d_model), jnp.float32)
    v = jax.random.normal(kv, (S, N, d_model), jnp.float32)
    params = init_params(kp, d_model)

    key_padding_mask = jax.random.bernoulli(km, 0.1, (N, S))
    key_padding_mask = key_padding_mask.at[:, 0].set(False)  # guarantee >=1 valid key per row

    out, attn_w = multihead_attention(q, k, v, key_padding_mask, params, nhead)
    out, attn_w = jax.block_until_ready((out, attn_w))

    ref_out, ref_w = reference_mha(q, k, v, key_padding_mask, params, nhead)
    np.testing.assert_allclose(np.asarray(out), np.asarray(ref_out), rtol=1e-4, atol=1e-4)
    np.testing.assert_allclose(np.asarray(attn_w), np.asarray(ref_w), rtol=1e-4, atol=1e-4)

    assert out.shape == (L, N, d_model) and attn_w.shape == (N, L, S)
    print("KERNEL_OK")
</pallas_src>

<mosaic_0001>
module attributes {stable_mosaic.version = 11 : i64} {
  func.func @_fused_mha_kernel(%arg0: i32, %arg1: memref<8x128xf32, #tpu.memory_space<vmem>>, %arg2: memref<64x8x128xf32, #tpu.memory_space<vmem>>, %arg3: memref<128x128xf32, #tpu.memory_space<vmem>>, %arg4: memref<1x128xf32, #tpu.memory_space<vmem>>, %arg5: memref<128x128xf32, #tpu.memory_space<vmem>>, %arg6: memref<1x128xf32, #tpu.memory_space<vmem>>, %arg7: memref<64x64xf32, #tpu.memory_space<vmem>>, %arg8: memref<1x64xf32, #tpu.memory_space<vmem>>, %arg9: memref<64x8xf32, #tpu.memory_space<vmem>>, %arg10: memref<16x64xf32, #tpu.memory_space<vmem>>, %arg11: memref<8x128xf32, #tpu.memory_space<vmem>>) attributes {dimension_semantics = [#tpu.dimension_semantics<arbitrary>], iteration_bounds = array<i64: 1>, scalar_prefetch = 0 : i64, scratch_operands = 0 : i64, tpu.core_type = #tpu.core_type<tc>, window_params = [{pipeline_mode = #tpu.pipeline_mode<synchronous>, transform_indices = @transform_0, window_bounds = array<i64: 8, 128>}, {pipeline_mode = #tpu.pipeline_mode<synchronous>, transform_indices = @transform_1, window_bounds = array<i64: 64, 8, 128>}, {pipeline_mode = #tpu.pipeline_mode<synchronous>, transform_indices = @transform_2, window_bounds = array<i64: 128, 128>}, {pipeline_mode = #tpu.pipeline_mode<synchronous>, transform_indices = @transform_3, window_bounds = array<i64: 1, 128>}, {pipeline_mode = #tpu.pipeline_mode<synchronous>, transform_indices = @transform_4, window_bounds = array<i64: 128, 128>}, {pipeline_mode = #tpu.pipeline_mode<synchronous>, transform_indices = @transform_5, window_bounds = array<i64: 1, 128>}, {pipeline_mode = #tpu.pipeline_mode<synchronous>, transform_indices = @transform_6, window_bounds = array<i64: 64, 64>}, {pipeline_mode = #tpu.pipeline_mode<synchronous>, transform_indices = @transform_7, window_bounds = array<i64: 1, 64>}, {pipeline_mode = #tpu.pipeline_mode<synchronous>, transform_indices = @transform_8, window_bounds = array<i64: 64, 8>}, {pipeline_mode = #tpu.pipeline_mode<synchronous>, transform_indices = @transform_9, window_bounds = array<i64: 16, 64>}, {pipeline_mode = #tpu.pipeline_mode<synchronous>, transform_indices = @transform_10, window_bounds = array<i64: 8, 128>}]} {
    %c0 = arith.constant 0 : index
    %c0_0 = arith.constant 0 : index
    %0 = vector.load %arg1[%c0, %c0_0] : memref<8x128xf32, #tpu.memory_space<vmem>>, vector<8x128xf32>
    %c0_1 = arith.constant 0 : index
    %c0_2 = arith.constant 0 : index
    %1 = vector.load %arg3[%c0_1, %c0_2] : memref<128x128xf32, #tpu.memory_space<vmem>>, vector<128x128xf32>
    %cst = arith.constant dense<0.000000e+00> : vector<8x128xf32>
    %2 = tpu.matmul %0, %1, %cst {dimension_numbers = #tpu.dot_dimension_numbers<[1], [0], [0], [1], [0, 0, 1, 1], [], []>} : vector<8x128xf32>, vector<128x128xf32>, vector<8x128xf32> -> vector<8x128xf32>
    %c0_3 = arith.constant 0 : index
    %c0_4 = arith.constant 0 : index
    %3 = vector.load %arg4[%c0_3, %c0_4] : memref<1x128xf32, #tpu.memory_space<vmem>>, vector<1x128xf32>
    %4 = vector.broadcast %3 : vector<1x128xf32> to vector<8x128xf32>
    %5 = arith.addf %2, %4 : vector<8x128xf32>
    %c0_5 = arith.constant 0 : index
    %c0_6 = arith.constant 0 : index
    %c0_7 = arith.constant 0 : index
    %6 = vector.load %arg2[%c0_5, %c0_6, %c0_7] : memref<64x8x128xf32, #tpu.memory_space<vmem>>, vector<64x8x128xf32>
    %7 = vector.shape_cast %6 : vector<64x8x128xf32> to vector<512x128xf32>
    %c0_8 = arith.constant 0 : index
    %c0_9 = arith.constant 0 : index
    %8 = vector.load %arg5[%c0_8, %c0_9] : memref<128x128xf32, #tpu.memory_space<vmem>>, vector<128x128xf32>
    %cst_10 = arith.constant dense<0.000000e+00> : vector<512x128xf32>
    %9 = tpu.matmul %7, %8, %cst_10 {dimension_numbers = #tpu.dot_dimension_numbers<[1], [0], [0], [1], [0, 0, 1, 1], [], []>} : vector<512x128xf32>, vector<128x128xf32>, vector<512x128xf32> -> vector<512x128xf32>
    %c0_11 = arith.constant 0 : index
    %c0_12 = arith.constant 0 : index
    %10 = vector.load %arg6[%c0_11, %c0_12] : memref<1x128xf32, #tpu.memory_space<vmem>>, vector<1x128xf32>
    %11 = vector.broadcast %10 : vector<1x128xf32> to vector<512x128xf32>
    %12 = arith.addf %9, %11 : vector<512x128xf32>
    %13 = vector.shape_cast %12 : vector<512x128xf32> to vector<64x8x128xf32>
    %14 = vector.extract_strided_slice %13 {offsets = [0, 0, 0], sizes = [64, 8, 64], strides = [1, 1, 1]} : vector<64x8x128xf32> to vector<64x8x64xf32>
    %15 = vector.extract_strided_slice %13 {offsets = [0, 0, 64], sizes = [64, 8, 64], strides = [1, 1, 1]} : vector<64x8x128xf32> to vector<64x8x64xf32>
    %16 = tpu.concatenate %14, %14 in 2 : vector<64x8x64xf32>, vector<64x8x64xf32> -> vector<64x8x128xf32>
    %17 = tpu.concatenate %15, %15 in 2 : vector<64x8x64xf32>, vector<64x8x64xf32> -> vector<64x8x128xf32>
    %c0_13 = arith.constant 0 : index
    %c0_14 = arith.constant 0 : index
    %18 = vector.load %arg9[%c0_13, %c0_14] : memref<64x8xf32, #tpu.memory_space<vmem>>, vector<64x8xf32>
    %19 = vector.shape_cast %18 : vector<64x8xf32> to vector<64x8x1xf32>
    %20 = vector.shape_cast %5 : vector<8x128xf32> to vector<1x8x128xf32>
    %21 = vector.broadcast %20 : vector<1x8x128xf32> to vector<64x8x128xf32>
    %22 = arith.mulf %21, %16 : vector<64x8x128xf32>
    %23 = vector.broadcast %19 : vector<64x8x1xf32> to vector<64x8x128xf32>
    %24 = arith.addf %22, %23 : vector<64x8x128xf32>
    %cst_15 = arith.constant dense<0xFF800000> : vector<8x128xf32>
    %25 = vector.multi_reduction <maximumf>, %24, %cst_15 [0] : vector<64x8x128xf32> to vector<8x128xf32>
    %26 = vector.shape_cast %25 : vector<8x128xf32> to vector<1x8x128xf32>
    %27 = vector.broadcast %26 : vector<1x8x128xf32> to vector<64x8x128xf32>
    %28 = arith.subf %24, %27 : vector<64x8x128xf32>
    %29 = math.exp %28 : vector<64x8x128xf32>
    %cst_16 = arith.constant dense<0.000000e+00> : vector<8x128xf32>
    %30 = vector.multi_reduction <add>, %29, %cst_16 [0] : vector<64x8x128xf32> to vector<8x128xf32>
    %31 = vector.shape_cast %30 : vector<8x128xf32> to vector<1x8x128xf32>
    %cst_17 = arith.constant 1.000000e+00 : f32
    %32 = vector.broadcast %cst_17 : f32 to vector<1x8x128xf32>
    %33 = arith.divf %32, %31 : vector<1x8x128xf32>
    %34 = vector.broadcast %33 : vector<1x8x128xf32> to vector<64x8x128xf32>
    %35 = arith.mulf %29, %34 : vector<64x8x128xf32>
    %36 = arith.mulf %35, %17 : vector<64x8x128xf32>
    %cst_18 = arith.constant dense<0.000000e+00> : vector<8x128xf32>
    %37 = vector.multi_reduction <add>, %36, %cst_18 [0] : vector<64x8x128xf32> to vector<8x128xf32>
    %38 = vector.extract_strided_slice %35 {offsets = [0, 0, 0], sizes = [64, 8, 64], strides = [1, 1, 1]} : vector<64x8x128xf32> to vector<64x8x64xf32>
    %cst_19 = arith.constant dense<0.000000e+00> : vector<64x8xf32>
    %39 = vector.multi_reduction <add>, %38, %cst_19 [2] : vector<64x8x64xf32> to vector<64x8xf32>
    %40 = vector.extract_strided_slice %35 {offsets = [0, 0, 64], sizes = [64, 8, 64], strides = [1, 1, 1]} : vector<64x8x128xf32> to vector<64x8x64xf32>
    %cst_20 = arith.constant dense<0.000000e+00> : vector<64x8xf32>
    %41 = vector.multi_reduction <add>, %40, %cst_20 [2] : vector<64x8x64xf32> to vector<64x8xf32>
    %42 = tpu.concatenate %39, %41 in 0 : vector<64x8xf32>, vector<64x8xf32> -> vector<128x8xf32>
    %43 = tpu.iota {dimensions = array<i32: 0>} : vector<8x8xi32>
    %44 = tpu.iota {dimensions = array<i32: 1>} : vector<8x8xi32>
    %45 = arith.cmpi eq, %43, %44 : vector<8x8xi32>
    %46 = arith.extui %45 : vector<8x8xi1> to vector<8x8xi32>
    %47 = arith.sitofp %46 : vector<8x8xi32> to vector<8x8xf32>
    %cst_21 = arith.constant dense<0.000000e+00> : vector<8x128xf32>
    %48 = tpu.matmul %47, %42, %cst_21 {dimension_numbers = #tpu.dot_dimension_numbers<[1], [1], [0], [0], [0, 0, 1, 0], [], []>} : vector<8x8xf32>, vector<128x8xf32>, vector<8x128xf32> -> vector<8x128xf32>
    %cst_22 = arith.constant 1.562500e-02 : f32
    %49 = vector.broadcast %cst_22 : f32 to vector<8x128xf32>
    %50 = arith.mulf %48, %49 : vector<8x128xf32>
    %c0_23 = arith.constant 0 : index
    %c0_24 = arith.constant 0 : index
    %51 = vector.load %arg11[%c0_23, %c0_24] : memref<8x128xf32, #tpu.memory_space<vmem>>, vector<8x128xf32>
    tpu.vector_store %arg11[%c0_23, %c0_24], %50 {strides = array<i32>} : memref<8x128xf32, #tpu.memory_space<vmem>>, vector<8x128xf32>,
    %52 = vector.extract_strided_slice %37 {offsets = [0, 0], sizes = [8, 64], strides = [1, 1]} : vector<8x128xf32> to vector<8x64xf32>
    %53 = vector.extract_strided_slice %37 {offsets = [0, 64], sizes = [8, 64], strides = [1, 1]} : vector<8x128xf32> to vector<8x64xf32>
    %54 = tpu.concatenate %52, %53 in 0 : vector<8x64xf32>, vector<8x64xf32> -> vector<16x64xf32>
    %c0_25 = arith.constant 0 : index
    %c0_26 = arith.constant 0 : index
    %55 = vector.load %arg7[%c0_25, %c0_26] : memref<64x64xf32, #tpu.memory_space<vmem>>, vector<64x64xf32>
    %cst_27 = arith.constant dense<0.000000e+00> : vector<16x64xf32>
    %56 = tpu.matmul %54, %55, %cst_27 {dimension_numbers = #tpu.dot_dimension_numbers<[1], [0], [0], [1], [0, 0, 1, 1], [], []>} : vector<16x64xf32>, vector<64x64xf32>, vector<16x64xf32> -> vector<16x64xf32>
    %c0_28 = arith.constant 0 : index
    %c0_29 = arith.constant 0 : index
    %57 = vector.load %arg8[%c0_28, %c0_29] : memref<1x64xf32, #tpu.memory_space<vmem>>, vector<1x64xf32>
    %58 = vector.broadcast %57 : vector<1x64xf32> to vector<16x64xf32>
    %59 = arith.addf %56, %58 : vector<16x64xf32>
    %c0_30 = arith.constant 0 : index
    %c0_31 = arith.constant 0 : index
    %60 = vector.load %arg10[%c0_30, %c0_31] : memref<16x64xf32, #tpu.memory_space<vmem>>, vector<16x64xf32>
    tpu.vector_store %arg10[%c0_30, %c0_31], %59 {strides = array<i32>} : memref<16x64xf32, #tpu.memory_space<vmem>>, vector<16x64xf32>,
    return
  }
  func.func @transform_0(%arg0: i32) -> (i32, i32) {
    %c0_i32 = arith.constant 0 : i32
    %c0_i32_0 = arith.constant 0 : i32
    %c0_i32_1 = arith.constant 0 : i32
    return %c0_i32, %c0_i32_0 : i32, i32
  }
  func.func @transform_1(%arg0: i32) -> (i32, i32, i32) {
    %c0_i32 = arith.constant 0 : i32
    %c0_i32_0 = arith.constant 0 : i32
    %c0_i32_1 = arith.constant 0 : i32
    %c0_i32_2 = arith.constant 0 : i32
    return %c0_i32, %c0_i32_0, %c0_i32_1 : i32, i32, i32
  }
  func.func @transform_2(%arg0: i32) -> (i32, i32) {
    %c0_i32 = arith.constant 0 : i32
    %c0_i32_0 = arith.constant 0 : i32
    %c0_i32_1 = arith.constant 0 : i32
    return %c0_i32, %c0_i32_0 : i32, i32
  }
  func.func @transform_3(%arg0: i32) -> (i32, i32) {
    %c0_i32 = arith.constant 0 : i32
    %c0_i32_0 = arith.constant 0 : i32
    %c0_i32_1 = arith.constant 0 : i32
    return %c0_i32, %c0_i32_0 : i32, i32
  }
  func.func @transform_4(%arg0: i32) -> (i32, i32) {
    %c0_i32 = arith.constant 0 : i32
    %c0_i32_0 = arith.constant 0 : i32
    %c0_i32_1 = arith.constant 0 : i32
    return %c0_i32, %c0_i32_0 : i32, i32
  }
  func.func @transform_5(%arg0: i32) -> (i32, i32) {
    %c0_i32 = arith.constant 0 : i32
    %c0_i32_0 = arith.constant 0 : i32
    %c0_i32_1 = arith.constant 0 : i32
    return %c0_i32, %c0_i32_0 : i32, i32
  }
  func.func @transform_6(%arg0: i32) -> (i32, i32) {
    %c0_i32 = arith.constant 0 : i32
    %c0_i32_0 = arith.constant 0 : i32
    %c0_i32_1 = arith.constant 0 : i32
    return %c0_i32, %c0_i32_0 : i32, i32
  }
  func.func @transform_7(%arg0: i32) -> (i32, i32) {
    %c0_i32 = arith.constant 0 : i32
    %c0_i32_0 = arith.constant 0 : i32
    %c0_i32_1 = arith.constant 0 : i32
    return %c0_i32, %c0_i32_0 : i32, i32
  }
  func.func @transform_8(%arg0: i32) -> (i32, i32) {
    %c0_i32 = arith.constant 0 : i32
    %c0_i32_0 = arith.constant 0 : i32
    %c0_i32_1 = arith.constant 0 : i32
    return %c0_i32, %c0_i32_0 : i32, i32
  }
  func.func @transform_9(%arg0: i32) -> (i32, i32) {
    %c0_i32 = arith.constant 0 : i32
    %c0_i32_0 = arith.constant 0 : i32
    %c0_i32_1 = arith.constant 0 : i32
    return %c0_i32, %c0_i32_0 : i32, i32
  }
  func.func @transform_10(%arg0: i32) -> (i32, i32) {
    %c0_i32 = arith.constant 0 : i32
    %c0_i32_0 = arith.constant 0 : i32
    %c0_i32_1 = arith.constant 0 : i32
    return %c0_i32, %c0_i32_0 : i32, i32
  }
}

</mosaic_0001>

<bundles_post_ra>
// kernel: multihead_attention.1
= control target key start
LH: loop header
LB: loop body
LE: loop exit
PB: predicated region body
PF: predicated region fallthrough
CT: control target
= control target key end

     0   :  { %v7679_v5 = vmov 0.0|0.0   ;;  %v994_v14 = vlaneseq  ;;  %vm4344_vm0 = vmmov 0   ;;  %v4345_v32 = vmov 0.0   ;;  %s7668_s0 = inlined_call_operand.vmem [shape: f32[8,128], index: 0, kind: input, shape index: {}]   ;;  %s7669_s1 = inlined_call_operand.vmem [shape: f32[64,8,128], index: 1, kind: input, shape index: {}]   ;;  %s7670_s2 = inlined_call_operand.vmem [shape: f32[128,128], index: 2, kind: input, shape index: {}]   ;;  %s7671_s3 = inlined_call_operand.vmem [shape: f32[1,128], index: 3, kind: input, shape index: {}]   ;;  %s7672_s4 = inlined_call_operand.vmem [shape: f32[128,128], index: 4, kind: input, shape index: {}]   ;;  %s7673_s5 = inlined_call_operand.vmem [shape: f32[1,128], index: 5, kind: input, shape index: {}]   ;;  %s7674_s6 = inlined_call_operand.vmem [shape: f32[64,64], index: 6, kind: input, shape index: {}]   ;;  %s7675_s7 = inlined_call_operand.vmem [shape: f32[1,64], index: 7, kind: input, shape index: {}]   ;;  %s7676_s8 = inlined_call_operand.vmem [shape: f32[64,8], index: 8, kind: input, shape index: {}]   ;;  %s7677_s9 = inlined_call_operand.hbm [shape: f32[16,64], index: 9, kind: output, shape index: {0}]   ;;  %s7678_s10 = inlined_call_operand.vmem [shape: f32[8,128], index: 10, kind: output, shape index: {1}]  }
   0x1   :  { %v193_v0 = vld [vmem:[%s7672_s4] sm:$0xff]  ;;  %v194_v1 = vld [vmem:[%s7672_s4 + $0x8] sm:$0xff]  ;;  %v195_v2 = vld [vmem:[%s7672_s4 + $0x10] sm:$0xff]  ;;  %4078 = vmatprep.subr.bf16.mxu0 %v7679_v5  ;;  %3893 = vmatprep.mubr.msk.f32.mxu0 %vm4344_vm0, %v4345_v32 }
   0x2   :  { %v4102_v3 = vpack.c.bf16 %v194_v1, %v193_v0  ;;  %v196_v4 = vld [vmem:[%s7672_s4 + $0x18] sm:$0xff]  ;;  %v197_v7 = vld [vmem:[%s7672_s4 + $0x20] sm:$0xff]  ;;  %v198_v8 = vld [vmem:[%s7672_s4 + $0x28] sm:$0xff]  ;;  %v995_v18 = vshrl.u32 %v994_v14, 7  ;;  %v2786_v27 = vand.u32 127, %v994_v14 }
   0x3   :  { %v4106_v6 = vpack.c.bf16 %v196_v4, %v195_v2  ;;  %v4110_v9 = vpack.c.bf16 %v198_v8, %v197_v7  ;;  %v129_v10 = vld [vmem:[%s7669_s1] sm:$0xff]  ;;  %v199_v11 = vld [vmem:[%s7672_s4 + $0x30] sm:$0xff]  ;;  %v200_v12 = vld [vmem:[%s7672_s4 + $0x38] sm:$0xff] }
   0x4   :  { %4103 = vmatprep.subr.bf16.mxu1 %v4102_v3  ;;  %3928 = vmatprep.mubr.f32.mxu1 %v129_v10  ;;  %v4114_v13 = vpack.c.bf16 %v200_v12, %v199_v11  ;;  %v201_v15 = vld [vmem:[%s7672_s4 + $0x40] sm:$0xff]  ;;  %v202_v16 = vld [vmem:[%s7672_s4 + $0x48] sm:$0xff]  ;;  %v203_v19 = vld [vmem:[%s7672_s4 + $0x50] sm:$0xff]  ;;  %v4451_v24 = vsub.s32 0, %v995_v18  ;;  %v4453_v25 = vsub.s32 1, %v995_v18  ;;  %v4455_v26 = vsub.s32 2, %v995_v18 }
   0x5   :  { %4105 = vmatpush3.bf16.msra.mxu1 %v4102_v3  ;;  %v4118_v17 = vpack.c.bf16 %v202_v16, %v201_v15  ;;  %v204_v20 = vld [vmem:[%s7672_s4 + $0x58] sm:$0xff]  ;;  %v205_v22 = vld [vmem:[%s7672_s4 + $0x60] sm:$0xff]  ;;  %v206_v23 = vld [vmem:[%s7672_s4 + $0x68] sm:$0xff]  ;;  %v4477_v37 = vsub.s32 3, %v995_v18  ;;  %v4490_v43 = vsub.s32 4, %v995_v18  ;;  %v4492_v44 = vsub.s32 %v2786_v27, %v995_v18 }
   0x6   :  { %4107 = vmatprep.subr.bf16.mxu1 %v4106_v6  ;;  %v4122_v21 = vpack.c.bf16 %v204_v20, %v203_v19  ;;  %v4126_v28 = vpack.c.bf16 %v206_v23, %v205_v22  ;;  %v36_v29 = vld [vmem:[%s7670_s2] sm:$0xff]  ;;  %v37_v30 = vld [vmem:[%s7670_s2 + $0x8] sm:$0xff]  ;;  %v38_v35 = vld [vmem:[%s7670_s2 + $0x10] sm:$0xff]  ;;  %vm3484_vm1 = vcmp.eq.s32.totalorder %v995_v18, %v2786_v27  ;;  %v4503_v49 = vsub.s32 5, %v995_v18 }
   0x7   :  { %v4466_v31 = vld [vmem:[%s7676_s8] sm:$0xff]  ;;  %v4079_v33 = vpack.c.bf16 %v37_v30, %v36_v29  ;;  %v207_v38 = vld [vmem:[%s7672_s4 + $0x70] sm:$0xff]  ;;  %v208_v39 = vld [vmem:[%s7672_s4 + $0x78] sm:$0xff]  ;;  %7909 = vst [vmem:[#allocation5_spill] sm:$0xff] %v4492_v44  ;;  %v4506_v50 = vsel %vm3484_vm1, 1.0, %v4345_v32  ;;  %v4517_v55 = vsub.s32 6, %v995_v18 }
   0x8   :  { %v997_v34 = vrot.slane %v4466_v31, %v4451_v24  ;;  %v1004_v36 = vrot.slane %v4466_v31, %v4453_v25  ;;  %v39_v40 = vld [vmem:[%s7670_s2 + $0x18] sm:$0xff]  ;;  %v1011_v42 = vrot.slane %v4466_v31, %v4455_v26  ;;  %v40_v45 = vld [vmem:[%s7670_s2 + $0x20] sm:$0xff]  ;;  %v41_v46 = vld [vmem:[%s7670_s2 + $0x28] sm:$0xff]  ;;  %v4130_v47 = vpack.c.bf16 %v208_v39, %v207_v38  ;;  %7910 = vst [vmem:[#allocation6_spill] sm:$0xff] %v4506_v50 }
   0x9   :  { %4109 = vmatpush3.bf16.msra.mxu1 %v4106_v6  ;;  %4080 = vmatpush3.bf16.msra.mxu0 %v4079_v33  ;;  %v4082_v41 = vpack.c.bf16 %v39_v40, %v38_v35  ;;  %v1018_v48 = vrot.slane %v4466_v31, %v4477_v37  ;;  %v4085_v51 = vpack.c.bf16 %v41_v46, %v40_v45  ;;  %v42_v53 = vld [vmem:[%s7670_s2 + $0x30] sm:$0xff]  ;;  %v43_v54 = vld [vmem:[%s7670_s2 + $0x38] sm:$0xff]  ;;  %v4521_v57 = vsub.s32 7, %v995_v18  ;;  %v130_v59 = vld [vmem:[%s7669_s1 + $0x8] sm:$0xff] }
   0xa   :  { %4111 = vmatprep.subr.bf16.mxu1 %v4110_v9  ;;  %999 = vbcast.lane.b32.xlu0 %v997_v34, 256  ;;  %v1025_v52 = vrot.slane %v4466_v31, %v4490_v43  ;;  %v1032_v56 = vrot.slane %v4466_v31, %v4503_v49  ;;  %v4088_v58 = vpack.c.bf16 %v43_v54, %v42_v53  ;;  %v44_v61 = vld [vmem:[%s7670_s2 + $0x40] sm:$0xff]  ;;  %v45_v62 = vld [vmem:[%s7670_s2 + $0x48] sm:$0xff]  ;;  %v131_v63 = vld [vmem:[%s7669_s1 + $0x10] sm:$0xff] }
   0xb   :  { %4081 = vmatprep.subr.bf16.mxu0 %v7679_v5  ;;  %1006 = vbcast.lane.b32.xlu1 %v1004_v36, 256  ;;  %v1039_v60 = vrot.slane %v4466_v31, %v4517_v55  ;;  %v1046_v0 = vrot.slane %v4466_v31, %v4521_v57  ;;  %v987_v1 = vld [vmem:[%s7676_s8 + $0x8] sm:$0xff]  ;;  %v4091_v2 = vpack.c.bf16 %v45_v62, %v44_v61 }
   0xd   :  { %4113 = vmatpush3.bf16.msra.mxu1 %v4110_v9  ;;  %4083 = vmatpush3.bf16.msra.mxu0 %v4082_v41 }
   0xe   :  { %4115 = vmatprep.subr.bf16.mxu1 %v4114_v13  ;;  %1013 = vbcast.lane.b32.xlu0 %v1011_v42, 256 }
   0xf   :  { %4084 = vmatprep.subr.bf16.mxu0 %v7679_v5  ;;  %1020 = vbcast.lane.b32.xlu1 %v1018_v48, 256 }
  0x11   :  { %4117 = vmatpush3.bf16.msra.mxu1 %v4114_v13  ;;  %4086 = vmatpush3.bf16.msra.mxu0 %v4085_v51 }
  0x12   :  { %4119 = vmatprep.subr.bf16.mxu1 %v4118_v17  ;;  %1027 = vbcast.lane.b32.xlu0 %v1025_v52, 256 }
  0x13   :  { %4087 = vmatprep.subr.bf16.mxu0 %v7679_v5  ;;  %1034 = vbcast.lane.b32.xlu1 %v1032_v56, 256 }
  0x15   :  { %4121 = vmatpush3.bf16.msra.mxu1 %v4118_v17  ;;  %4089 = vmatpush3.bf16.msra.mxu0 %v4088_v58 }
  0x16   :  { %4123 = vmatprep.subr.bf16.mxu1 %v4122_v21 }
  0x19   :  { %4125 = vmatpush3.bf16.msra.mxu1 %v4122_v21 }
  0x1a   :  { %4127 = vmatprep.subr.bf16.mxu1 %v4126_v28 }
  0x1d   :  { %4129 = vmatpush3.bf16.msra.mxu1 %v4126_v28 }
  0x1e   :  { %4131 = vmatprep.subr.bf16.mxu1 %v4130_v47 }
  0x21   :  { %4133 = vmatpush3.bf16.msra.mxu1 %v4130_v47 }
  0x24   :  { %3929 = vmatmul.mubr.f32.vlgmr.msra.gmra.mrb[0].mxu1 %v130_v59 }
  0x25   :  { %16 = vsyncpa [#allocation3], 0  ;;  %3931 = vmatprep.mubr.f32.mxu1 %v131_v63  ;;  %v132_v3 = vld [vmem:[%s7669_s1 + $0x18] sm:$0xff]  ;;  %1041 = vbcast.lane.b32.xlu0 %v1039_v60, 256  ;;  %v1053_v4 = vrot.slane %v987_v1, %v4451_v24  ;;  %v46_v6 = vld [vmem:[%s7670_s2 + $0x50] sm:$0xff]  ;;  %v1060_v9 = vrot.slane %v987_v1, %v4453_v25  ;;  %v1067_v12 = vrot.slane %v987_v1, %v4455_v26  ;;  %s4346_s24 = smov 64  }
  0x26   :  { %v47_v7 = vld [vmem:[%s7670_s2 + $0x58] sm:$0xff]  ;;  %v133_v8 = vld [vmem:[%s7669_s1 + $0x20] sm:$0xff]  ;;  %4090 = vmatprep.subr.bf16.mxu0 %v7679_v5  ;;  %1048 = vbcast.lane.b32.xlu1 %v1046_v0, 256  ;;  %v134_v11 = vld [vmem:[%s7669_s1 + $0x28] sm:$0xff]  ;;  %v1074_v16 = vrot.slane %v987_v1, %v4477_v37  ;;  %v1081_v19 = vrot.slane %v987_v1, %v4490_v43  ;;  %v1088_v23 = vrot.slane %v987_v1, %v4503_v49  ;;  %vm857_vm2 = vcmask 523264  }
  0x27   :  { %4092 = vmatpush3.bf16.msra.mxu0 %v4091_v2  ;;  %v4094_v10 = vpack.c.bf16 %v47_v7, %v46_v6  ;;  %v48_v13 = vld [vmem:[%s7670_s2 + $0x60] sm:$0xff]  ;;  %v49_v14 = vld [vmem:[%s7670_s2 + $0x68] sm:$0xff]  ;;  %v135_v15 = vld [vmem:[%s7669_s1 + $0x30] sm:$0xff]  ;;  %v1095_v29 = vrot.slane %v987_v1, %v4517_v55  ;;  %v1102_v31 = vrot.slane %v987_v1, %v4521_v57  ;;  %vm3043_vm3 = vcmask 1041409  }
  0x28   :  { %3932 = vmatmul.mubr.f32.gmra.mrb[2].mxu1 %v132_v3  ;;  %4093 = vmatprep.subr.bf16.mxu0 %v7679_v5  ;;  %v4097_v17 = vpack.c.bf16 %v49_v14, %v48_v13  ;;  %v136_v18 = vld [vmem:[%s7669_s1 + $0x38] sm:$0xff]  ;;  %v50_v20 = vld [vmem:[%s7670_s2 + $0x70] sm:$0xff]  ;;  %v137_v22 = vld [vmem:[%s7669_s1 + $0x40] sm:$0xff]  ;;  %vm3045_vm4 = vcmask 1042434   ;;  %vm3047_vm5 = vcmask 1043459   ;;  %vm3049_vm6 = vcmask 1044484  }
  0x29   :  { %3934 = vmatprep.mubr.f32.mxu1 %v133_v8  ;;  %1055 = vbcast.lane.b32.xlu0 %v1053_v4, 256  ;;  %v51_v21 = vld [vmem:[%s7670_s2 + $0x78] sm:$0xff]  ;;  %v138_v28 = vld [vmem:[%s7669_s1 + $0x48] sm:$0xff]  ;;  %v139_v30 = vld [vmem:[%s7669_s1 + $0x50] sm:$0xff]  ;;  %vm3051_vm7 = vcmask 1045509   ;;  %vm3053_vm8 = vcmask 1046534  }
  0x2a   :  { %1062 = vbcast.lane.b32.xlu1 %v1060_v9, 256  ;;  %v4100_v27 = vpack.c.bf16 %v51_v21, %v50_v20  ;;  %v988_v33 = vld [vmem:[%s7676_s8 + $0x10] sm:$0xff]  ;;  %v35_v34 = vld [vmem:[%s7668_s0] sm:$0xff]  ;;  %v140_v35 = vld [vmem:[%s7669_s1 + $0x58] sm:$0xff]  ;;  %vm3055_vm9 = vcmask 1047559   ;;  %vm3487_vm10 = vcmask 64512  }
  0x2b   :  { %4095 = vmatpush3.bf16.msra.mxu0 %v4094_v10  ;;  %v1109_v36 = vrot.slane %v988_v33, %v4451_v24  ;;  %v141_v38 = vld [vmem:[%s7669_s1 + $0x60] sm:$0xff]  ;;  %v1116_v39 = vrot.slane %v988_v33, %v4453_v25  ;;  %v142_v40 = vld [vmem:[%s7669_s1 + $0x68] sm:$0xff]  ;;  %v1123_v41 = vrot.slane %v988_v33, %v4455_v26  ;;  %v143_v42 = vld [vmem:[%s7669_s1 + $0x70] sm:$0xff]  ;;  %v1130_v45 = vrot.slane %v988_v33, %v4477_v37 }
  0x2c   :  { %3935 = vmatmul.mubr.f32.gmra.mrb[4].mxu1 %v134_v11  ;;  %4096 = vmatprep.subr.bf16.mxu0 %v7679_v5  ;;  %v1137_v46 = vrot.slane %v988_v33, %v4490_v43  ;;  %v145_v47 = vld [vmem:[%s7669_s1 + $0x80] sm:$0xff]  ;;  %v1144_v48 = vrot.slane %v988_v33, %v4503_v49  ;;  %v146_v51 = vld [vmem:[%s7669_s1 + $0x88] sm:$0xff]  ;;  %v1151_v52 = vrot.slane %v988_v33, %v4517_v55  ;;  %v147_v53 = vld [vmem:[%s7669_s1 + $0x90] sm:$0xff] }
  0x2d   :  { %3937 = vmatprep.mubr.f32.mxu1 %v135_v15  ;;  %1069 = vbcast.lane.b32.xlu0 %v1067_v12, 256  ;;  %v1158_v54 = vrot.slane %v988_v33, %v4521_v57  ;;  %v989_v56 = vld [vmem:[%s7676_s8 + $0x18] sm:$0xff]  ;;  %v149_v60 = vld [vmem:[%s7669_s1 + $0xa0] sm:$0xff]  ;;  %v150_v62 = vld [vmem:[%s7669_s1 + $0xa8] sm:$0xff] }
  0x2e   :  { %1076 = vbcast.lane.b32.xlu1 %v1074_v16, 256  ;;  %v148_v58 = vld [vmem:[%s7669_s1 + $0x98] sm:$0xff]  ;;  %v1165_v59 = vrot.slane %v989_v56, %v4451_v24  ;;  %v1172_v61 = vrot.slane %v989_v56, %v4453_v25  ;;  %v1179_v63 = vrot.slane %v989_v56, %v4455_v26  ;;  %v151_v0 = vld [vmem:[%s7669_s1 + $0xb0] sm:$0xff]  ;;  %v1186_v1 = vrot.slane %v989_v56, %v4477_v37  ;;  %v153_v4 = vld [vmem:[%s7669_s1 + $0xc0] sm:$0xff] }
  0x2f   :  { %4098 = vmatpush3.bf16.msra.mxu0 %v4097_v17  ;;  %v152_v2 = vld [vmem:[%s7669_s1 + $0xb8] sm:$0xff]  ;;  %v1193_v3 = vrot.slane %v989_v56, %v4490_v43  ;;  %v1200_v6 = vrot.slane %v989_v56, %v4503_v49  ;;  %v154_v7 = vld [vmem:[%s7669_s1 + $0xc8] sm:$0xff]  ;;  %v1207_v8 = vrot.slane %v989_v56, %v4517_v55  ;;  %v155_v9 = vld [vmem:[%s7669_s1 + $0xd0] sm:$0xff]  ;;  %v1214_v10 = vrot.slane %v989_v56, %v4521_v57 }
  0x30   :  { %3938 = vmatmul.mubr.f32.gmra.mrb[6].mxu1 %v136_v18  ;;  %4099 = vmatprep.subr.bf16.mxu0 %v7679_v5  ;;  %v990_v11 = vld [vmem:[%s7676_s8 + $0x20] sm:$0xff]  ;;  %v156_v12 = vld [vmem:[%s7669_s1 + $0xd8] sm:$0xff]  ;;  %v158_v16 = vld [vmem:[%s7669_s1 + $0xe8] sm:$0xff] }
  0x31   :  { %3940 = vmatprep.mubr.f32.mxu1 %v137_v22  ;;  %1083 = vbcast.lane.b32.xlu0 %v1081_v19, 256  ;;  %v1221_v13 = vrot.slane %v990_v11, %v4451_v24  ;;  %v157_v14 = vld [vmem:[%s7669_s1 + $0xe0] sm:$0xff]  ;;  %v1228_v15 = vrot.slane %v990_v11, %v4453_v25  ;;  %v1235_v17 = vrot.slane %v990_v11, %v4455_v26  ;;  %v159_v18 = vld [vmem:[%s7669_s1 + $0xf0] sm:$0xff]  ;;  %v160_v20 = vld [vmem:[%s7669_s1 + $0xf8] sm:$0xff] }
  0x32   :  { %1090 = vbcast.lane.b32.xlu1 %v1088_v23, 256  ;;  %v1242_v19 = vrot.slane %v990_v11, %v4477_v37  ;;  %v1249_v21 = vrot.slane %v990_v11, %v4490_v43  ;;  %v161_v22 = vld [vmem:[%s7669_s1 + $0x100] sm:$0xff]  ;;  %v1256_v23 = vrot.slane %v990_v11, %v4503_v49  ;;  %v164_v33 = vld [vmem:[%s7669_s1 + $0x118] sm:$0xff]  ;;  %vm7210_vm11 = vmpackc.low %vm3487_vm10, %vm3487_vm10 }
  0x33   :  { %4101 = vmatpush3.bf16.msra.mxu0 %v4100_v27  ;;  %v162_v27 = vld [vmem:[%s7669_s1 + $0x108] sm:$0xff] }
  0x34   :  { %3941 = vmatmul.mubr.f32.gmra.mrb[8].mxu1 %v138_v28  ;;  %4134 = vmatprep.subr.bf16.mxu0 %v7679_v5  ;;  %v1263_v28 = vrot.slane %v990_v11, %v4517_v55 }
  0x35   :  { %3943 = vmatprep.mubr.f32.mxu1 %v139_v30  ;;  %1097 = vbcast.lane.b32.xlu0 %v1095_v29, 256  ;;  %v163_v29 = vld [vmem:[%s7669_s1 + $0x110] sm:$0xff]  ;;  %v1270_v30 = vrot.slane %v990_v11, %v4521_v57 }
  0x36   :  { %1104 = vbcast.lane.b32.xlu1 %v1102_v31, 256  ;;  %3894 = vmatmul.mubr.f32.vlgmr.msra.gmra.mrb[0].mxu0 %v35_v34  ;;  %v991_v31 = vld [vmem:[%s7676_s8 + $0x28] sm:$0xff] }
  0x37   :  { %4056 = vmatprep.mubr.msk.f32.mxu0 %vm4344_vm0, %v4345_v32  ;;  %v144_v32 = vld [vmem:[%s7669_s1 + $0x78] sm:$0xff]  ;;  %v1277_v34 = vrot.slane %v991_v31, %v4451_v24 }
  0x38   :  { %3944 = vmatmul.mubr.f32.gmra.mrb[10].mxu1 %v140_v35  ;;  %v165_v35 = vld [vmem:[%s7669_s1 + $0x120] sm:$0xff] }
  0x39   :  { %3946 = vmatprep.mubr.f32.mxu1 %v141_v38  ;;  %1111 = vbcast.lane.b32.xlu0 %v1109_v36, 256  ;;  %v1284_v36 = vrot.slane %v991_v31, %v4453_v25  ;;  %v166_v38 = vld [vmem:[%s7669_s1 + $0x128] sm:$0xff] }
  0x3a   :  { %1118 = vbcast.lane.b32.xlu1 %v1116_v39, 256  ;;  %v1291_v39 = vrot.slane %v991_v31, %v4455_v26 }
  0x3c   :  { %3947 = vmatmul.mubr.f32.gmra.mrb[12].mxu1 %v142_v40  ;;  %v167_v40 = vld [vmem:[%s7669_s1 + $0x130] sm:$0xff] }
  0x3d   :  { %3949 = vmatprep.mubr.f32.mxu1 %v143_v42  ;;  %1125 = vbcast.lane.b32.xlu0 %v1123_v41, 256  ;;  %v1298_v41 = vrot.slane %v991_v31, %v4477_v37  ;;  %v168_v42 = vld [vmem:[%s7669_s1 + $0x138] sm:$0xff] }
  0x3e   :  { %1132 = vbcast.lane.b32.xlu1 %v1130_v45, 256  ;;  %v1305_v45 = vrot.slane %v991_v31, %v4490_v43 }
  0x40   :  { %3950 = vmatmul.mubr.f32.gmra.mrb[14].mxu1 %v144_v32  ;;  %v169_v32 = vld [vmem:[%s7669_s1 + $0x140] sm:$0xff] }
  0x41   :  { %3952 = vmatprep.mubr.f32.mxu1 %v145_v47  ;;  %1139 = vbcast.lane.b32.xlu0 %v1137_v46, 256  ;;  %v1312_v46 = vrot.slane %v991_v31, %v4503_v49  ;;  %v170_v47 = vld [vmem:[%s7669_s1 + $0x148] sm:$0xff] }
  0x42   :  { %1146 = vbcast.lane.b32.xlu1 %v1144_v48, 256  ;;  %v1319_v48 = vrot.slane %v991_v31, %v4517_v55 }
  0x44   :  { %3953 = vmatmul.mubr.f32.gmra.mrb[16].mxu1 %v146_v51  ;;  %v171_v51 = vld [vmem:[%s7669_s1 + $0x150] sm:$0xff] }
  0x45   :  { %3955 = vmatprep.mubr.f32.mxu1 %v147_v53  ;;  %1153 = vbcast.lane.b32.xlu0 %v1151_v52, 256  ;;  %v1326_v52 = vrot.slane %v991_v31, %v4521_v57  ;;  %v992_v53 = vld [vmem:[%s7676_s8 + $0x30] sm:$0xff] }
  0x46   :  { %1160 = vbcast.lane.b32.xlu1 %v1158_v54, 256  ;;  %v172_v54 = vld [vmem:[%s7669_s1 + $0x158] sm:$0xff]  ;;  %v1333_v56 = vrot.slane %v992_v53, %v4451_v24 }
  0x48   :  { %3956 = vmatmul.mubr.f32.gmra.mrb[18].mxu1 %v148_v58  ;;  %v173_v58 = vld [vmem:[%s7669_s1 + $0x160] sm:$0xff] }
  0x49   :  { %3958 = vmatprep.mubr.f32.mxu1 %v149_v60  ;;  %1167 = vbcast.lane.b32.xlu0 %v1165_v59, 256  ;;  %v1340_v59 = vrot.slane %v992_v53, %v4453_v25  ;;  %v174_v60 = vld [vmem:[%s7669_s1 + $0x168] sm:$0xff] }
  0x4a   :  { %1174 = vbcast.lane.b32.xlu1 %v1172_v61, 256  ;;  %v1347_v61 = vrot.slane %v992_v53, %v4455_v26 }
  0x4c   :  { %3959 = vmatmul.mubr.f32.gmra.mrb[20].mxu1 %v150_v62  ;;  %v175_v62 = vld [vmem:[%s7669_s1 + $0x170] sm:$0xff] }
  0x4d   :  { %3961 = vmatprep.mubr.f32.mxu1 %v151_v0  ;;  %1181 = vbcast.lane.b32.xlu0 %v1179_v63, 256  ;;  %v1354_v63 = vrot.slane %v992_v53, %v4477_v37  ;;  %v176_v0 = vld [vmem:[%s7669_s1 + $0x178] sm:$0xff] }
  0x4e   :  { %1188 = vbcast.lane.b32.xlu1 %v1186_v1, 256  ;;  %v1361_v1 = vrot.slane %v992_v53, %v4490_v43 }
  0x50   :  { %3962 = vmatmul.mubr.f32.gmra.mrb[22].mxu1 %v152_v2  ;;  %v177_v2 = vld [vmem:[%s7669_s1 + $0x180] sm:$0xff] }
  0x51   :  { %3964 = vmatprep.mubr.f32.mxu1 %v153_v4  ;;  %1195 = vbcast.lane.b32.xlu0 %v1193_v3, 256  ;;  %v1368_v3 = vrot.slane %v992_v53, %v4503_v49  ;;  %v178_v4 = vld [vmem:[%s7669_s1 + $0x188] sm:$0xff] }
  0x52   :  { %1202 = vbcast.lane.b32.xlu1 %v1200_v6, 256  ;;  %v1375_v6 = vrot.slane %v992_v53, %v4517_v55 }
  0x54   :  { %3965 = vmatmul.mubr.f32.gmra.mrb[24].mxu1 %v154_v7  ;;  %v179_v7 = vld [vmem:[%s7669_s1 + $0x190] sm:$0xff] }
  0x55   :  { %3967 = vmatprep.mubr.f32.mxu1 %v155_v9  ;;  %1209 = vbcast.lane.b32.xlu0 %v1207_v8, 256  ;;  %v1382_v8 = vrot.slane %v992_v53, %v4521_v57  ;;  %v993_v9 = vld [vmem:[%s7676_s8 + $0x38] sm:$0xff] }
  0x56   :  { %1216 = vbcast.lane.b32.xlu1 %v1214_v10, 256  ;;  %v180_v10 = vld [vmem:[%s7669_s1 + $0x198] sm:$0xff]  ;;  %v1389_v11 = vrot.slane %v993_v9, %v4451_v24  ;;  %v183_v24 = vld [vmem:[%s7669_s1 + $0x1b0] sm:$0xff] }
  0x58   :  { %3968 = vmatmul.mubr.f32.gmra.mrb[26].mxu1 %v156_v12  ;;  %v181_v12 = vld [vmem:[%s7669_s1 + $0x1a0] sm:$0xff] }
  0x59   :  { %3970 = vmatprep.mubr.f32.mxu1 %v157_v14  ;;  %1223 = vbcast.lane.b32.xlu0 %v1221_v13, 256  ;;  %v1396_v13 = vrot.slane %v993_v9, %v4453_v25  ;;  %v182_v14 = vld [vmem:[%s7669_s1 + $0x1a8] sm:$0xff]  ;;  %v184_v25 = vld [vmem:[%s7669_s1 + $0x1b8] sm:$0xff] }
  0x5a   :  { %1230 = vbcast.lane.b32.xlu1 %v1228_v15, 256  ;;  %v1403_v15 = vrot.slane %v993_v9, %v4455_v26  ;;  %v185_v26 = vld [vmem:[%s7669_s1 + $0x1c0] sm:$0xff] }
  0x5c   :  { %3971 = vmatmul.mubr.f32.gmra.mrb[28].mxu1 %v158_v16  ;;  %v1410_v16 = vrot.slane %v993_v9, %v4477_v37  ;;  %v186_v37 = vld [vmem:[%s7669_s1 + $0x1c8] sm:$0xff] }
  0x5d   :  { %3973 = vmatprep.mubr.f32.mxu1 %v159_v18  ;;  %1237 = vbcast.lane.b32.xlu0 %v1235_v17, 256  ;;  %v1417_v17 = vrot.slane %v993_v9, %v4490_v43  ;;  %v1424_v18 = vrot.slane %v993_v9, %v4503_v49  ;;  %v187_v43 = vld [vmem:[%s7669_s1 + $0x1d0] sm:$0xff]  ;;  %v188_v49 = vld [vmem:[%s7669_s1 + $0x1d8] sm:$0xff] }
  0x5e   :  { %1244 = vbcast.lane.b32.xlu1 %v1242_v19, 256  ;;  %v1431_v19 = vrot.slane %v993_v9, %v4517_v55  ;;  %v190_v55 = vld [vmem:[%s7669_s1 + $0x1e8] sm:$0xff] }
  0x60   :  { %3974 = vmatmul.mubr.f32.gmra.mrb[30].mxu1 %v160_v20  ;;  %v1438_v20 = vrot.slane %v993_v9, %v4521_v57  ;;  %v191_v57 = vld [vmem:[%s7669_s1 + $0x1f0] sm:$0xff] }
  0x61   :  { %3976 = vmatprep.mubr.f32.mxu1 %v161_v22  ;;  %1251 = vbcast.lane.b32.xlu0 %v1249_v21, 256  ;;  %v189_v21 = vld [vmem:[%s7669_s1 + $0x1e0] sm:$0xff]  ;;  %v192_v22 = vld [vmem:[%s7669_s1 + $0x1f8] sm:$0xff] }
  0x62   :  { %1258 = vbcast.lane.b32.xlu1 %v1256_v23, 256 }
  0x64   :  { %3977 = vmatmul.mubr.f32.gmra.mrb[32].mxu1 %v162_v27 }
  0x65   :  { %3979 = vmatprep.mubr.f32.mxu1 %v163_v29  ;;  %1265 = vbcast.lane.b32.xlu0 %v1263_v28, 256 }
  0x66   :  { %1272 = vbcast.lane.b32.xlu1 %v1270_v30, 256 }
  0x68   :  { %3980 = vmatmul.mubr.f32.gmra.mrb[34].mxu1 %v164_v33 }
  0x69   :  { %3982 = vmatprep.mubr.f32.mxu1 %v165_v35  ;;  %1279 = vbcast.lane.b32.xlu0 %v1277_v34, 256 }
  0x6a   :  { %1286 = vbcast.lane.b32.xlu1 %v1284_v36, 256 }
  0x6c   :  { %3983 = vmatmul.mubr.f32.gmra.mrb[36].mxu1 %v166_v38 }
  0x6d   :  { %3985 = vmatprep.mubr.f32.mxu1 %v167_v40  ;;  %1293 = vbcast.lane.b32.xlu0 %v1291_v39, 256 }
  0x6e   :  { %1300 = vbcast.lane.b32.xlu1 %v1298_v41, 256 }
  0x70   :  { %3986 = vmatmul.mubr.f32.gmra.mrb[38].mxu1 %v168_v42 }
  0x71   :  { %3988 = vmatprep.mubr.f32.mxu1 %v169_v32  ;;  %1307 = vbcast.lane.b32.xlu0 %v1305_v45, 256 }
  0x72   :  { %1314 = vbcast.lane.b32.xlu1 %v1312_v46, 256 }
  0x74   :  { %3989 = vmatmul.mubr.f32.gmra.mrb[40].mxu1 %v170_v47 }
  0x75   :  { %3991 = vmatprep.mubr.f32.mxu1 %v171_v51  ;;  %1321 = vbcast.lane.b32.xlu0 %v1319_v48, 256 }
  0x76   :  { %1328 = vbcast.lane.b32.xlu1 %v1326_v52, 256 }
  0x78   :  { %3992 = vmatmul.mubr.f32.gmra.mrb[42].mxu1 %v172_v54 }
  0x79   :  { %3994 = vmatprep.mubr.f32.mxu1 %v173_v58  ;;  %1335 = vbcast.lane.b32.xlu0 %v1333_v56, 256  ;;  %v4881_v58 = vld [vmem:[%s7673_s5] ss:$0 sm:$0xff] }
  0x7a   :  { %1342 = vbcast.lane.b32.xlu1 %v1340_v59, 256 }
  0x7c   :  { %3995 = vmatmul.mubr.f32.gmra.mrb[44].mxu1 %v174_v60  ;;  %v4828_v23 = vpop.permute.xlu0 %999 }
  0x7d   :  { %3997 = vmatprep.mubr.f32.mxu1 %v175_v62  ;;  %1349 = vbcast.lane.b32.xlu0 %v1347_v61, 256  ;;  %v4830_v27 = vpop.permute.xlu1 %1006 }
  0x7e   :  { %1356 = vbcast.lane.b32.xlu1 %v1354_v63, 256 }
  0x80   :  { %3998 = vmatmul.mubr.f32.gmra.mrb[46].mxu1 %v176_v0  ;;  %v4832_v28 = vpop.permute.xlu0 %1013 }
  0x81   :  { %4000 = vmatprep.mubr.f32.mxu1 %v177_v2  ;;  %1363 = vbcast.lane.b32.xlu0 %v1361_v1, 256  ;;  %v4834_v29 = vpop.permute.xlu1 %1020 }
  0x82   :  { %1370 = vbcast.lane.b32.xlu1 %v1368_v3, 256 }
  0x84   :  { %4001 = vmatmul.mubr.f32.gmra.mrb[48].mxu1 %v178_v4  ;;  %v4836_v30 = vpop.permute.xlu0 %1027 }
  0x85   :  { %4003 = vmatprep.mubr.f32.mxu1 %v179_v7  ;;  %1377 = vbcast.lane.b32.xlu0 %v1375_v6, 256  ;;  %v4838_v31 = vpop.permute.xlu1 %1034 }
  0x86   :  { %1384 = vbcast.lane.b32.xlu1 %v1382_v8, 256 }
  0x88   :  { %4004 = vmatmul.mubr.f32.gmra.mrb[50].mxu1 %v180_v10 }
  0x89   :  { %4006 = vmatprep.mubr.f32.mxu1 %v181_v12  ;;  %1391 = vbcast.lane.b32.xlu0 %v1389_v11, 256 }
  0x8a   :  { %1398 = vbcast.lane.b32.xlu1 %v1396_v13, 256 }
  0x8c   :  { %4007 = vmatmul.mubr.f32.gmra.mrb[52].mxu1 %v182_v14 }
  0x8d   :  { %4009 = vmatprep.mubr.f32.mxu1 %v183_v24  ;;  %1405 = vbcast.lane.b32.xlu0 %v1403_v15, 256 }
  0x8e   :  { %1412 = vbcast.lane.b32.xlu1 %v1410_v16, 256 }
  0x90   :  { %4010 = vmatmul.mubr.f32.gmra.mrb[54].mxu1 %v184_v25 }
  0x91   :  { %4012 = vmatprep.mubr.f32.mxu1 %v185_v26  ;;  %1419 = vbcast.lane.b32.xlu0 %v1417_v17, 256 }
  0x92   :  { %1426 = vbcast.lane.b32.xlu1 %v1424_v18, 256 }
  0x94   :  { %4013 = vmatmul.mubr.f32.gmra.mrb[56].mxu1 %v186_v37 }
  0x95   :  { %4015 = vmatprep.mubr.f32.mxu1 %v187_v43  ;;  %1433 = vbcast.lane.b32.xlu0 %v1431_v19, 256 }
  0x96   :  { %1440 = vbcast.lane.b32.xlu1 %v1438_v20, 256 }
  0x97   :  { %v4840_v33 = vpop.permute.xlu0 %1041 }
  0x98   :  { %4016 = vmatmul.mubr.f32.gmra.mrb[58].mxu1 %v188_v49  ;;  %v4842_v34 = vpop.permute.xlu1 %1048 }
  0x99   :  { %4018 = vmatprep.mubr.f32.mxu1 %v189_v21 }
  0x9b   :  { %v4844_v35 = vpop.permute.xlu0 %1055 }
  0x9c   :  { %4019 = vmatmul.mubr.f32.gmra.mrb[60].mxu1 %v190_v55  ;;  %v4846_v36 = vpop.permute.xlu1 %1062 }
  0x9d   :  { %4021 = vmatprep.mubr.f32.mxu1 %v191_v57 }
  0x9f   :  { %v4848_v38 = vpop.permute.xlu0 %1069 }
  0xa0   :  { %4022 = vmatmul.mubr.f32.gmra.mrb[62].mxu1 %v192_v22  ;;  %v4850_v39 = vpop.permute.xlu1 %1076 }
  0xa3   :  { %v4852_v40 = vpop.permute.xlu0 %1083 }
  0xa4   :  { %v4854_v41 = vpop.permute.xlu1 %1090 }
  0xa7   :  { %v4856_v42 = vpop.permute.xlu0 %1097 }
  0xa8   :  { %7911 = vst [vmem:[#allocation7_spill] sm:$0xff] %v4856_v42  ;;  %v4858_v45 = vpop.permute.xlu1 %1104 }
  0xa9   :  { %7912 = vst [vmem:[#allocation8_spill] sm:$0xff] %v4858_v45 }
  0xab   :  { %v4860_v32 = vpop.permute.xlu0 %1111 }
  0xac   :  { %7913 = vst [vmem:[#allocation9_spill] sm:$0xff] %v4860_v32  ;;  %v4862_v46 = vpop.permute.xlu1 %1118 }
  0xad   :  { %7914 = vst [vmem:[#allocation10_spill] sm:$0xff] %v4862_v46 }
  0xaf   :  { %v4864_v47 = vpop.permute.xlu0 %1125 }
  0xb0   :  { %7915 = vst [vmem:[#allocation11_spill] sm:$0xff] %v4864_v47  ;;  %v4866_v48 = vpop.permute.xlu1 %1132 }
  0xb1   :  { %7916 = vst [vmem:[#allocation12_spill] sm:$0xff] %v4866_v48 }
  0xb3   :  { %v4868_v51 = vpop.permute.xlu0 %1139 }
  0xb4   :  { %7917 = vst [vmem:[#allocation13_spill] sm:$0xff] %v4868_v51  ;;  %v4870_v52 = vpop.permute.xlu1 %1146 }
  0xb5   :  { %7918 = vst [vmem:[#allocation14_spill] sm:$0xff] %v4870_v52 }
  0xb7   :  { %v4872_v53 = vpop.permute.xlu0 %1153 }
  0xb8   :  { %7919 = vst [vmem:[#allocation15_spill] sm:$0xff] %v4872_v53  ;;  %v4874_v54 = vpop.permute.xlu1 %1160 }
  0xb9   :  { %7920 = vst [vmem:[#allocation16_spill] sm:$0xff] %v4874_v54 }
  0xbb   :  { %v4876_v56 = vpop.permute.xlu0 %1167 }
  0xbc   :  { %7921 = vst [vmem:[#allocation17_spill] sm:$0xff] %v4876_v56  ;;  %v4886_v62 = vpop.permute.xlu1 %1174 }
  0xbd   :  { %7923 = vst [vmem:[#allocation19_spill] sm:$0xff] %v4886_v62 }
  0xbf   :  { %v4890_v63 = vpop.permute.xlu0 %1181 }
  0xc0   :  { %7924 = vst [vmem:[#allocation20_spill] sm:$0xff] %v4890_v63  ;;  %v4902_v4 = vpop.permute.xlu1 %1188 }
  0xc1   :  { %7927 = vst [vmem:[#allocation23_spill] sm:$0xff] %v4902_v4 }
  0xc3   :  { %v4907_v9 = vpop.permute.xlu0 %1195 }
  0xc4   :  { %7929 = vst [vmem:[#allocation25_spill] sm:$0xff] %v4907_v9  ;;  %v4919_v14 = vpop.permute.xlu1 %1202 }
  0xc5   :  { %7932 = vst [vmem:[#allocation28_spill] sm:$0xff] %v4919_v14 }
  0xc7   :  { %v4929_v16 = vpop.permute.xlu0 %1209 }
  0xc8   :  { %7935 = vst [vmem:[#allocation31_spill] sm:$0xff] %v4929_v16  ;;  %v4941_v37 = vpop.permute.xlu1 %1216 }
  0xc9   :  { %7938 = vst [vmem:[#allocation34_spill] sm:$0xff] %v4941_v37 }
  0xcb   :  { %v4947_v21 = vpop.permute.xlu0 %1223 }
  0xcc   :  { %7939 = vst [vmem:[#allocation35_spill] sm:$0xff] %v4947_v21 }
  0xf7   :  { %v3930_v59 = vpop.f32.mrb[0].mxu1 }
  0xf8   :  { %v4884_v60 = vadd.f32 %v3930_v59, %v4881_v58  ;;  %v282_v61 = vpop.f32.mrb[1].mxu1 }
  0xf9   :  { %v4893_v1 = vadd.f32 %v4881_v58, %v282_v61  ;;  %v4959_v61 = vpop.permute.xlu1 %1230 }
  0xfa   :  { %7922 = vst [vmem:[#allocation18_spill] sm:$0xff] %v4884_v60  ;;  %667 = vrot.lane.b32.xlu0 %v4884_v60, %s4346_s24  ;;  %7942 = vst [vmem:[#allocation38_spill] sm:$0xff] %v4959_v61 }
  0xfb   :  { %v3933_v0 = vpop.f32.mrb[2].mxu1  ;;  %7925 = vst [vmem:[#allocation21_spill] sm:$0xff] %v4893_v1 }
  0xfc   :  { %v4896_v2 = vadd.f32 %v3933_v0, %v4881_v58  ;;  %v292_v3 = vpop.f32.mrb[3].mxu1 }
  0xfd   :  { %v4905_v7 = vadd.f32 %v4881_v58, %v292_v3 }
  0xfe   :  { %7926 = vst [vmem:[#allocation22_spill] sm:$0xff] %v4896_v2  ;;  %671 = vrot.lane.b32.xlu1 %v4896_v2, %s4346_s24  ;;  %665 = vrot.lane.b32.xlu0 %v4893_v1, %s4346_s24 }
  0xff   :  { %v3936_v6 = vpop.f32.mrb[4].mxu1  ;;  %7928 = vst [vmem:[#allocation24_spill] sm:$0xff] %v4905_v7 }
 0x100   :  { %v302_v8 = vpop.f32.mrb[5].mxu1  ;;  %v4913_v11 = vadd.f32 %v3936_v6, %v4881_v58  ;;  %v4969_v6 = vpop.permute.xlu0 %1237 }
 0x101   :  { %v4910_v10 = vadd.f32 %v4881_v58, %v302_v8  ;;  %7945 = vst [vmem:[#allocation41_spill] sm:$0xff] %v4969_v6 }
 0x102   :  { %7931 = vst [vmem:[#allocation27_spill] sm:$0xff] %v4913_v11  ;;  %669 = vrot.lane.b32.xlu1 %v4905_v7, %s4346_s24 }
 0x103   :  { %7930 = vst [vmem:[#allocation26_spill] sm:$0xff] %v4910_v10  ;;  %v3939_v12 = vpop.f32.mrb[6].mxu1  ;;  %673 = vrot.lane.b32.xlu0 %v4910_v10, %s4346_s24 }
 0x104   :  { %v312_v13 = vpop.f32.mrb[7].mxu1  ;;  %v4925_v24 = vadd.f32 %v3939_v12, %v4881_v58 }
 0x105   :  { %v4922_v15 = vadd.f32 %v4881_v58, %v312_v13 }
 0x106   :  { %7934 = vst [vmem:[#allocation30_spill] sm:$0xff] %v4925_v24  ;;  %675 = vrot.lane.b32.xlu1 %v4913_v11, %s4346_s24 }
 0x107   :  { %7933 = vst [vmem:[#allocation29_spill] sm:$0xff] %v4922_v15  ;;  %v3942_v25 = vpop.f32.mrb[8].mxu1  ;;  %677 = vrot.lane.b32.xlu0 %v4922_v15, %s4346_s24 }
 0x108   :  { %v322_v17 = vpop.f32.mrb[9].mxu1  ;;  %v4937_v18 = vadd.f32 %v3942_v25, %v4881_v58 }
 0x109   :  { %v4934_v26 = vadd.f32 %v4881_v58, %v322_v17  ;;  %v4943_v19 = vpop.f32.mrb[0].mxu0  ;;  %v4981_v17 = vpop.permute.xlu1 %1244 }
 0x10a   :  { %7937 = vst [vmem:[#allocation33_spill] sm:$0xff] %v4937_v18  ;;  %679 = vrot.lane.b32.xlu1 %v4925_v24, %s4346_s24  ;;  %v3895_v20 = vpop.f32.mrb[1].mxu0  ;;  %7948 = vst [vmem:[#allocation44_spill] sm:$0xff] %v4981_v17 }
 0x10b   :  { %7936 = vst [vmem:[#allocation32_spill] sm:$0xff] %v4934_v26  ;;  %v3945_v43 = vpop.f32.mrb[10].mxu1  ;;  %681 = vrot.lane.b32.xlu0 %v4934_v26, %s4346_s24 }
 0x10c   :  { %v332_v49 = vpop.f32.mrb[11].mxu1  ;;  %v4953_v57 = vadd.f32 %v3945_v43, %v4881_v58 }
 0x10d   :  { %v4950_v55 = vadd.f32 %v4881_v58, %v332_v49  ;;  %v4985_v49 = vpop.permute.xlu0 %1251  ;;  %v4997_v5 = vpop.permute.xlu1 %1258 }
 0x10e   :  { %7941 = vst [vmem:[#allocation37_spill] sm:$0xff] %v4953_v57  ;;  %683 = vrot.lane.b32.xlu1 %v4937_v18, %s4346_s24  ;;  %7949 = vst [vmem:[#allocation45_spill] sm:$0xff] %v4985_v49 }
 0x10f   :  { %7940 = vst [vmem:[#allocation36_spill] sm:$0xff] %v4950_v55  ;;  %v3948_v22 = vpop.f32.mrb[12].mxu1  ;;  %685 = vrot.lane.b32.xlu0 %v4950_v55, %s4346_s24  ;;  %7952 = vst [vmem:[#allocation48_spill] sm:$0xff] %v4997_v5 }
 0x110   :  { %v342_v59 = vpop.f32.mrb[13].mxu1  ;;  %v4965_v3 = vadd.f32 %v3948_v22, %v4881_v58 }
 0x111   :  { %v4962_v0 = vadd.f32 %v4881_v58, %v342_v59 }
 0x112   :  { %7944 = vst [vmem:[#allocation40_spill] sm:$0xff] %v4965_v3  ;;  %687 = vrot.lane.b32.xlu1 %v4953_v57, %s4346_s24 }
 0x113   :  { %7943 = vst [vmem:[#allocation39_spill] sm:$0xff] %v4962_v0  ;;  %v3951_v8 = vpop.f32.mrb[14].mxu1  ;;  %689 = vrot.lane.b32.xlu0 %v4962_v0, %s4346_s24 }
 0x114   :  { %v352_v12 = vpop.f32.mrb[15].mxu1  ;;  %v4977_v25 = vadd.f32 %v3951_v8, %v4881_v58 }
 0x115   :  { %v4974_v13 = vadd.f32 %v4881_v58, %v352_v12 }
 0x116   :  { %7947 = vst [vmem:[#allocation43_spill] sm:$0xff] %v4977_v25  ;;  %691 = vrot.lane.b32.xlu1 %v4965_v3, %s4346_s24 }
 0x117   :  { %7946 = vst [vmem:[#allocation42_spill] sm:$0xff] %v4974_v13  ;;  %v3954_v43 = vpop.f32.mrb[16].mxu1  ;;  %693 = vrot.lane.b32.xlu0 %v4974_v13, %s4346_s24 }
 0x118   :  { %v362_v20 = vpop.f32.mrb[17].mxu1  ;;  %v4991_v59 = vadd.f32 %v3954_v43, %v4881_v58  ;;  %v5007_v43 = vpop.permute.xlu0 %1265 }
 0x119   :  { %v4988_v22 = vadd.f32 %v4881_v58, %v362_v20  ;;  %7955 = vst [vmem:[#allocation51_spill] sm:$0xff] %v5007_v43 }
 0x11a   :  { %7951 = vst [vmem:[#allocation47_spill] sm:$0xff] %v4991_v59  ;;  %695 = vrot.lane.b32.xlu1 %v4977_v25, %s4346_s24 }
 0x11b   :  { %7950 = vst [vmem:[#allocation46_spill] sm:$0xff] %v4988_v22  ;;  %v3957_v8 = vpop.f32.mrb[18].mxu1  ;;  %697 = vrot.lane.b32.xlu0 %v4988_v22, %s4346_s24 }
 0x11c   :  { %v372_v12 = vpop.f32.mrb[19].mxu1  ;;  %v5003_v44 = vadd.f32 %v3957_v8, %v4881_v58  ;;  %v5019_v8 = vpop.permute.xlu1 %1272 }
 0x11d   :  { %v5000_v50 = vadd.f32 %v4881_v58, %v372_v12  ;;  %7958 = vst [vmem:[#allocation54_spill] sm:$0xff] %v5019_v8  ;;  %v5023_v6 = vpop.permute.xlu0 %1279 }
 0x11e   :  { %7954 = vst [vmem:[#allocation50_spill] sm:$0xff] %v5003_v44  ;;  %699 = vrot.lane.b32.xlu1 %v4991_v59, %s4346_s24  ;;  %7959 = vst [vmem:[#allocation55_spill] sm:$0xff] %v5023_v6 }
 0x11f   :  { %7953 = vst [vmem:[#allocation49_spill] sm:$0xff] %v5000_v50  ;;  %v3960_v20 = vpop.f32.mrb[20].mxu1  ;;  %701 = vrot.lane.b32.xlu0 %v5000_v50, %s4346_s24 }
 0x120   :  { %v382_v49 = vpop.f32.mrb[21].mxu1  ;;  %v5015_v5 = vadd.f32 %v3960_v20, %v4881_v58  ;;  %v5035_v21 = vpop.permute.xlu1 %1286 }
 0x121   :  { %v5012_v17 = vadd.f32 %v4881_v58, %v382_v49  ;;  %7962 = vst [vmem:[#allocation58_spill] sm:$0xff] %v5035_v21 }
 0x122   :  { %7957 = vst [vmem:[#allocation53_spill] sm:$0xff] %v5015_v5  ;;  %703 = vrot.lane.b32.xlu1 %v5003_v44, %s4346_s24 }
 0x123   :  { %7956 = vst [vmem:[#allocation52_spill] sm:$0xff] %v5012_v17  ;;  %v3963_v12 = vpop.f32.mrb[22].mxu1  ;;  %705 = vrot.lane.b32.xlu0 %v5012_v17, %s4346_s24 }
 0x124   :  { %v392_v43 = vpop.f32.mrb[23].mxu1  ;;  %v5029_v49 = vadd.f32 %v3963_v12, %v4881_v58 }
 0x125   :  { %v5026_v61 = vadd.f32 %v4881_v58, %v392_v43  ;;  %v5045_v43 = vpop.permute.xlu0 %1293 }
 0x126   :  { %7961 = vst [vmem:[#allocation57_spill] sm:$0xff] %v5029_v49  ;;  %707 = vrot.lane.b32.xlu1 %v5015_v5, %s4346_s24  ;;  %7965 = vst [vmem:[#allocation61_spill] sm:$0xff] %v5045_v43 }
 0x127   :  { %7960 = vst [vmem:[#allocation56_spill] sm:$0xff] %v5026_v61  ;;  %v3966_v20 = vpop.f32.mrb[24].mxu1  ;;  %709 = vrot.lane.b32.xlu0 %v5026_v61, %s4346_s24 }
 0x128   :  { %v402_v8 = vpop.f32.mrb[25].mxu1  ;;  %v5041_v6 = vadd.f32 %v3966_v20, %v4881_v58 }
 0x129   :  { %v5038_v37 = vadd.f32 %v4881_v58, %v402_v8  ;;  %v5057_v8 = vpop.permute.xlu1 %1300  ;;  %v5061_v9 = vpop.permute.xlu0 %1307 }
 0x12a   :  { %7964 = vst [vmem:[#allocation60_spill] sm:$0xff] %v5041_v6  ;;  %711 = vrot.lane.b32.xlu1 %v5029_v49, %s4346_s24  ;;  %7968 = vst [vmem:[#allocation64_spill] sm:$0xff] %v5057_v8 }
 0x12b   :  { %7963 = vst [vmem:[#allocation59_spill] sm:$0xff] %v5038_v37  ;;  %v3969_v12 = vpop.f32.mrb[26].mxu1  ;;  %713 = vrot.lane.b32.xlu0 %v5038_v37, %s4346_s24  ;;  %7969 = vst [vmem:[#allocation65_spill] sm:$0xff] %v5061_v9 }
 0x12c   :  { %v412_v16 = vpop.f32.mrb[27].mxu1  ;;  %v5053_v21 = vadd.f32 %v3969_v12, %v4881_v58 }
 0x12d   :  { %v5050_v14 = vadd.f32 %v4881_v58, %v412_v16  ;;  %v5073_v63 = vpop.permute.xlu1 %1314 }
 0x12e   :  { %7967 = vst [vmem:[#allocation63_spill] sm:$0xff] %v5053_v21  ;;  %715 = vrot.lane.b32.xlu1 %v5041_v6, %s4346_s24  ;;  %7972 = vst [vmem:[#allocation68_spill] sm:$0xff] %v5073_v63 }
 0x12f   :  { %7966 = vst [vmem:[#allocation62_spill] sm:$0xff] %v5050_v14  ;;  %v3972_v20 = vpop.f32.mrb[28].mxu1  ;;  %717 = vrot.lane.b32.xlu0 %v5050_v14, %s4346_s24 }
 0x130   :  { %v422_v43 = vpop.f32.mrb[29].mxu1  ;;  %v5067_v16 = vadd.f32 %v3972_v20, %v4881_v58 }
 0x131   :  { %v5064_v4 = vadd.f32 %v4881_v58, %v422_v43  ;;  %v5083_v43 = vpop.permute.xlu0 %1321 }
 0x132   :  { %7971 = vst [vmem:[#allocation67_spill] sm:$0xff] %v5067_v16  ;;  %719 = vrot.lane.b32.xlu1 %v5053_v21, %s4346_s24  ;;  %7975 = vst [vmem:[#allocation71_spill] sm:$0xff] %v5083_v43 }
 0x133   :  { %7970 = vst [vmem:[#allocation66_spill] sm:$0xff] %v5064_v4  ;;  %v3975_v12 = vpop.f32.mrb[30].mxu1  ;;  %721 = vrot.lane.b32.xlu0 %v5064_v4, %s4346_s24 }
 0x134   :  { %v432_v8 = vpop.f32.mrb[31].mxu1  ;;  %v5079_v9 = vadd.f32 %v3975_v12, %v4881_v58 }
 0x135   :  { %v5076_v62 = vadd.f32 %v4881_v58, %v432_v8  ;;  %v5095_v8 = vpop.permute.xlu1 %1328  ;;  %v5099_v53 = vpop.permute.xlu0 %1335 }
 0x136   :  { %7974 = vst [vmem:[#allocation70_spill] sm:$0xff] %v5079_v9  ;;  %723 = vrot.lane.b32.xlu1 %v5067_v16, %s4346_s24  ;;  %7978 = vst [vmem:[#allocation74_spill] sm:$0xff] %v5095_v8 }
 0x137   :  { %7973 = vst [vmem:[#allocation69_spill] sm:$0xff] %v5076_v62  ;;  %v3978_v20 = vpop.f32.mrb[32].mxu1  ;;  %725 = vrot.lane.b32.xlu0 %v5076_v62, %s4346_s24  ;;  %7979 = vst [vmem:[#allocation75_spill] sm:$0xff] %v5099_v53 }
 0x138   :  { %v442_v56 = vpop.f32.mrb[33].mxu1  ;;  %v5091_v63 = vadd.f32 %v3978_v20, %v4881_v58 }
 0x139   :  { %v5088_v54 = vadd.f32 %v4881_v58, %v442_v56 }
 0x13a   :  { %7977 = vst [vmem:[#allocation73_spill] sm:$0xff] %v5091_v63  ;;  %727 = vrot.lane.b32.xlu1 %v5079_v9, %s4346_s24  ;;  %v5111_v9 = vpop.permute.xlu1 %1342 }
 0x13b   :  { %7976 = vst [vmem:[#allocation72_spill] sm:$0xff] %v5088_v54  ;;  %v3981_v12 = vpop.f32.mrb[34].mxu1  ;;  %729 = vrot.lane.b32.xlu0 %v5088_v54, %s4346_s24  ;;  %7982 = vst [vmem:[#allocation78_spill] sm:$0xff] %v5111_v9 }
 0x13c   :  { %v452_v43 = vpop.f32.mrb[35].mxu1  ;;  %v5105_v56 = vadd.f32 %v3981_v12, %v4881_v58 }
 0x13d   :  { %v5102_v52 = vadd.f32 %v4881_v58, %v452_v43  ;;  %v5121_v43 = vpop.permute.xlu0 %1349 }
 0x13e   :  { %7981 = vst [vmem:[#allocation77_spill] sm:$0xff] %v5105_v56  ;;  %731 = vrot.lane.b32.xlu1 %v5091_v63, %s4346_s24  ;;  %7985 = vst [vmem:[#allocation81_spill] sm:$0xff] %v5121_v43 }
 0x13f   :  { %7980 = vst [vmem:[#allocation76_spill] sm:$0xff] %v5102_v52  ;;  %v3984_v20 = vpop.f32.mrb[36].mxu1  ;;  %733 = vrot.lane.b32.xlu0 %v5102_v52, %s4346_s24 }
 0x140   :  { %v462_v8 = vpop.f32.mrb[37].mxu1  ;;  %v5117_v53 = vadd.f32 %v3984_v20, %v4881_v58 }
 0x141   :  { %v5114_v54 = vadd.f32 %v4881_v58, %v462_v8  ;;  %v5133_v8 = vpop.permute.xlu1 %1356 }
 0x142   :  { %7984 = vst [vmem:[#allocation80_spill] sm:$0xff] %v5117_v53  ;;  %735 = vrot.lane.b32.xlu1 %v5105_v56, %s4346_s24  ;;  %7988 = vst [vmem:[#allocation84_spill] sm:$0xff] %v5133_v8  ;;  %v5137_v56 = vpop.permute.xlu0 %1363 }
 0x143   :  { %7983 = vst [vmem:[#allocation79_spill] sm:$0xff] %v5114_v54  ;;  %v3987_v12 = vpop.f32.mrb[38].mxu1  ;;  %737 = vrot.lane.b32.xlu0 %v5114_v54, %s4346_s24  ;;  %7989 = vst [vmem:[#allocation85_spill] sm:$0xff] %v5137_v56 }
 0x144   :  { %v472_v63 = vpop.f32.mrb[39].mxu1  ;;  %v5129_v9 = vadd.f32 %v3987_v12, %v4881_v58 }
 0x145   :  { %v5126_v52 = vadd.f32 %v4881_v58, %v472_v63 }
 0x146   :  { %7987 = vst [vmem:[#allocation83_spill] sm:$0xff] %v5129_v9  ;;  %739 = vrot.lane.b32.xlu1 %v5117_v53, %s4346_s24  ;;  %v5149_v53 = vpop.permute.xlu1 %1370 }
 0x147   :  { %7986 = vst [vmem:[#allocation82_spill] sm:$0xff] %v5126_v52  ;;  %v3990_v20 = vpop.f32.mrb[40].mxu1  ;;  %741 = vrot.lane.b32.xlu0 %v5126_v52, %s4346_s24  ;;  %7992 = vst [vmem:[#allocation88_spill] sm:$0xff] %v5149_v53 }
 0x148   :  { %v482_v43 = vpop.f32.mrb[41].mxu1  ;;  %v5143_v63 = vadd.f32 %v3990_v20, %v4881_v58 }
 0x149   :  { %v5140_v54 = vadd.f32 %v4881_v58, %v482_v43  ;;  %v5159_v43 = vpop.permute.xlu0 %1377 }
 0x14a   :  { %7991 = vst [vmem:[#allocation87_spill] sm:$0xff] %v5143_v63  ;;  %743 = vrot.lane.b32.xlu1 %v5129_v9, %s4346_s24  ;;  %7995 = vst [vmem:[#allocation91_spill] sm:$0xff] %v5159_v43 }
 0x14b   :  { %7990 = vst [vmem:[#allocation86_spill] sm:$0xff] %v5140_v54  ;;  %v3993_v12 = vpop.f32.mrb[42].mxu1  ;;  %745 = vrot.lane.b32.xlu0 %v5140_v54, %s4346_s24 }
 0x14c   :  { %v492_v8 = vpop.f32.mrb[43].mxu1  ;;  %v5155_v56 = vadd.f32 %v3993_v12, %v4881_v58 }
 0x14d   :  { %v5152_v52 = vadd.f32 %v4881_v58, %v492_v8  ;;  %v5171_v8 = vpop.permute.xlu1 %1384 }
 0x14e   :  { %7994 = vst [vmem:[#allocation90_spill] sm:$0xff] %v5155_v56  ;;  %747 = vrot.lane.b32.xlu1 %v5143_v63, %s4346_s24  ;;  %7998 = vst [vmem:[#allocation94_spill] sm:$0xff] %v5171_v8  ;;  %v5175_v63 = vpop.permute.xlu0 %1391 }
 0x14f   :  { %7993 = vst [vmem:[#allocation89_spill] sm:$0xff] %v5152_v52  ;;  %v3996_v20 = vpop.f32.mrb[44].mxu1  ;;  %749 = vrot.lane.b32.xlu0 %v5152_v52, %s4346_s24  ;;  %7999 = vst [vmem:[#allocation95_spill] sm:$0xff] %v5175_v63 }
 0x150   :  { %v502_v9 = vpop.f32.mrb[45].mxu1  ;;  %v5167_v53 = vadd.f32 %v3996_v20, %v4881_v58 }
 0x151   :  { %v5164_v54 = vadd.f32 %v4881_v58, %v502_v9 }
 0x152   :  { %7997 = vst [vmem:[#allocation93_spill] sm:$0xff] %v5167_v53  ;;  %751 = vrot.lane.b32.xlu1 %v5155_v56, %s4346_s24  ;;  %v5187_v56 = vpop.permute.xlu1 %1398 }
 0x153   :  { %7996 = vst [vmem:[#allocation92_spill] sm:$0xff] %v5164_v54  ;;  %v3999_v12 = vpop.f32.mrb[46].mxu1  ;;  %753 = vrot.lane.b32.xlu0 %v5164_v54, %s4346_s24  ;;  %8002 = vst [vmem:[#allocation98_spill] sm:$0xff] %v5187_v56 }
 0x154   :  { %v512_v43 = vpop.f32.mrb[47].mxu1  ;;  %v5181_v9 = vadd.f32 %v3999_v12, %v4881_v58 }
 0x155   :  { %v5178_v52 = vadd.f32 %v4881_v58, %v512_v43  ;;  %v5197_v43 = vpop.permute.xlu0 %1405 }
 0x156   :  { %8001 = vst [vmem:[#allocation97_spill] sm:$0xff] %v5181_v9  ;;  %755 = vrot.lane.b32.xlu1 %v5167_v53, %s4346_s24  ;;  %8005 = vst [vmem:[#allocation101_spill] sm:$0xff] %v5197_v43 }
 0x157   :  { %8000 = vst [vmem:[#allocation96_spill] sm:$0xff] %v5178_v52  ;;  %v4002_v20 = vpop.f32.mrb[48].mxu1  ;;  %757 = vrot.lane.b32.xlu0 %v5178_v52, %s4346_s24 }
 0x158   :  { %v522_v8 = vpop.f32.mrb[49].mxu1  ;;  %v5193_v63 = vadd.f32 %v4002_v20, %v4881_v58 }
 0x159   :  { %v5190_v54 = vadd.f32 %v4881_v58, %v522_v8  ;;  %v5209_v8 = vpop.permute.xlu1 %1412 }
 0x15a   :  { %8004 = vst [vmem:[#allocation100_spill] sm:$0xff] %v5193_v63  ;;  %759 = vrot.lane.b32.xlu1 %v5181_v9, %s4346_s24  ;;  %8008 = vst [vmem:[#allocation104_spill] sm:$0xff] %v5209_v8  ;;  %v5213_v9 = vpop.permute.xlu0 %1419 }
 0x15b   :  { %8003 = vst [vmem:[#allocation99_spill] sm:$0xff] %v5190_v54  ;;  %v4005_v12 = vpop.f32.mrb[50].mxu1  ;;  %761 = vrot.lane.b32.xlu0 %v5190_v54, %s4346_s24  ;;  %8009 = vst [vmem:[#allocation105_spill] sm:$0xff] %v5213_v9 }
 0x15c   :  { %v532_v53 = vpop.f32.mrb[51].mxu1  ;;  %v5205_v56 = vadd.f32 %v4005_v12, %v4881_v58 }
 0x15d   :  { %v5202_v52 = vadd.f32 %v4881_v58, %v532_v53 }
 0x15e   :  { %8007 = vst [vmem:[#allocation103_spill] sm:$0xff] %v5205_v56  ;;  %763 = vrot.lane.b32.xlu1 %v5193_v63, %s4346_s24  ;;  %v5225_v63 = vpop.permute.xlu1 %1426 }
 0x15f   :  { %8006 = vst [vmem:[#allocation102_spill] sm:$0xff] %v5202_v52  ;;  %v4008_v20 = vpop.f32.mrb[52].mxu1  ;;  %765 = vrot.lane.b32.xlu0 %v5202_v52, %s4346_s24  ;;  %8012 = vst [vmem:[#allocation108_spill] sm:$0xff] %v5225_v63 }
 0x160   :  { %v542_v43 = vpop.f32.mrb[53].mxu1  ;;  %v5219_v53 = vadd.f32 %v4008_v20, %v4881_v58 }
 0x161   :  { %v5216_v54 = vadd.f32 %v4881_v58, %v542_v43  ;;  %v5235_v43 = vpop.permute.xlu0 %1433 }
 0x162   :  { %8011 = vst [vmem:[#allocation107_spill] sm:$0xff] %v5219_v53  ;;  %767 = vrot.lane.b32.xlu1 %v5205_v56, %s4346_s24  ;;  %8015 = vst [vmem:[#allocation111_spill] sm:$0xff] %v5235_v43 }
 0x163   :  { %8010 = vst [vmem:[#allocation106_spill] sm:$0xff] %v5216_v54  ;;  %v4011_v12 = vpop.f32.mrb[54].mxu1  ;;  %769 = vrot.lane.b32.xlu0 %v5216_v54, %s4346_s24 }
 0x164   :  { %v552_v8 = vpop.f32.mrb[55].mxu1  ;;  %v5231_v9 = vadd.f32 %v4011_v12, %v4881_v58 }
 0x165   :  { %v5228_v52 = vadd.f32 %v4881_v58, %v552_v8  ;;  %v5247_v8 = vpop.permute.xlu1 %1440 }
 0x166   :  { %8014 = vst [vmem:[#allocation110_spill] sm:$0xff] %v5231_v9  ;;  %771 = vrot.lane.b32.xlu1 %v5219_v53, %s4346_s24  ;;  %8018 = vst [vmem:[#allocation114_spill] sm:$0xff] %v5247_v8 }
 0x167   :  { %8013 = vst [vmem:[#allocation109_spill] sm:$0xff] %v5228_v52  ;;  %v4014_v20 = vpop.f32.mrb[56].mxu1  ;;  %773 = vrot.lane.b32.xlu0 %v5228_v52, %s4346_s24 }
 0x168   :  { %v562_v56 = vpop.f32.mrb[57].mxu1  ;;  %v5243_v63 = vadd.f32 %v4014_v20, %v4881_v58 }
 0x169   :  { %v5240_v54 = vadd.f32 %v4881_v58, %v562_v56 }
 0x16a   :  { %8017 = vst [vmem:[#allocation113_spill] sm:$0xff] %v5243_v63  ;;  %775 = vrot.lane.b32.xlu1 %v5231_v9, %s4346_s24 }
 0x16b   :  { %8016 = vst [vmem:[#allocation112_spill] sm:$0xff] %v5240_v54  ;;  %v4017_v12 = vpop.f32.mrb[58].mxu1  ;;  %777 = vrot.lane.b32.xlu0 %v5240_v54, %s4346_s24 }
 0x16c   :  { %v5251_v43 = vpop.permute.xlu0 %667  ;;  %v572_v53 = vpop.f32.mrb[59].mxu1  ;;  %v5257_v56 = vadd.f32 %v4017_v12, %v4881_v58 }
 0x16d   :  { %8019 = vst [vmem:[#allocation115_spill] sm:$0xff] %v5251_v43  ;;  %v5254_v52 = vadd.f32 %v4881_v58, %v572_v53 }
 0x16e   :  { %8021 = vst [vmem:[#allocation117_spill] sm:$0xff] %v5257_v56  ;;  %779 = vrot.lane.b32.xlu1 %v5243_v63, %s4346_s24 }
 0x16f   :  { %8020 = vst [vmem:[#allocation116_spill] sm:$0xff] %v5254_v52  ;;  %v4020_v20 = vpop.f32.mrb[60].mxu1  ;;  %781 = vrot.lane.b32.xlu0 %v5254_v52, %s4346_s24 }
 0x170   :  { %v5263_v8 = vpop.permute.xlu1 %671  ;;  %v582_v9 = vpop.f32.mrb[61].mxu1  ;;  %v5271_v53 = vadd.f32 %v4020_v20, %v4881_v58 }
 0x171   :  { %8022 = vst [vmem:[#allocation118_spill] sm:$0xff] %v5263_v8  ;;  %v5266_v54 = vadd.f32 %v4881_v58, %v582_v9  ;;  %v5268_v62 = vpop.permute.xlu0 %665 }
 0x172   :  { %8024 = vst [vmem:[#allocation120_spill] sm:$0xff] %v5268_v62  ;;  %8025 = vst [vmem:[#allocation121_spill] sm:$0xff] %v5271_v53  ;;  %783 = vrot.lane.b32.xlu1 %v5257_v56, %s4346_s24 }
 0x173   :  { %8023 = vst [vmem:[#allocation119_spill] sm:$0xff] %v5266_v54  ;;  %v4023_v12 = vpop.f32.mrb[62].mxu1  ;;  %785 = vrot.lane.b32.xlu0 %v5266_v54, %s4346_s24 }
 0x174   :  { %v592_v63 = vpop.f32.mrb[63].mxu1  ;;  %v5277_v52 = vpop.permute.xlu1 %669  ;;  %v5285_v48 = vadd.f32 %v4023_v12, %v4881_v58 }
 0x175   :  { %8026 = vst [vmem:[#allocation122_spill] sm:$0xff] %v5277_v52  ;;  %v5280_v51 = vadd.f32 %v4881_v58, %v592_v63  ;;  %v5282_v9 = vpop.permute.xlu0 %673 }
 0x176   :  { %8028 = vst [vmem:[#allocation124_spill] sm:$0xff] %v5282_v9  ;;  %8029 = vst [vmem:[#allocation125_spill] sm:$0xff] %v5285_v48  ;;  %787 = vrot.lane.b32.xlu1 %v5271_v53, %s4346_s24 }
 0x177   :  { %8027 = vst [vmem:[#allocation123_spill] sm:$0xff] %v5280_v51  ;;  %789 = vrot.lane.b32.xlu0 %v5280_v51, %s4346_s24 }
 0x178   :  { %v5291_v20 = vpop.permute.xlu1 %675 }
 0x179   :  { %8030 = vst [vmem:[#allocation126_spill] sm:$0xff] %v5291_v20  ;;  %v5293_v54 = vpop.permute.xlu0 %677 }
 0x17a   :  { %8031 = vst [vmem:[#allocation127_spill] sm:$0xff] %v5293_v54  ;;  %791 = vrot.lane.b32.xlu1 %v5285_v48, %s4346_s24 }
 0x17c   :  { %v5297_v63 = vpop.permute.xlu1 %679 }
 0x17d   :  { %8032 = vst [vmem:[#allocation128_spill] sm:$0xff] %v5297_v63  ;;  %v5299_v56 = vpop.permute.xlu0 %681 }
 0x17e   :  { %8033 = vst [vmem:[#allocation129_spill] sm:$0xff] %v5299_v56 }
 0x180   :  { %v5301_v16 = vpop.permute.xlu1 %683 }
 0x181   :  { %8034 = vst [vmem:[#allocation130_spill] sm:$0xff] %v5301_v16  ;;  %v5303_v58 = vpop.permute.xlu0 %685 }
 0x182   :  { %8035 = vst [vmem:[#allocation131_spill] sm:$0xff] %v5303_v58 }
 0x184   :  { %v5305_v12 = vpop.permute.xlu1 %687 }
 0x185   :  { %8036 = vst [vmem:[#allocation132_spill] sm:$0xff] %v5305_v12  ;;  %v5307_v53 = vpop.permute.xlu0 %689 }
 0x186   :  { %8037 = vst [vmem:[#allocation133_spill] sm:$0xff] %v5307_v53 }
 0x188   :  { %v5309_v51 = vpop.permute.xlu1 %691 }
 0x189   :  { %8038 = vst [vmem:[#allocation134_spill] sm:$0xff] %v5309_v51  ;;  %v5311_v4 = vpop.permute.xlu0 %693 }
 0x18a   :  { %8039 = vst [vmem:[#allocation135_spill] sm:$0xff] %v5311_v4 }
 0x18c   :  { %v5313_v21 = vpop.permute.xlu1 %695 }
 0x18d   :  { %8040 = vst [vmem:[#allocation136_spill] sm:$0xff] %v5313_v21  ;;  %v5315_v14 = vpop.permute.xlu0 %697 }
 0x18e   :  { %8041 = vst [vmem:[#allocation137_spill] sm:$0xff] %v5315_v14 }
 0x190   :  { %v5317_v48 = vpop.permute.xlu1 %699 }
 0x191   :  { %8042 = vst [vmem:[#allocation138_spill] sm:$0xff] %v5317_v48  ;;  %v5319_v6 = vpop.permute.xlu0 %701 }
 0x192   :  { %8043 = vst [vmem:[#allocation139_spill] sm:$0xff] %v5319_v6 }
 0x194   :  { %v5321_v47 = vpop.permute.xlu1 %703 }
 0x195   :  { %8044 = vst [vmem:[#allocation140_spill] sm:$0xff] %v5321_v47  ;;  %v5323_v37 = vpop.permute.xlu0 %705 }
 0x196   :  { %8045 = vst [vmem:[#allocation141_spill] sm:$0xff] %v5323_v37 }
 0x198   :  { %v5325_v49 = vpop.permute.xlu1 %707 }
 0x199   :  { %8046 = vst [vmem:[#allocation142_spill] sm:$0xff] %v5325_v49  ;;  %v5327_v46 = vpop.permute.xlu0 %709 }
 0x19a   :  { %8047 = vst [vmem:[#allocation143_spill] sm:$0xff] %v5327_v46  ;;  %v3714_v46 = vld [vmem:[%s7671_s3] ss:$0 sm:$0xff] }
 0x19c   :  { %v5329_v61 = vpop.permute.xlu1 %711 }
 0x19d   :  { %8048 = vst [vmem:[#allocation144_spill] sm:$0xff] %v5329_v61  ;;  %v5331_v5 = vpop.permute.xlu0 %713 }
 0x19e   :  { %8049 = vst [vmem:[#allocation145_spill] sm:$0xff] %v5331_v5 }
 0x1a0   :  { %v5333_v32 = vpop.permute.xlu1 %715 }
 0x1a1   :  { %8050 = vst [vmem:[#allocation146_spill] sm:$0xff] %v5333_v32  ;;  %v5335_v17 = vpop.permute.xlu0 %717  ;;  %v5353_v32 = vadd.f32 %v3714_v46, %v4943_v19 }
 0x1a2   :  { %8051 = vst [vmem:[#allocation147_spill] sm:$0xff] %v5335_v17 }
 0x1a4   :  { %v5337_v44 = vpop.permute.xlu1 %719 }
 0x1a5   :  { %8052 = vst [vmem:[#allocation148_spill] sm:$0xff] %v5337_v44  ;;  %v5339_v45 = vpop.permute.xlu0 %721  ;;  %v861_v44 = vsel %vm857_vm2, %v4896_v2, %v5263_v8 }
 0x1a6   :  { %8053 = vst [vmem:[#allocation149_spill] sm:$0xff] %v5339_v45  ;;  %v859_v45 = vsel %vm857_vm2, %v4884_v60, %v5251_v43  ;;  %v1445_v8 = vmul.f32 %v861_v44, %v5353_v32 }
 0x1a7   :  { %v1443_v19 = vmul.f32 %v859_v45, %v5353_v32 }
 0x1a8   :  { %v5341_v42 = vpop.permute.xlu1 %723 }
 0x1a9   :  { %8054 = vst [vmem:[#allocation150_spill] sm:$0xff] %v5341_v42  ;;  %v5343_v47 = vpop.permute.xlu0 %725 }
 0x1aa   :  { %8055 = vst [vmem:[#allocation151_spill] sm:$0xff] %v5343_v47  ;;  %v862_v47 = vsel %vm857_vm2, %v4910_v10, %v5282_v9  ;;  %v863_v9 = vsel %vm857_vm2, %v4913_v11, %v5291_v20  ;;  %v860_v10 = vsel %vm857_vm2, %v4905_v7, %v5277_v52  ;;  %v866_v20 = vsel %vm857_vm2, %v4934_v26, %v5299_v56  ;;  %v8106_v7 = vld [vmem:[#allocation17_spill] sm:$0xff] }
 0x1ab   :  { %v1446_v43 = vmul.f32 %v862_v47, %v5353_v32  ;;  %v1447_v45 = vmul.f32 %v863_v9, %v5353_v32  ;;  %v865_v47 = vsel %vm857_vm2, %v4925_v24, %v5297_v63  ;;  %v868_v63 = vsel %vm857_vm2, %v4950_v55, %v5303_v58 }
 0x1ac   :  { %v5348_v61 = vpop.permute.xlu1 %727 }
 0x1ad   :  { %8056 = vst [vmem:[#allocation152_spill] sm:$0xff] %v5348_v61  ;;  %v5350_v5 = vpop.permute.xlu0 %729  ;;  %v5403_v9 = vadd.f32 %v1446_v43, %v4836_v30  ;;  %v1449_v30 = vmul.f32 %v865_v47, %v5353_v32  ;;  %v1450_v43 = vmul.f32 %v866_v20, %v5353_v32  ;;  %v1452_v47 = vmul.f32 %v868_v63, %v5353_v32  ;;  %v8092_v55 = vld [vmem:[#allocation149_spill] sm:$0xff] }
 0x1ae   :  { %8057 = vst [vmem:[#allocation153_spill] sm:$0xff] %v5350_v5  ;;  %v858_v5 = vsel %vm857_vm2, %v4893_v1, %v5268_v62  ;;  %v864_v62 = vsel %vm857_vm2, %v4922_v15, %v5293_v54  ;;  %v5399_v54 = vadd.f32 %v1443_v19, %v4830_v27  ;;  %v1444_v15 = vmul.f32 %v860_v10, %v5353_v32 }
 0x1af   :  { %v1442_v2 = vmul.f32 %v858_v5, %v5353_v32  ;;  %v867_v5 = vsel %vm857_vm2, %v4937_v18, %v5301_v16  ;;  %v1448_v56 = vmul.f32 %v864_v62, %v5353_v32  ;;  %v869_v16 = vsel %vm857_vm2, %v4953_v57, %v5305_v12  ;;  %v8091_v57 = vld [vmem:[#allocation63_spill] sm:$0xff] }
 0x1b0   :  { %v5361_v42 = vpop.permute.xlu1 %731  ;;  %v870_v27 = vsel %vm857_vm2, %v4962_v0, %v5307_v53  ;;  %v871_v10 = vsel %vm857_vm2, %v4965_v3, %v5309_v51  ;;  %v1451_v19 = vmul.f32 %v867_v5, %v5353_v32  ;;  %v872_v62 = vsel %vm857_vm2, %v4974_v13, %v5311_v4  ;;  %v8094_v18 = vld [vmem:[#allocation150_spill] sm:$0xff] }
 0x1b1   :  { %8058 = vst [vmem:[#allocation154_spill] sm:$0xff] %v5361_v42  ;;  %v5369_v46 = vpop.permute.xlu0 %733  ;;  %v5427_v12 = vadd.f32 %v1445_v8, %v4834_v29  ;;  %v5430_v53 = vadd.f32 %v1442_v2, %v4828_v23  ;;  %v5433_v51 = vadd.f32 %v1447_v45, %v4838_v31  ;;  %v1453_v5 = vmul.f32 %v869_v16, %v5353_v32  ;;  %v8099_v11 = vld [vmem:[#allocation151_spill] sm:$0xff] }
 0x1b2   :  { %8059 = vst [vmem:[#allocation155_spill] sm:$0xff] %v5369_v46  ;;  %v1454_v3 = vmul.f32 %v870_v27, %v5353_v32  ;;  %v1455_v4 = vmul.f32 %v871_v10, %v5353_v32  ;;  %v873_v29 = vsel %vm857_vm2, %v4977_v25, %v5313_v21  ;;  %v5445_v23 = vadd.f32 %v1444_v15, %v4832_v28  ;;  %v8079_v25 = vld [vmem:[#allocation144_spill] sm:$0xff] }
 0x1b3   :  { %v1570_v31 = vmax.f32 %v5430_v53, %v5403_v9  ;;  %v5450_v2 = vadd.f32 %v1448_v56, %v4840_v33  ;;  %v1456_v8 = vmul.f32 %v872_v62, %v5353_v32  ;;  %v5454_v16 = vadd.f32 %v1449_v30, %v4842_v34 }
 0x1b4   :  { %v5384_v1 = vpop.permute.xlu1 %735  ;;  %v5457_v63 = vadd.f32 %v1450_v43, %v4844_v35  ;;  %v5460_v45 = vadd.f32 %v1451_v19, %v4846_v36  ;;  %v874_v28 = vsel %vm857_vm2, %v4988_v22, %v5315_v14  ;;  %v1571_v33 = vmax.f32 %v5399_v54, %v5433_v51  ;;  %v8066_v19 = vld [vmem:[#allocation7_spill] sm:$0xff]  ;;  %v8074_v14 = vld [vmem:[#allocation53_spill] sm:$0xff]  ;;  %v8076_v22 = vld [vmem:[#allocation56_spill] sm:$0xff] }
 0x1b5   :  { %8060 = vst [vmem:[#allocation156_spill] sm:$0xff] %v5384_v1  ;;  %v5396_v44 = vpop.permute.xlu0 %737  ;;  %v5470_v56 = vadd.f32 %v1452_v47, %v4848_v38  ;;  %v1457_v34 = vmul.f32 %v873_v29, %v5353_v32  ;;  %v875_v35 = vsel %vm857_vm2, %v4991_v59, %v5317_v48  ;;  %v5479_v27 = vadd.f32 %v1453_v5, %v4850_v39  ;;  %v8068_v29 = vld [vmem:[#allocation8_spill] sm:$0xff] }
 0x1b6   :  { %8061 = vst [vmem:[#allocation157_spill] sm:$0xff] %v5396_v44  ;;  %v5482_v10 = vadd.f32 %v1454_v3, %v4852_v40  ;;  %v5485_v30 = vadd.f32 %v1455_v4, %v4854_v41  ;;  %v876_v38 = vsel %vm857_vm2, %v5000_v50, %v5319_v6  ;;  %v1572_v43 = vmax.f32 %v5445_v23, %v5450_v2  ;;  %v8072_v59 = vld [vmem:[#allocation52_spill] sm:$0xff] }
 0x1b7   :  { %v5493_v62 = vadd.f32 %v1456_v8, %v8066_v19  ;;  %v1458_v47 = vmul.f32 %v874_v28, %v5353_v32  ;;  %v1573_v39 = vmax.f32 %v5427_v12, %v5454_v16  ;;  %v1574_v40 = vmax.f32 %v1570_v31, %v5457_v63  ;;  %v8069_v19 = vld [vmem:[#allocation140_spill] sm:$0xff]  ;;  %v8070_v28 = vld [vmem:[#allocation50_spill] sm:$0xff] }
 0x1b8   :  { %v5424_v58 = vpop.permute.xlu1 %739  ;;  %v1575_v41 = vmax.f32 %v1571_v33, %v5460_v45  ;;  %v1459_v4 = vmul.f32 %v875_v35, %v5353_v32  ;;  %v1576_v5 = vmax.f32 %v1572_v43, %v5470_v56  ;;  %v5505_v6 = vadd.f32 %v1457_v34, %v8068_v29  ;;  %v8073_v29 = vld [vmem:[#allocation9_spill] sm:$0xff] }
 0x1b9   :  { %8062 = vst [vmem:[#allocation158_spill] sm:$0xff] %v5424_v58  ;;  %v5436_v20 = vpop.permute.xlu0 %741  ;;  %v1460_v8 = vmul.f32 %v876_v38, %v5353_v32  ;;  %v877_v50 = vsel %vm857_vm2, %v8070_v28, %v8069_v19  ;;  %v1577_v31 = vmax.f32 %v1573_v39, %v5479_v27  ;;  %v1578_v33 = vmax.f32 %v1574_v40, %v5482_v10  ;;  %v8075_v28 = vld [vmem:[#allocation143_spill] sm:$0xff]  ;;  %v8077_v40 = vld [vmem:[#allocation10_spill] sm:$0xff] }
 0x1ba   :  { %8063 = vst [vmem:[#allocation159_spill] sm:$0xff] %v5436_v20  ;;  %v1579_v35 = vmax.f32 %v1575_v41, %v5485_v30  ;;  %v878_v43 = vsel %vm857_vm2, %v8072_v59, %v5323_v37  ;;  %v1580_v34 = vmax.f32 %v1576_v5, %v5493_v62  ;;  %v5521_v38 = vadd.f32 %v1458_v47, %v8073_v29  ;;  %v8080_v37 = vld [vmem:[#allocation57_spill] sm:$0xff]  ;;  %v8082_v47 = vld [vmem:[#allocation59_spill] sm:$0xff] }
 0x1bb   :  { %v879_v19 = vsel %vm857_vm2, %v8074_v14, %v5325_v49  ;;  %v880_v39 = vsel %vm857_vm2, %v8076_v22, %v8075_v28  ;;  %v5530_v21 = vadd.f32 %v1459_v4, %v8077_v40  ;;  %v1461_v41 = vmul.f32 %v877_v50, %v5353_v32  ;;  %v8081_v59 = vld [vmem:[#allocation145_spill] sm:$0xff]  ;;  %v8084_v14 = vld [vmem:[#allocation11_spill] sm:$0xff]  ;;  %v8086_v40 = vld [vmem:[#allocation146_spill] sm:$0xff] }
 0x1bc   :  { %v5465_v15 = vpop.permute.xlu1 %743  ;;  %v881_v5 = vsel %vm857_vm2, %v8080_v37, %v8079_v25  ;;  %v882_v29 = vsel %vm857_vm2, %v8082_v47, %v8081_v59  ;;  %v1581_v49 = vmax.f32 %v1577_v31, %v5505_v6  ;;  %v5543_v0 = vadd.f32 %v1460_v8, %v8084_v14  ;;  %v8087_v28 = vld [vmem:[#allocation60_spill] sm:$0xff]  ;;  %v8089_v59 = vld [vmem:[#allocation62_spill] sm:$0xff] }
 0x1bd   :  { %8064 = vst [vmem:[#allocation160_spill] sm:$0xff] %v5465_v15  ;;  %v5476_v36 = vpop.permute.xlu0 %745  ;;  %8078 = vst [vmem:[#allocation9_spill] sm:$0xff] %v5530_v21  ;;  %v1462_v4 = vmul.f32 %v878_v43, %v5353_v32  ;;  %v883_v50 = vsel %vm857_vm2, %v8087_v28, %v8086_v40  ;;  %v1463_v25 = vmul.f32 %v879_v19, %v5353_v32  ;;  %v8090_v31 = vld [vmem:[#allocation148_spill] sm:$0xff]  ;;  %v8093_v40 = vld [vmem:[#allocation66_spill] sm:$0xff] }
 0x1be   :  { %8065 = vst [vmem:[#allocation161_spill] sm:$0xff] %v5476_v36  ;;  %8085 = vst [vmem:[#allocation11_spill] sm:$0xff] %v5543_v0  ;;  %v1464_v37 = vmul.f32 %v880_v39, %v5353_v32  ;;  %v884_v47 = vsel %vm857_vm2, %v8089_v59, %v5335_v17  ;;  %v885_v14 = vsel %vm857_vm2, %v8091_v57, %v8090_v31  ;;  %v8095_v19 = vld [vmem:[#allocation67_spill] sm:$0xff]  ;;  %v8096_v59 = vld [vmem:[#allocation12_spill] sm:$0xff] }
 0x1bf   :  { %v1465_v8 = vmul.f32 %v881_v5, %v5353_v32  ;;  %v1466_v43 = vmul.f32 %v882_v29, %v5353_v32  ;;  %v886_v28 = vsel %vm857_vm2, %v8093_v40, %v8092_v55  ;;  %v887_v39 = vsel %vm857_vm2, %v8095_v19, %v8094_v18  ;;  %v8098_v29 = vld [vmem:[#allocation13_spill] sm:$0xff] }
 0x1c0   :  { %v5501_v3 = vpop.permute.xlu1 %747  ;;  %v1582_v26 = vmax.f32 %v1578_v33, %v5521_v38  ;;  %v1583_v17 = vmax.f32 %v1579_v35, %v5530_v21  ;;  %v5570_v24 = vadd.f32 %v1461_v41, %v8096_v59  ;;  %v1467_v31 = vmul.f32 %v883_v50, %v5353_v32  ;;  %v8100_v18 = vld [vmem:[#allocation69_spill] sm:$0xff]  ;;  %v8102_v35 = vld [vmem:[#allocation14_spill] sm:$0xff] }
 0x1c1   :  { %8067 = vst [vmem:[#allocation7_spill] sm:$0xff] %v5501_v3  ;;  %v5511_v48 = vpop.permute.xlu0 %749  ;;  %v5576_v57 = vadd.f32 %v1462_v4, %v8098_v29  ;;  %v1468_v55 = vmul.f32 %v884_v47, %v5353_v32  ;;  %v1469_v40 = vmul.f32 %v885_v14, %v5353_v32  ;;  %v888_v33 = vsel %vm857_vm2, %v8100_v18, %v8099_v11  ;;  %v8103_v29 = vld [vmem:[#allocation15_spill] sm:$0xff]  ;;  %v8104_v47 = vld [vmem:[#allocation16_spill] sm:$0xff]  ;;  %v8108_v11 = vld [vmem:[#allocation70_spill] sm:$0xff] }
 0x1c2   :  { %8071 = vst [vmem:[#allocation8_spill] sm:$0xff] %v5511_v48  ;;  %v1584_v59 = vmax.f32 %v1580_v34, %v5543_v0  ;;  %v5587_v41 = vadd.f32 %v1463_v25, %v8102_v35  ;;  %v1470_v50 = vmul.f32 %v886_v28, %v5353_v32  ;;  %v1471_v4 = vmul.f32 %v887_v39, %v5353_v32  ;;  %v8109_v35 = vld [vmem:[#allocation19_spill] sm:$0xff]  ;;  %v8111_v39 = vld [vmem:[#allocation153_spill] sm:$0xff] }
 0x1c3   :  { %v5592_v52 = vadd.f32 %v1464_v37, %v8103_v29  ;;  %v5595_v14 = vadd.f32 %v1465_v8, %v8104_v47  ;;  %v5598_v60 = vadd.f32 %v1466_v43, %v8106_v7  ;;  %v889_v34 = vsel %vm857_vm2, %v8108_v11, %v5348_v61  ;;  %v8112_v37 = vld [vmem:[#allocation72_spill] sm:$0xff]  ;;  %v8116_v0 = vld [vmem:[#allocation23_spill] sm:$0xff]  ;;  %v8120_v11 = vld [vmem:[#allocation25_spill] sm:$0xff] }
 0x1c4   :  { %v5539_v13 = vpop.permute.xlu1 %751  ;;  %v1585_v25 = vmax.f32 %v1581_v49, %v5570_v24  ;;  %v5605_v18 = vadd.f32 %v1467_v31, %v8109_v35  ;;  %v1472_v28 = vmul.f32 %v888_v33, %v5353_v32  ;;  %v890_v29 = vsel %vm857_vm2, %v8112_v37, %v8111_v39  ;;  %v8114_v43 = vld [vmem:[#allocation20_spill] sm:$0xff]  ;;  %v8118_v49 = vld [vmem:[#allocation73_spill] sm:$0xff] }
 0x1c5   :  { %8083 = vst [vmem:[#allocation10_spill] sm:$0xff] %v5539_v13  ;;  %v5549_v22 = vpop.permute.xlu0 %753  ;;  %8105 = vst [vmem:[#allocation14_spill] sm:$0xff] %v5595_v14  ;;  %v1586_v7 = vmax.f32 %v1582_v26, %v5576_v57  ;;  %v5615_v47 = vadd.f32 %v1468_v55, %v8114_v43  ;;  %v5618_v61 = vadd.f32 %v1469_v40, %v8116_v0  ;;  %v8122_v37 = vld [vmem:[#allocation28_spill] sm:$0xff] }
 0x1c6   :  { %8088 = vst [vmem:[#allocation162_spill] sm:$0xff] %v5549_v22  ;;  %8107 = vst [vmem:[#allocation15_spill] sm:$0xff] %v5598_v60  ;;  %v891_v31 = vsel %vm857_vm2, %v8118_v49, %v5361_v42  ;;  %v1587_v33 = vmax.f32 %v1583_v17, %v5587_v41  ;;  %v5627_v39 = vadd.f32 %v1470_v50, %v8120_v11  ;;  %v8124_v49 = vld [vmem:[#allocation31_spill] sm:$0xff]  ;;  %v8126_v50 = vld [vmem:[#allocation76_spill] sm:$0xff] }
 0x1c7   :  { %8110 = vst [vmem:[#allocation16_spill] sm:$0xff] %v5605_v18  ;;  %8115 = vst [vmem:[#allocation19_spill] sm:$0xff] %v5615_v47  ;;  %v5630_v21 = vadd.f32 %v1471_v4, %v8122_v37  ;;  %v1473_v26 = vmul.f32 %v889_v34, %v5353_v32  ;;  %v1588_v55 = vmax.f32 %v1584_v59, %v5592_v52  ;;  %v8128_v37 = vld [vmem:[#allocation77_spill] sm:$0xff] }
 0x1c8   :  { %v5573_v5 = vpop.permute.xlu1 %755  ;;  %8117 = vst [vmem:[#allocation20_spill] sm:$0xff] %v5618_v61  ;;  %8121 = vst [vmem:[#allocation25_spill] sm:$0xff] %v5627_v39  ;;  %v1589_v0 = vmax.f32 %v1585_v25, %v5595_v14  ;;  %v1590_v40 = vmax.f32 %v1586_v7, %v5598_v60  ;;  %v1474_v43 = vmul.f32 %v890_v29, %v5353_v32  ;;  %v8210_v14 = vld [vmem:[#allocation105_spill] sm:$0xff] }
 0x1c9   :  { %8097 = vst [vmem:[#allocation12_spill] sm:$0xff] %v5573_v5  ;;  %v5583_v19 = vpop.permute.xlu0 %757  ;;  %8123 = vst [vmem:[#allocation28_spill] sm:$0xff] %v5630_v21  ;;  %v1591_v42 = vmax.f32 %v1587_v33, %v5605_v18  ;;  %v5639_v17 = vadd.f32 %v1472_v28, %v8124_v49  ;;  %v1475_v11 = vmul.f32 %v891_v31, %v5353_v32  ;;  %v8130_v31 = vld [vmem:[#allocation34_spill] sm:$0xff] }
 0x1ca   :  { %8101 = vst [vmem:[#allocation13_spill] sm:$0xff] %v5583_v19  ;;  %v892_v4 = vsel %vm857_vm2, %v8126_v50, %v5369_v46  ;;  %v1592_v59 = vmax.f32 %v1588_v55, %v5615_v47  ;;  %v1593_v25 = vmax.f32 %v1589_v0, %v5618_v61  ;;  %v893_v29 = vsel %vm857_vm2, %v8128_v37, %v5384_v1  ;;  %v8132_v46 = vld [vmem:[#allocation79_spill] sm:$0xff]  ;;  %v8135_v1 = vld [vmem:[#allocation80_spill] sm:$0xff]  ;;  %v8202_v18 = vld [vmem:[#allocation98_spill] sm:$0xff] }
 0x1cb   :  { %8125 = vst [vmem:[#allocation31_spill] sm:$0xff] %v5639_v17  ;;  %v1594_v28 = vmax.f32 %v1590_v40, %v5627_v39  ;;  %v1595_v49 = vmax.f32 %v1591_v42, %v5630_v21  ;;  %v5657_v33 = vadd.f32 %v1473_v26, %v8130_v31  ;;  %v894_v50 = vsel %vm857_vm2, %v8132_v46, %v5396_v44  ;;  %v8133_v55 = vld [vmem:[#allocation35_spill] sm:$0xff]  ;;  %v8136_v40 = vld [vmem:[#allocation82_spill] sm:$0xff] }
 0x1cc   :  { %v5611_v8 = vpop.permute.xlu1 %759  ;;  %v5663_v47 = vadd.f32 %v1474_v43, %v8133_v55  ;;  %v1476_v0 = vmul.f32 %v892_v4, %v5353_v32  ;;  %v895_v37 = vsel %vm857_vm2, %v8135_v1, %v5424_v58  ;;  %v896_v42 = vsel %vm857_vm2, %v8136_v40, %v5436_v20  ;;  %v8137_v31 = vld [vmem:[#allocation38_spill] sm:$0xff]  ;;  %v8139_v43 = vld [vmem:[#allocation83_spill] sm:$0xff] }
 0x1cd   :  { %8113 = vst [vmem:[#allocation17_spill] sm:$0xff] %v5611_v8  ;;  %v5623_v35 = vpop.permute.xlu0 %761  ;;  %8131 = vst [vmem:[#allocation34_spill] sm:$0xff] %v5657_v33  ;;  %v1596_v26 = vmax.f32 %v1592_v59, %v5639_v17  ;;  %v5674_v21 = vadd.f32 %v1475_v11, %v8137_v31  ;;  %v1477_v44 = vmul.f32 %v893_v29, %v5353_v32  ;;  %v8141_v58 = vld [vmem:[#allocation86_spill] sm:$0xff]  ;;  %v8142_v20 = vld [vmem:[#allocation87_spill] sm:$0xff] }
 0x1ce   :  { %8119 = vst [vmem:[#allocation23_spill] sm:$0xff] %v5623_v35  ;;  %8134 = vst [vmem:[#allocation35_spill] sm:$0xff] %v5663_v47  ;;  %v897_v55 = vsel %vm857_vm2, %v8139_v43, %v5465_v15  ;;  %v1478_v46 = vmul.f32 %v894_v50, %v5353_v32  ;;  %v898_v1 = vsel %vm857_vm2, %v8141_v58, %v5476_v36  ;;  %v8143_v11 = vld [vmem:[#allocation89_spill] sm:$0xff]  ;;  %v8145_v40 = vld [vmem:[#allocation90_spill] sm:$0xff] }
 0x1cf   :  { %8138 = vst [vmem:[#allocation38_spill] sm:$0xff] %v5674_v21  ;;  %v899_v59 = vsel %vm857_vm2, %v8142_v20, %v5501_v3  ;;  %v900_v29 = vsel %vm857_vm2, %v8143_v11, %v5511_v48  ;;  %v1597_v15 = vmax.f32 %v1593_v25, %v5657_v33  ;;  %v1479_v43 = vmul.f32 %v895_v37, %v5353_v32  ;;  %v8146_v17 = vld [vmem:[#allocation41_spill] sm:$0xff]  ;;  %v8148_v48 = vld [vmem:[#allocation92_spill] sm:$0xff] }
 0x1d0   :  { %v5645_v34 = vpop.permute.xlu1 %763  ;;  %v1480_v50 = vmul.f32 %v896_v42, %v5353_v32  ;;  %v901_v36 = vsel %vm857_vm2, %v8145_v40, %v5539_v13  ;;  %v1598_v58 = vmax.f32 %v1594_v28, %v5663_v47  ;;  %v5702_v3 = vadd.f32 %v1476_v0, %v8146_v17  ;;  %v8149_v33 = vld [vmem:[#allocation93_spill] sm:$0xff]  ;;  %v8151_v0 = vld [vmem:[#allocation44_spill] sm:$0xff] }
 0x1d1   :  { %8127 = vst [vmem:[#allocation163_spill] sm:$0xff] %v5645_v34  ;;  %v5652_v7 = vpop.permute.xlu0 %765  ;;  %v1481_v20 = vmul.f32 %v897_v55, %v5353_v32  ;;  %v902_v11 = vsel %vm857_vm2, %v8148_v48, %v5549_v22  ;;  %v1482_v25 = vmul.f32 %v898_v1, %v5353_v32  ;;  %v1483_v37 = vmul.f32 %v899_v59, %v5353_v32  ;;  %v8153_v40 = vld [vmem:[#allocation45_spill] sm:$0xff]  ;;  %v8156_v59 = vld [vmem:[#allocation48_spill] sm:$0xff]  ;;  %v8158_v48 = vld [vmem:[#allocation51_spill] sm:$0xff] }
 0x1d2   :  { %8129 = vst [vmem:[#allocation164_spill] sm:$0xff] %v5652_v7  ;;  %8147 = vst [vmem:[#allocation41_spill] sm:$0xff] %v5702_v3  ;;  %v1484_v42 = vmul.f32 %v900_v29, %v5353_v32  ;;  %v903_v13 = vsel %vm857_vm2, %v8149_v33, %v5573_v5  ;;  %v1599_v17 = vmax.f32 %v1595_v49, %v5674_v21  ;;  %v8160_v49 = vld [vmem:[#allocation96_spill] sm:$0xff]  ;;  %v8162_v33 = vld [vmem:[#allocation97_spill] sm:$0xff] }
 0x1d3   :  { %v5718_v55 = vadd.f32 %v1477_v44, %v8151_v0  ;;  %v5721_v47 = vadd.f32 %v1478_v46, %v8153_v40  ;;  %v1485_v1 = vmul.f32 %v901_v36, %v5353_v32  ;;  %v5727_v29 = vadd.f32 %v1479_v43, %v8156_v59  ;;  %v8161_v46 = vld [vmem:[#allocation54_spill] sm:$0xff]  ;;  %v8163_v59 = vld [vmem:[#allocation55_spill] sm:$0xff]  ;;  %v8165_v21 = vld [vmem:[#allocation61_spill] sm:$0xff] }
 0x1d4   :  { %v5680_v4 = vpop.permute.xlu1 %767  ;;  %v5730_v39 = vadd.f32 %v1480_v50, %v8158_v48  ;;  %v1486_v5 = vmul.f32 %v902_v11, %v5353_v32  ;;  %v904_v44 = vsel %vm857_vm2, %v8160_v49, %v5583_v19  ;;  %v1600_v0 = vmax.f32 %v1596_v26, %v5702_v3  ;;  %v8164_v50 = vld [vmem:[#allocation58_spill] sm:$0xff]  ;;  %v8166_v26 = vld [vmem:[#allocation99_spill] sm:$0xff] }
 0x1d5   :  { %8140 = vst [vmem:[#allocation165_spill] sm:$0xff] %v5680_v4  ;;  %v5692_v31 = vpop.permute.xlu0 %769  ;;  %8152 = vst [vmem:[#allocation44_spill] sm:$0xff] %v5718_v55  ;;  %v5738_v40 = vadd.f32 %v1481_v20, %v8161_v46  ;;  %v1487_v36 = vmul.f32 %v903_v13, %v5353_v32  ;;  %v905_v43 = vsel %vm857_vm2, %v8162_v33, %v5611_v8  ;;  %v8168_v8 = vld [vmem:[#allocation64_spill] sm:$0xff]  ;;  %v8176_v49 = vld [vmem:[#allocation103_spill] sm:$0xff] }
 0x1d6   :  { %8144 = vst [vmem:[#allocation166_spill] sm:$0xff] %v5692_v31  ;;  %8154 = vst [vmem:[#allocation45_spill] sm:$0xff] %v5721_v47  ;;  %v5745_v48 = vadd.f32 %v1482_v25, %v8163_v59  ;;  %v5748_v11 = vadd.f32 %v1483_v37, %v8164_v50  ;;  %v5751_v61 = vadd.f32 %v1484_v42, %v8165_v21  ;;  %v8170_v59 = vld [vmem:[#allocation65_spill] sm:$0xff] }
 0x1d7   :  { %8157 = vst [vmem:[#allocation48_spill] sm:$0xff] %v5727_v29  ;;  %8159 = vst [vmem:[#allocation51_spill] sm:$0xff] %v5730_v39  ;;  %v906_v20 = vsel %vm857_vm2, %v8166_v26, %v5623_v35  ;;  %v1601_v13 = vmax.f32 %v1597_v15, %v5718_v55  ;;  %v1602_v19 = vmax.f32 %v1598_v58, %v5721_v47  ;;  %v8171_v26 = vld [vmem:[#allocation68_spill] sm:$0xff] }
 0x1d8   :  { %v5714_v28 = vpop.permute.xlu1 %771  ;;  %v5761_v33 = vadd.f32 %v1485_v1, %v8168_v8  ;;  %v1488_v25 = vmul.f32 %v904_v44, %v5353_v32  ;;  %v1603_v21 = vmax.f32 %v1599_v17, %v5727_v29  ;;  %v1604_v42 = vmax.f32 %v1600_v0, %v5730_v39  ;;  %v8172_v1 = vld [vmem:[#allocation100_spill] sm:$0xff] }
 0x1d9   :  { %8150 = vst [vmem:[#allocation167_spill] sm:$0xff] %v5714_v28  ;;  %v5724_v22 = vpop.permute.xlu0 %773  ;;  %v5769_v50 = vadd.f32 %v1486_v5, %v8170_v59  ;;  %v1489_v35 = vmul.f32 %v905_v43, %v5353_v32  ;;  %v1605_v15 = vmax.f32 %v1601_v13, %v5738_v40  ;;  %v5774_v58 = vadd.f32 %v1487_v36, %v8171_v26  ;;  %v8173_v59 = vld [vmem:[#allocation102_spill] sm:$0xff]  ;;  %v8175_v26 = vld [vmem:[#allocation71_spill] sm:$0xff]  ;;  %v8192_v55 = vld [vmem:[#allocation84_spill] sm:$0xff] }
 0x1da   :  { %8155 = vst [vmem:[#allocation168_spill] sm:$0xff] %v5724_v22  ;;  %v1490_v8 = vmul.f32 %v906_v20, %v5353_v32  ;;  %v907_v44 = vsel %vm857_vm2, %v8172_v1, %v5645_v34  ;;  %v1606_v17 = vmax.f32 %v1602_v19, %v5745_v48  ;;  %v1607_v0 = vmax.f32 %v1603_v21, %v5748_v11  ;;  %v8177_v19 = vld [vmem:[#allocation107_spill] sm:$0xff] }
 0x1db   :  { %v1608_v5 = vmax.f32 %v1604_v42, %v5751_v61  ;;  %v908_v43 = vsel %vm857_vm2, %v8173_v59, %v5652_v7  ;;  %v1609_v36 = vmax.f32 %v1605_v15, %v5761_v33  ;;  %v5790_v20 = vadd.f32 %v1488_v25, %v8175_v26  ;;  %v8179_v7 = vld [vmem:[#allocation74_spill] sm:$0xff]  ;;  %v8180_v25 = vld [vmem:[#allocation109_spill] sm:$0xff] }
 0x1dc   :  { %v5756_v46 = vpop.permute.xlu1 %775  ;;  %v909_v34 = vsel %vm857_vm2, %v8176_v49, %v5680_v4  ;;  %v911_v21 = vsel %vm857_vm2, %v8177_v19, %v5714_v28  ;;  %v1610_v1 = vmax.f32 %v1606_v17, %v5769_v50  ;;  %v5802_v59 = vadd.f32 %v1489_v35, %v8179_v7  ;;  %v8181_v4 = vld [vmem:[#allocation75_spill] sm:$0xff]  ;;  %v8182_v19 = vld [vmem:[#allocation110_spill] sm:$0xff] }
 0x1dd   :  { %8167 = vst [vmem:[#allocation54_spill] sm:$0xff] %v5756_v46  ;;  %v5764_v37 = vpop.permute.xlu0 %777  ;;  %v1491_v15 = vmul.f32 %v907_v44, %v5353_v32  ;;  %v912_v26 = vsel %vm857_vm2, %v8180_v25, %v5724_v22  ;;  %v1611_v39 = vmax.f32 %v1607_v0, %v5774_v58  ;;  %v5810_v49 = vadd.f32 %v1490_v8, %v8181_v4  ;;  %v8183_v7 = vld [vmem:[#allocation106_spill] sm:$0xff]  ;;  %v8184_v22 = vld [vmem:[#allocation113_spill] sm:$0xff] }
 0x1de   :  { %8169 = vst [vmem:[#allocation55_spill] sm:$0xff] %v5764_v37  ;;  %v1492_v28 = vmul.f32 %v908_v43, %v5353_v32  ;;  %v913_v17 = vsel %vm857_vm2, %v8182_v19, %v5756_v46  ;;  %v1493_v35 = vmul.f32 %v909_v34, %v5353_v32  ;;  %v910_v44 = vsel %vm857_vm2, %v8183_v7, %v5692_v31  ;;  %v8186_v46 = vld [vmem:[#allocation116_spill] sm:$0xff]  ;;  %v8187_v19 = vld [vmem:[#allocation117_spill] sm:$0xff]  ;;  %v8189_v7 = vld [vmem:[#allocation78_spill] sm:$0xff] }
 0x1df   :  { %v1495_v29 = vmul.f32 %v911_v21, %v5353_v32  ;;  %v1612_v8 = vmax.f32 %v1608_v5, %v5790_v20  ;;  %v1496_v43 = vmul.f32 %v912_v26, %v5353_v32  ;;  %v1613_v21 = vmax.f32 %v1609_v36, %v5802_v59  ;;  %v8190_v5 = vld [vmem:[#allocation112_spill] sm:$0xff] }
 0x1e0   :  { %v5786_v13 = vpop.permute.xlu1 %779  ;;  %v914_v26 = vsel %vm857_vm2, %v8190_v5, %v5764_v37  ;;  %v1614_v47 = vmax.f32 %v1610_v1, %v5810_v49  ;;  %v5851_v36 = vadd.f32 %v1493_v35, %v8192_v55  ;;  %v8195_v1 = vld [vmem:[#allocation91_spill] sm:$0xff]  ;;  %v8197_v55 = vld [vmem:[#allocation121_spill] sm:$0xff] }
 0x1e1   :  { %8174 = vst [vmem:[#allocation58_spill] sm:$0xff] %v5786_v13  ;;  %v5798_v42 = vpop.permute.xlu0 %781  ;;  %v915_v0 = vsel %vm857_vm2, %v8184_v22, %v5786_v13  ;;  %v5838_v13 = vadd.f32 %v1491_v15, %v8189_v7  ;;  %v1497_v22 = vmul.f32 %v913_v17, %v5353_v32  ;;  %v8193_v15 = vld [vmem:[#allocation88_spill] sm:$0xff]  ;;  %v5861_v5 = vadd.f32 %v1496_v43, %v8195_v1 }
 0x1e2   :  { %8178 = vst [vmem:[#allocation61_spill] sm:$0xff] %v5798_v42  ;;  %v916_v34 = vsel %vm857_vm2, %v8186_v46, %v5798_v42  ;;  %v8191_v42 = vld [vmem:[#allocation81_spill] sm:$0xff]  ;;  %v5854_v7 = vadd.f32 %v1495_v29, %v8193_v15  ;;  %v8200_v15 = vld [vmem:[#allocation123_spill] sm:$0xff] }
 0x1e3   :  { %v5846_v46 = vadd.f32 %v1492_v28, %v8191_v42  ;;  %v1500_v17 = vmul.f32 %v916_v34, %v5353_v32  ;;  %v1498_v28 = vmul.f32 %v914_v26, %v5353_v32  ;;  %v8196_v42 = vld [vmem:[#allocation119_spill] sm:$0xff] }
 0x1e4   :  { %v5824_v4 = vpop.permute.xlu1 %783 }
 0x1e5   :  { %8185 = vst [vmem:[#allocation64_spill] sm:$0xff] %v5824_v4  ;;  %v917_v25 = vsel %vm857_vm2, %v8187_v19, %v5824_v4  ;;  %v5834_v31 = vpop.permute.xlu0 %785  ;;  %v1494_v4 = vmul.f32 %v910_v44, %v5353_v32  ;;  %v1499_v19 = vmul.f32 %v915_v0, %v5353_v32  ;;  %v1615_v0 = vmax.f32 %v1611_v39, %v5838_v13 }
 0x1e6   :  { %8188 = vst [vmem:[#allocation65_spill] sm:$0xff] %v5834_v31  ;;  %v1501_v3 = vmul.f32 %v917_v25, %v5353_v32  ;;  %v918_v44 = vsel %vm857_vm2, %v8196_v42, %v5834_v31  ;;  %v8199_v25 = vld [vmem:[#allocation94_spill] sm:$0xff]  ;;  %v1616_v1 = vmax.f32 %v1612_v8, %v5846_v46  ;;  %v8201_v31 = vld [vmem:[#allocation85_spill] sm:$0xff]  ;;  %v1617_v39 = vmax.f32 %v1613_v21, %v5851_v36 }
 0x1e7   :  { %v5874_v34 = vadd.f32 %v1497_v22, %v8199_v25  ;;  %v5882_v42 = vadd.f32 %v1494_v4, %v8201_v31  ;;  %v8203_v22 = vld [vmem:[#allocation101_spill] sm:$0xff]  ;;  %v1619_v31 = vmax.f32 %v1615_v0, %v5854_v7 }
 0x1e8   :  { %v5858_v37 = vpop.permute.xlu1 %787  ;;  %v5890_v25 = vadd.f32 %v1500_v17, %v8203_v22  ;;  %v1620_v4 = vmax.f32 %v1616_v1, %v5861_v5  ;;  %v8207_v8 = vld [vmem:[#allocation125_spill] sm:$0xff]  ;;  %v8209_v22 = vld [vmem:[#allocation111_spill] sm:$0xff] }
 0x1e9   :  { %8194 = vst [vmem:[#allocation68_spill] sm:$0xff] %v5858_v37  ;;  %v919_v29 = vsel %vm857_vm2, %v8197_v55, %v5858_v37  ;;  %v5870_v35 = vpop.permute.xlu0 %789  ;;  %v5885_v37 = vadd.f32 %v1499_v19, %v8202_v18  ;;  %v8206_v18 = vld [vmem:[#allocation95_spill] sm:$0xff]  ;;  %v1621_v17 = vmax.f32 %v1617_v39, %v5874_v34  ;;  %v1618_v0 = vmax.f32 %v1614_v47, %v5882_v42  ;;  %v8211_v39 = vld [vmem:[#allocation114_spill] sm:$0xff] }
 0x1ea   :  { %8198 = vst [vmem:[#allocation71_spill] sm:$0xff] %v5870_v35  ;;  %v1503_v43 = vmul.f32 %v919_v29, %v5353_v32  ;;  %v920_v26 = vsel %vm857_vm2, %v8200_v15, %v5870_v35  ;;  %v8204_v29 = vld [vmem:[#allocation104_spill] sm:$0xff]  ;;  %v1502_v35 = vmul.f32 %v918_v44, %v5353_v32  ;;  %v5901_v19 = vadd.f32 %v1498_v28, %v8206_v18 }
 0x1eb   :  { %v1504_v55 = vmul.f32 %v920_v26, %v5353_v32  ;;  %v5893_v60 = vadd.f32 %v1501_v3, %v8204_v29  ;;  %v8208_v26 = vld [vmem:[#allocation108_spill] sm:$0xff]  ;;  %v1623_v1 = vmax.f32 %v1619_v31, %v5885_v37  ;;  %v1624_v28 = vmax.f32 %v1620_v4, %v5890_v25 }
 0x1ec   :  { %v5896_v15 = vpop.permute.xlu1 %791  ;;  %v5908_v3 = vadd.f32 %v1503_v43, %v8208_v26  ;;  %v1622_v43 = vmax.f32 %v1618_v0, %v5901_v19 }
 0x1ed   :  { %8205 = vst [vmem:[#allocation74_spill] sm:$0xff] %v5896_v15  ;;  %v921_v21 = vsel %vm857_vm2, %v8207_v8, %v5896_v15  ;;  %v5911_v44 = vadd.f32 %v1504_v55, %v8209_v22  ;;  %v1625_v18 = vmax.f32 %v1621_v17, %v5893_v60  ;;  %v5919_v15 = vadd.f32 %v1502_v35, %v8210_v14 }
 0x1ee   :  { %v1505_v29 = vmul.f32 %v921_v21, %v5353_v32  ;;  %v1627_v55 = vmax.f32 %v1623_v1, %v5908_v3 }
 0x1ef   :  { %v1628_v32 = vmax.f32 %v1624_v28, %v5911_v44  ;;  %v1626_v31 = vmax.f32 %v1622_v43, %v5919_v15 }
 0x1f0   :  { %v5922_v8 = vadd.f32 %v1505_v29, %v8211_v39 }
 0x1f1   :  { %v1630_v4 = vmax.f32 %v1626_v31, %v1627_v55 }
 0x1f2   :  { %v1629_v47 = vmax.f32 %v1625_v18, %v5922_v8 }
 0x1f4   :  { %v1631_v21 = vmax.f32 %v1628_v32, %v1629_v47 }
 0x1f6   :  { %v5929_v26 = vmax.f32 %v1630_v4, %v1631_v21 }
 0x1f8   :  { %v1652_v14 = vsub.f32 %v5570_v24, %v5929_v26  ;;  %v1653_v35 = vsub.f32 %v5576_v57, %v5929_v26  ;;  %v1633_v17 = vsub.f32 %v5430_v53, %v5929_v26  ;;  %v1634_v47 = vsub.f32 %v5399_v54, %v5929_v26 }
 0x1f9   :  { %v1635_v31 = vsub.f32 %v5445_v23, %v5929_v26  ;;  %v1636_v4 = vsub.f32 %v5427_v12, %v5929_v26  ;;  %v1637_v43 = vsub.f32 %v5403_v9, %v5929_v26  ;;  %v1638_v32 = vsub.f32 %v5433_v51, %v5929_v26 }
 0x1fa   :  { %v1697_v39 = vmul.f32 1.442695, %v1633_v17  ;;  %v1699_v21 = vmul.f32 1.442695, %v1634_v47  ;;  %v1639_v54 = vsub.f32 %v5450_v2, %v5929_v26  ;;  %v1640_v23 = vsub.f32 %v5454_v16, %v5929_v26 }
 0x1fb   :  { %v1701_v55 = vmul.f32 1.442695, %v1635_v31  ;;  %v1703_v53 = vmul.f32 1.442695, %v1636_v4  ;;  %v1705_v17 = vmul.f32 1.442695, %v1637_v43  ;;  %v1642_v51 = vsub.f32 %v5460_v45, %v5929_v26 }
 0x1fc   :  { %4189 = vpow2.f32 %v1697_v39  ;;  %v1707_v12 = vmul.f32 1.442695, %v1638_v32  ;;  %v1641_v39 = vsub.f32 %v5457_v63, %v5929_v26  ;;  %v1709_v9 = vmul.f32 1.442695, %v1639_v54 }
 0x1fd   :  { %4191 = vpow2.f32 %v1699_v21  ;;  %v1711_v2 = vmul.f32 1.442695, %v1640_v23  ;;  %v1643_v43 = vsub.f32 %v5470_v56, %v5929_v26  ;;  %v1715_v32 = vmul.f32 1.442695, %v1642_v51 }
 0x1fe   :  { %4193 = vpow2.f32 %v1701_v55  ;;  %v1713_v16 = vmul.f32 1.442695, %v1641_v39  ;;  %v1644_v55 = vsub.f32 %v5479_v27, %v5929_v26  ;;  %v1645_v4 = vsub.f32 %v5482_v10, %v5929_v26 }
 0x1ff   :  { %4195 = vpow2.f32 %v1703_v53  ;;  %v1717_v56 = vmul.f32 1.442695, %v1643_v43  ;;  %v1646_v23 = vsub.f32 %v5485_v30, %v5929_v26  ;;  %v1648_v43 = vsub.f32 %v5505_v6, %v5929_v26 }
 0x200   :  { %4197 = vpow2.f32 %v1705_v17  ;;  %v1719_v27 = vmul.f32 1.442695, %v1644_v55  ;;  %v1721_v10 = vmul.f32 1.442695, %v1645_v4  ;;  %v1649_v55 = vsub.f32 %v5521_v38, %v5929_v26  ;;  %v8212_v4 = vld [vmem:[#allocation9_spill] sm:$0xff] }
 0x201   :  { %4199 = vpow2.f32 %v1707_v12  ;;  %v1723_v30 = vmul.f32 1.442695, %v1646_v23  ;;  %v1727_v6 = vmul.f32 1.442695, %v1648_v43 }
 0x202   :  { %4201 = vpow2.f32 %v1709_v9  ;;  %v1647_v9 = vsub.f32 %v5493_v62, %v5929_v26  ;;  %v1729_v38 = vmul.f32 1.442695, %v1649_v55  ;;  %v1735_v55 = vmul.f32 1.442695, %v1652_v14 }
 0x203   :  { %4203 = vpow2.f32 %v1711_v2 }
 0x204   :  { %4205 = vpow2.f32 %v1713_v16  ;;  %v1725_v62 = vmul.f32 1.442695, %v1647_v9 }
 0x205   :  { %4207 = vpow2.f32 %v1715_v32 }
 0x206   :  { %v6003_v47 = vpop.eup %4189  ;;  %4209 = vpow2.f32 %v1717_v56  ;;  %v1650_v56 = vsub.f32 %v8212_v4, %v5929_v26 }
 0x207   :  { %v6005_v31 = vpop.eup %4191  ;;  %4211 = vpow2.f32 %v1719_v27  ;;  %v8213_v27 = vld [vmem:[#allocation11_spill] sm:$0xff] }
 0x208   :  { %v1825_v53 = vadd.f32 %v6005_v31, %v6003_v47  ;;  %v6013_v63 = vpop.eup %4193  ;;  %4213 = vpow2.f32 %v1721_v10 }
 0x209   :  { %v6018_v45 = vpop.eup %4195  ;;  %4215 = vpow2.f32 %v1723_v30 }
 0x20a   :  { %v1826_v21 = vadd.f32 %v6013_v63, %v1825_v53  ;;  %v6023_v17 = vpop.eup %4197  ;;  %4217 = vpow2.f32 %v1725_v62  ;;  %v1654_v62 = vsub.f32 %v5587_v41, %v5929_v26 }
 0x20b   :  { %v6028_v39 = vpop.eup %4199  ;;  %4219 = vpow2.f32 %v1727_v6 }
 0x20c   :  { %v1827_v54 = vadd.f32 %v6018_v45, %v1826_v21  ;;  %v6033_v2 = vpop.eup %4201  ;;  %4221 = vpow2.f32 %v1729_v38  ;;  %v8214_v38 = vld [vmem:[#allocation14_spill] sm:$0xff]  ;;  %v1739_v14 = vmul.f32 1.442695, %v1654_v62 }
 0x20d   :  { %v6038_v53 = vpop.eup %4203  ;;  %v1656_v24 = vsub.f32 %v8214_v38, %v5929_v26 }
 0x20e   :  { %v1828_v12 = vadd.f32 %v6023_v17, %v1827_v54  ;;  %v6043_v21 = vpop.eup %4205 }
 0x20f   :  { %v6048_v23 = vpop.eup %4207  ;;  %v1743_v38 = vmul.f32 1.442695, %v1656_v24 }
 0x210   :  { %v1829_v51 = vadd.f32 %v6028_v39, %v1828_v12  ;;  %v1651_v12 = vsub.f32 %v8213_v27, %v5929_v26  ;;  %v6053_v10 = vpop.eup %4209  ;;  %v1737_v27 = vmul.f32 1.442695, %v1653_v35 }
 0x211   :  { %v6056_v4 = vpop.eup %4211 }
 0x212   :  { %v1830_v16 = vadd.f32 %v6033_v2, %v1829_v51  ;;  %v1731_v51 = vmul.f32 1.442695, %v1650_v56  ;;  %v1733_v43 = vmul.f32 1.442695, %v1651_v12 }
 0x214   :  { %v1831_v32 = vadd.f32 %v6038_v53, %v1830_v16  ;;  %4223 = vpow2.f32 %v1731_v51 }
 0x215   :  { %4225 = vpow2.f32 %v1733_v43 }
 0x216   :  { %v1832_v54 = vadd.f32 %v6043_v21, %v1831_v32  ;;  %v6059_v32 = vpop.eup %4213  ;;  %4227 = vpow2.f32 %v1735_v55 }
 0x217   :  { %v6067_v6 = vpop.eup %4215  ;;  %4229 = vpow2.f32 %v1737_v27 }
 0x218   :  { %v1833_v9 = vadd.f32 %v6048_v23, %v1832_v54  ;;  %v1655_v54 = vsub.f32 %v5592_v52, %v5929_v26  ;;  %v6075_v41 = vpop.eup %4217  ;;  %v8215_v52 = vld [vmem:[#allocation15_spill] sm:$0xff]  ;;  %4231 = vpow2.f32 %v1739_v14 }
 0x219   :  { %v6080_v51 = vpop.eup %4219 }
 0x21a   :  { %v1834_v16 = vadd.f32 %v6053_v10, %v1833_v9  ;;  %v1741_v43 = vmul.f32 1.442695, %v1655_v54  ;;  %v6085_v35 = vpop.eup %4221 }
 0x21c   :  { %v1835_v30 = vadd.f32 %v6056_v4, %v1834_v16  ;;  %v1657_v16 = vsub.f32 %v8215_v52, %v5929_v26  ;;  %4233 = vpow2.f32 %v1741_v43 }
 0x21d   :  { %4235 = vpow2.f32 %v1743_v38 }
 0x21e   :  { %v1836_v56 = vadd.f32 %v6059_v32, %v1835_v30  ;;  %v8216_v30 = vld [vmem:[#allocation16_spill] sm:$0xff]  ;;  %v6090_v55 = vpop.eup %4223  ;;  %v1745_v52 = vmul.f32 1.442695, %v1657_v16 }
 0x21f   :  { %v6095_v27 = vpop.eup %4225 }
 0x220   :  { %v1837_v12 = vadd.f32 %v6067_v6, %v1836_v56  ;;  %v1658_v56 = vsub.f32 %v8216_v30, %v5929_v26  ;;  %8218 = vst [vmem:[#allocation75_spill] sm:$0xff] %v6095_v27  ;;  %v6100_v14 = vpop.eup %4227  ;;  %4237 = vpow2.f32 %v1745_v52 }
 0x221   :  { %8220 = vst [vmem:[#allocation78_spill] sm:$0xff] %v6100_v14  ;;  %v6105_v43 = vpop.eup %4229 }
 0x222   :  { %v1838_v9 = vadd.f32 %v6075_v41, %v1837_v12  ;;  %v8217_v12 = vld [vmem:[#allocation19_spill] sm:$0xff]  ;;  %v1747_v30 = vmul.f32 1.442695, %v1658_v56  ;;  %8222 = vst [vmem:[#allocation81_spill] sm:$0xff] %v6105_v43  ;;  %v6110_v38 = vpop.eup %4231 }
 0x223   :  { %v1659_v18 = vsub.f32 %v8217_v12, %v5929_v26  ;;  %8224 = vst [vmem:[#allocation84_spill] sm:$0xff] %v6110_v38 }
 0x224   :  { %v1839_v57 = vadd.f32 %v6080_v51, %v1838_v9  ;;  %v8219_v9 = vld [vmem:[#allocation20_spill] sm:$0xff]  ;;  %4239 = vpow2.f32 %v1747_v30 }
 0x225   :  { %v1660_v28 = vsub.f32 %v8219_v9, %v5929_v26  ;;  %v1749_v12 = vmul.f32 1.442695, %v1659_v18 }
 0x226   :  { %v1840_v62 = vadd.f32 %v6085_v35, %v1839_v57  ;;  %v8221_v57 = vld [vmem:[#allocation25_spill] sm:$0xff]  ;;  %v6115_v52 = vpop.eup %4233 }
 0x227   :  { %v1661_v1 = vsub.f32 %v8221_v57, %v5929_v26  ;;  %v1751_v9 = vmul.f32 1.442695, %v1660_v28  ;;  %4241 = vpow2.f32 %v1749_v12  ;;  %8226 = vst [vmem:[#allocation88_spill] sm:$0xff] %v6115_v52  ;;  %v6120_v30 = vpop.eup %4235 }
 0x228   :  { %v1841_v54 = vadd.f32 %v6090_v55, %v1840_v62  ;;  %v8223_v62 = vld [vmem:[#allocation28_spill] sm:$0xff]  ;;  %8228 = vst [vmem:[#allocation91_spill] sm:$0xff] %v6120_v30 }
 0x229   :  { %v1662_v0 = vsub.f32 %v8223_v62, %v5929_v26  ;;  %v1753_v57 = vmul.f32 1.442695, %v1661_v1  ;;  %4243 = vpow2.f32 %v1751_v9 }
 0x22a   :  { %v1842_v24 = vadd.f32 %v6095_v27, %v1841_v54  ;;  %v8225_v54 = vld [vmem:[#allocation31_spill] sm:$0xff]  ;;  %v6125_v12 = vpop.eup %4237 }
 0x22b   :  { %v1663_v29 = vsub.f32 %v8225_v54, %v5929_v26  ;;  %v1755_v62 = vmul.f32 1.442695, %v1662_v0  ;;  %4245 = vpow2.f32 %v1753_v57 }
 0x22c   :  { %v1843_v16 = vadd.f32 %v6100_v14, %v1842_v24  ;;  %v8227_v24 = vld [vmem:[#allocation34_spill] sm:$0xff] }
 0x22d   :  { %v1664_v22 = vsub.f32 %v8227_v24, %v5929_v26  ;;  %v1757_v54 = vmul.f32 1.442695, %v1663_v29  ;;  %4247 = vpow2.f32 %v1755_v62 }
 0x22e   :  { %v1844_v56 = vadd.f32 %v6105_v43, %v1843_v16  ;;  %v8229_v16 = vld [vmem:[#allocation35_spill] sm:$0xff]  ;;  %v6130_v9 = vpop.eup %4239 }
 0x22f   :  { %v1665_v43 = vsub.f32 %v8229_v16, %v5929_v26  ;;  %v1759_v24 = vmul.f32 1.442695, %v1664_v22  ;;  %4249 = vpow2.f32 %v1757_v54 }
 0x230   :  { %v1845_v18 = vadd.f32 %v6110_v38, %v1844_v56  ;;  %v8230_v56 = vld [vmem:[#allocation38_spill] sm:$0xff] }
 0x231   :  { %v1666_v38 = vsub.f32 %v8230_v56, %v5929_v26  ;;  %v1761_v16 = vmul.f32 1.442695, %v1665_v43  ;;  %v6135_v57 = vpop.eup %4241  ;;  %4251 = vpow2.f32 %v1759_v24 }
 0x232   :  { %v1846_v28 = vadd.f32 %v6115_v52, %v1845_v18  ;;  %v8231_v18 = vld [vmem:[#allocation41_spill] sm:$0xff]  ;;  %8232 = vst [vmem:[#allocation94_spill] sm:$0xff] %v6135_v57 }
 0x233   :  { %v1667_v52 = vsub.f32 %v8231_v18, %v5929_v26  ;;  %v1763_v56 = vmul.f32 1.442695, %v1666_v38  ;;  %v6140_v62 = vpop.eup %4243  ;;  %4253 = vpow2.f32 %v1761_v16 }
 0x234   :  { %v1847_v1 = vadd.f32 %v6120_v30, %v1846_v28  ;;  %v8233_v28 = vld [vmem:[#allocation44_spill] sm:$0xff]  ;;  %8234 = vst [vmem:[#allocation85_spill] sm:$0xff] %v6140_v62 }
 0x235   :  { %v1668_v30 = vsub.f32 %v8233_v28, %v5929_v26  ;;  %v1765_v18 = vmul.f32 1.442695, %v1667_v52  ;;  %v6145_v54 = vpop.eup %4245  ;;  %4255 = vpow2.f32 %v1763_v56 }
 0x236   :  { %v1848_v0 = vadd.f32 %v6125_v12, %v1847_v1  ;;  %v8235_v1 = vld [vmem:[#allocation45_spill] sm:$0xff] }
 0x237   :  { %v1669_v14 = vsub.f32 %v8235_v1, %v5929_v26  ;;  %v1767_v28 = vmul.f32 1.442695, %v1668_v30  ;;  %v6150_v24 = vpop.eup %4247  ;;  %4257 = vpow2.f32 %v1765_v18 }
 0x238   :  { %v1849_v29 = vadd.f32 %v6130_v9, %v1848_v0  ;;  %v8236_v0 = vld [vmem:[#allocation48_spill] sm:$0xff] }
 0x239   :  { %v1670_v27 = vsub.f32 %v8236_v0, %v5929_v26  ;;  %v1769_v1 = vmul.f32 1.442695, %v1669_v14  ;;  %v6155_v16 = vpop.eup %4249  ;;  %4259 = vpow2.f32 %v1767_v28  ;;  %v8238_v14 = vsub.f32 %v5738_v40, %v5929_v26 }
 0x23a   :  { %v1850_v22 = vadd.f32 %v6135_v57, %v1849_v29  ;;  %v8237_v29 = vld [vmem:[#allocation51_spill] sm:$0xff] }
 0x23b   :  { %v1671_v57 = vsub.f32 %v8237_v29, %v5929_v26  ;;  %v6158_v0 = vpop.eup %4251  ;;  %4261 = vpow2.f32 %v1769_v1  ;;  %v1775_v18 = vmul.f32 1.442695, %v8238_v14 }
 0x23c   :  { %v1851_v43 = vadd.f32 %v6140_v62, %v1850_v22  ;;  %v1771_v22 = vmul.f32 1.442695, %v1670_v27  ;;  %v8239_v27 = vsub.f32 %v5745_v48, %v5929_v26 }
 0x23d   :  { %v1773_v30 = vmul.f32 1.442695, %v1671_v57 }
 0x23e   :  { %v1852_v38 = vadd.f32 %v6145_v54, %v1851_v43  ;;  %v6161_v43 = vpop.eup %4253  ;;  %4263 = vpow2.f32 %v1771_v22  ;;  %v1777_v28 = vmul.f32 1.442695, %v8239_v27 }
 0x23f   :  { %v6167_v29 = vpop.eup %4255  ;;  %4265 = vpow2.f32 %v1773_v30  ;;  %v8242_v30 = vsub.f32 %v5751_v61, %v5929_v26 }
 0x240   :  { %v1853_v52 = vadd.f32 %v6150_v24, %v1852_v38  ;;  %4267 = vpow2.f32 %v1775_v18  ;;  %v8244_v18 = vsub.f32 %v5761_v33, %v5929_v26 }
 0x241   :  { %v6173_v1 = vpop.eup %4257  ;;  %4269 = vpow2.f32 %v1777_v28  ;;  %v8246_v28 = vsub.f32 %v5769_v50, %v5929_v26 }
 0x242   :  { %v1854_v62 = vadd.f32 %v6155_v16, %v1853_v52 }
 0x243   :  { %v6179_v22 = vpop.eup %4259 }
 0x244   :  { %v1855_v56 = vadd.f32 %v6158_v0, %v1854_v62  ;;  %v8240_v62 = vsub.f32 %v5748_v11, %v5929_v26  ;;  %8241 = vst [vmem:[#allocation98_spill] sm:$0xff] %v6179_v22 }
 0x245   :  { %v6185_v14 = vpop.eup %4261 }
 0x246   :  { %v1856_v38 = vadd.f32 %v6161_v43, %v1855_v56  ;;  %v1779_v52 = vmul.f32 1.442695, %v8240_v62  ;;  %v1781_v56 = vmul.f32 1.442695, %v8242_v30  ;;  %8243 = vst [vmem:[#allocation101_spill] sm:$0xff] %v6185_v14 }
 0x248   :  { %v1857_v57 = vadd.f32 %v6167_v29, %v1856_v38  ;;  %4271 = vpow2.f32 %v1779_v52  ;;  %v1783_v38 = vmul.f32 1.442695, %v8244_v18  ;;  %v6191_v27 = vpop.eup %4263  ;;  %v8248_v52 = vsub.f32 %v5774_v58, %v5929_v26 }
 0x249   :  { %8245 = vst [vmem:[#allocation104_spill] sm:$0xff] %v6191_v27  ;;  %4273 = vpow2.f32 %v1781_v56  ;;  %v6197_v62 = vpop.eup %4265  ;;  %v8250_v56 = vsub.f32 %v5790_v20, %v5929_v26 }
 0x24a   :  { %v1858_v40 = vadd.f32 %v6173_v1, %v1857_v57  ;;  %v1785_v57 = vmul.f32 1.442695, %v8246_v28  ;;  %8247 = vst [vmem:[#allocation95_spill] sm:$0xff] %v6197_v62  ;;  %4275 = vpow2.f32 %v1783_v38  ;;  %v6203_v30 = vpop.eup %4267  ;;  %v8251_v38 = vsub.f32 %v5802_v59, %v5929_v26 }
 0x24b   :  { %8249 = vst [vmem:[#allocation108_spill] sm:$0xff] %v6203_v30  ;;  %v6209_v18 = vpop.eup %4269 }
 0x24c   :  { %v1859_v48 = vadd.f32 %v6179_v22, %v1858_v40  ;;  %v1787_v40 = vmul.f32 1.442695, %v8248_v52  ;;  %4277 = vpow2.f32 %v1785_v57  ;;  %v8252_v57 = vsub.f32 %v5810_v49, %v5929_v26 }
 0x24e   :  { %v1860_v11 = vadd.f32 %v6185_v14, %v1859_v48  ;;  %v1789_v48 = vmul.f32 1.442695, %v8250_v56  ;;  %4279 = vpow2.f32 %v1787_v40  ;;  %v8254_v40 = vsub.f32 %v5838_v13, %v5929_v26 }
 0x250   :  { %v1861_v61 = vadd.f32 %v6191_v27, %v1860_v11  ;;  %v1791_v11 = vmul.f32 1.442695, %v8251_v38  ;;  %4281 = vpow2.f32 %v1789_v48  ;;  %v8255_v48 = vsub.f32 %v5846_v46, %v5929_v26 }
 0x252   :  { %v1862_v33 = vadd.f32 %v6197_v62, %v1861_v61  ;;  %v6215_v28 = vpop.eup %4271  ;;  %v1793_v61 = vmul.f32 1.442695, %v8252_v57  ;;  %4283 = vpow2.f32 %v1791_v11  ;;  %v8256_v11 = vsub.f32 %v5851_v36, %v5929_v26 }
 0x253   :  { %v6221_v52 = vpop.eup %4273 }
 0x254   :  { %v1863_v50 = vadd.f32 %v6203_v30, %v1862_v33  ;;  %8253 = vst [vmem:[#allocation111_spill] sm:$0xff] %v6221_v52  ;;  %v1795_v33 = vmul.f32 1.442695, %v8254_v40  ;;  %v6227_v56 = vpop.eup %4275  ;;  %4285 = vpow2.f32 %v1793_v61  ;;  %v8257_v61 = vsub.f32 %v5882_v42, %v5929_v26 }
 0x256   :  { %v1864_v58 = vadd.f32 %v6209_v18, %v1863_v50  ;;  %v1797_v50 = vmul.f32 1.442695, %v8255_v48  ;;  %v6233_v38 = vpop.eup %4277  ;;  %4287 = vpow2.f32 %v1795_v33  ;;  %v8258_v33 = vsub.f32 %v5854_v7, %v5929_v26 }
 0x258   :  { %v1865_v20 = vadd.f32 %v6215_v28, %v1864_v58  ;;  %v1799_v58 = vmul.f32 1.442695, %v8256_v11  ;;  %v6239_v57 = vpop.eup %4279  ;;  %4289 = vpow2.f32 %v1797_v50  ;;  %v8259_v50 = vsub.f32 %v5861_v5, %v5929_v26 }
 0x25a   :  { %v1866_v59 = vadd.f32 %v6221_v52, %v1865_v20  ;;  %v1801_v20 = vmul.f32 1.442695, %v8257_v61  ;;  %v6245_v40 = vpop.eup %4281  ;;  %4291 = vpow2.f32 %v1799_v58  ;;  %v8260_v58 = vsub.f32 %v5874_v34, %v5929_v26 }
 0x25c   :  { %v1867_v49 = vadd.f32 %v6227_v56, %v1866_v59  ;;  %v1803_v59 = vmul.f32 1.442695, %v8258_v33  ;;  %v6251_v48 = vpop.eup %4283  ;;  %4293 = vpow2.f32 %v1801_v20  ;;  %v8261_v20 = vsub.f32 %v5901_v19, %v5929_v26 }
 0x25e   :  { %v1868_v13 = vadd.f32 %v6233_v38, %v1867_v49  ;;  %v1805_v49 = vmul.f32 1.442695, %v8259_v50  ;;  %v6257_v11 = vpop.eup %4285  ;;  %4295 = vpow2.f32 %v1803_v59  ;;  %v8262_v59 = vsub.f32 %v5885_v37, %v5929_v26 }
 0x260   :  { %v1869_v46 = vadd.f32 %v6239_v57, %v1868_v13  ;;  %v1807_v13 = vmul.f32 1.442695, %v8260_v58  ;;  %v6263_v61 = vpop.eup %4287  ;;  %4297 = vpow2.f32 %v1805_v49  ;;  %v8263_v49 = vsub.f32 %v5890_v25, %v5929_v26 }
 0x261   :  { %v8266_v25 = vsub.f32 %v5908_v3, %v5929_v26 }
 0x262   :  { %v1870_v36 = vadd.f32 %v6245_v40, %v1869_v46  ;;  %v1809_v46 = vmul.f32 1.442695, %v8261_v20  ;;  %v6269_v33 = vpop.eup %4289  ;;  %4299 = vpow2.f32 %v1807_v13  ;;  %v8264_v13 = vsub.f32 %v5893_v60, %v5929_v26 }
 0x263   :  { %v8267_v60 = vsub.f32 %v5911_v44, %v5929_v26 }
 0x264   :  { %v1871_v42 = vadd.f32 %v6251_v48, %v1870_v36  ;;  %v1811_v36 = vmul.f32 1.442695, %v8262_v59  ;;  %v6275_v50 = vpop.eup %4291  ;;  %4301 = vpow2.f32 %v1809_v46 }
 0x266   :  { %v1872_v7 = vadd.f32 %v6257_v11, %v1871_v42  ;;  %v1813_v42 = vmul.f32 1.442695, %v8263_v49  ;;  %v4294_v58 = vpop.eup %4293  ;;  %4303 = vpow2.f32 %v1811_v36 }
 0x268   :  { %v1873_v5 = vadd.f32 %v6263_v61, %v1872_v7  ;;  %v1815_v7 = vmul.f32 1.442695, %v8264_v13  ;;  %v4296_v37 = vpop.eup %4295  ;;  %4305 = vpow2.f32 %v1813_v42 }
 0x26a   :  { %v1874_v34 = vadd.f32 %v6269_v33, %v1873_v5  ;;  %v8265_v5 = vsub.f32 %v5919_v15, %v5929_v26  ;;  %v4298_v30 = vpop.eup %4297  ;;  %4307 = vpow2.f32 %v1815_v7  ;;  %v8268_v15 = vsub.f32 %v5922_v8, %v5929_v26 }
 0x26c   :  { %v1875_v19 = vadd.f32 %v6275_v50, %v1874_v34  ;;  %v1817_v59 = vmul.f32 1.442695, %v8265_v5  ;;  %v1819_v34 = vmul.f32 1.442695, %v8266_v25  ;;  %v4300_v36 = vpop.eup %4299 }
 0x26e   :  { %v1876_v20 = vadd.f32 %v4294_v58, %v1875_v19  ;;  %4309 = vpow2.f32 %v1817_v59  ;;  %v1821_v19 = vmul.f32 1.442695, %v8267_v60  ;;  %v4302_v42 = vpop.eup %4301 }
 0x26f   :  { %4311 = vpow2.f32 %v1819_v34 }
 0x270   :  { %v1877_v46 = vadd.f32 %v4296_v37, %v1876_v20  ;;  %v1823_v20 = vmul.f32 1.442695, %v8268_v15  ;;  %v4304_v7 = vpop.eup %4303  ;;  %4313 = vpow2.f32 %v1821_v19 }
 0x272   :  { %v1878_v49 = vadd.f32 %v4298_v30, %v1877_v46  ;;  %v4306_v3 = vpop.eup %4305  ;;  %4315 = vpow2.f32 %v1823_v20 }
 0x274   :  { %v1879_v13 = vadd.f32 %v4300_v36, %v1878_v49  ;;  %v4308_v25 = vpop.eup %4307 }
 0x276   :  { %v1880_v5 = vadd.f32 %v4302_v42, %v1879_v13 }
 0x278   :  { %v1881_v62 = vadd.f32 %v4304_v7, %v1880_v5  ;;  %v4310_v27 = vpop.eup %4309 }
 0x279   :  { %v4312_v44 = vpop.eup %4311 }
 0x27a   :  { %v1882_v46 = vadd.f32 %v4306_v3, %v1881_v62  ;;  %v4314_v49 = vpop.eup %4313 }
 0x27c   :  { %v1883_v59 = vadd.f32 %v4308_v25, %v1882_v46  ;;  %v4316_v34 = vpop.eup %4315  ;;  %v8286_v46 = vld [vmem:[#allocation120_spill] sm:$0xff] }
 0x27e   :  { %v1884_v14 = vadd.f32 %v4310_v27, %v1883_v59 }
 0x280   :  { %v1885_v60 = vadd.f32 %v4312_v44, %v1884_v14 }
 0x282   :  { %v1886_v22 = vadd.f32 %v4314_v49, %v1885_v60  ;;  %v8289_v60 = vld [vmem:[#allocation24_spill] sm:$0xff] }
 0x284   :  { %v1887_v52 = vadd.f32 %v4316_v34, %v1886_v22 }
 0x286   :  { %4317 = vrcp.f32 %v1887_v52 }
 0x290   :  { %v6296_v8 = vpop.eup %4317 }
 0x291   :  { %v6300_v26 = vmul.f32 %v6296_v8, %v6003_v47  ;;  %v6304_v62 = vmul.f32 %v6296_v8, %v6005_v31  ;;  %v6312_v22 = vmul.f32 %v6296_v8, %v6043_v21  ;;  %v6316_v14 = vmul.f32 %v6296_v8, %v6048_v23 }
 0x292   :  { %v6324_v47 = vmul.f32 %v6296_v8, %v6013_v63  ;;  %v6328_v31 = vmul.f32 %v6296_v8, %v6053_v10  ;;  %v6332_v21 = vmul.f32 %v6296_v8, %v6018_v45  ;;  %v6336_v23 = vmul.f32 %v6296_v8, %v6056_v4 }
 0x293   :  { %8269 = vst [vmem:[#allocation105_spill] sm:$0xff] %v6300_v26  ;;  %2339 = vrot.lane.b32.xlu1 %v6304_v62, %s4346_s24  ;;  %2337 = vrot.lane.b32.xlu0 %v6300_v26, %s4346_s24  ;;  %8270 = vst [vmem:[#allocation114_spill] sm:$0xff] %v6316_v14  ;;  %v6340_v52 = vmul.f32 %v6296_v8, %v6227_v56  ;;  %v6346_v63 = vmul.f32 %v6296_v8, %v6233_v38 }
 0x294   :  { %8271 = vst [vmem:[#allocation9_spill] sm:$0xff] %v6324_v47  ;;  %8272 = vst [vmem:[#allocation11_spill] sm:$0xff] %v6332_v21  ;;  %v6350_v10 = vmul.f32 %v6296_v8, %v6239_v57  ;;  %v6354_v45 = vmul.f32 %v6296_v8, %v6245_v40  ;;  %v6358_v4 = vmul.f32 %v6296_v8, %v6251_v48 }
 0x295   :  { %8273 = vst [vmem:[#allocation14_spill] sm:$0xff] %v6336_v23  ;;  %v6364_v56 = vmul.f32 %v6296_v8, %v6257_v11  ;;  %v6368_v38 = vmul.f32 %v6296_v8, %v6263_v61  ;;  %v6372_v57 = vmul.f32 %v6296_v8, %v6269_v33  ;;  %v6376_v40 = vmul.f32 %v6296_v8, %v6275_v50 }
 0x296   :  { %v6379_v48 = vmul.f32 %v6296_v8, %v4294_v58  ;;  %v6382_v19 = vmul.f32 %v6296_v8, %v4296_v37  ;;  %v6385_v11 = vmul.f32 %v6296_v8, %v4298_v30  ;;  %v6388_v61 = vmul.f32 %v6296_v8, %v4300_v36 }
 0x297   :  { %2353 = vrot.lane.b32.xlu1 %v6312_v22, %s4346_s24  ;;  %2355 = vrot.lane.b32.xlu0 %v6316_v14, %s4346_s24  ;;  %v6391_v13 = vmul.f32 %v6296_v8, %v4302_v42  ;;  %v6394_v33 = vmul.f32 %v6296_v8, %v4304_v7  ;;  %v6397_v50 = vmul.f32 %v6296_v8, %v4306_v3  ;;  %v8285_v3 = vld [vmem:[#allocation21_spill] sm:$0xff] }
 0x298   :  { %v6400_v58 = vmul.f32 %v6296_v8, %v4308_v25  ;;  %v6405_v30 = vmul.f32 %v6296_v8, %v4310_v27  ;;  %v6408_v37 = vmul.f32 %v6296_v8, %v4312_v44  ;;  %v6411_v36 = vmul.f32 %v6296_v8, %v4314_v49  ;;  %v8290_v49 = vld [vmem:[#allocation122_spill] sm:$0xff] }
 0x299   :  { %8274 = vst [vmem:[#allocation15_spill] sm:$0xff] %v6394_v33  ;;  %8275 = vst [vmem:[#allocation16_spill] sm:$0xff] %v6397_v50  ;;  %v6414_v42 = vmul.f32 %v6296_v8, %v4316_v34  ;;  %v6420_v15 = vmul.f32 %v6296_v8, %v6023_v17  ;;  %v6424_v27 = vmul.f32 %v6296_v8, %v6059_v32 }
 0x29a   :  { %8276 = vst [vmem:[#allocation19_spill] sm:$0xff] %v6400_v58  ;;  %8277 = vst [vmem:[#allocation20_spill] sm:$0xff] %v6405_v30  ;;  %v6432_v20 = vmul.f32 %v6296_v8, %v6028_v39  ;;  %v6436_v5 = vmul.f32 %v6296_v8, %v6067_v6  ;;  %v6444_v17 = vmul.f32 %v6296_v8, %v6033_v2  ;;  %v8283_v39 = vld [vmem:[#allocation18_spill] sm:$0xff]  ;;  %v8284_v6 = vld [vmem:[#allocation115_spill] sm:$0xff] }
 0x29b   :  { %2341 = vrot.lane.b32.xlu1 %v6324_v47, %s4346_s24  ;;  %2357 = vrot.lane.b32.xlu0 %v6328_v31, %s4346_s24  ;;  %8278 = vst [vmem:[#allocation25_spill] sm:$0xff] %v6408_v37  ;;  %8279 = vst [vmem:[#allocation28_spill] sm:$0xff] %v6411_v36  ;;  %v6448_v32 = vmul.f32 %v6296_v8, %v6075_v41  ;;  %v923_v7 = vsel %vm857_vm2, %v8284_v6, %v8283_v39 }
 0x29c   :  { %8280 = vst [vmem:[#allocation31_spill] sm:$0xff] %v6414_v42  ;;  %8281 = vst [vmem:[#allocation34_spill] sm:$0xff] %v6432_v20  ;;  %v922_v25 = vsel %vm857_vm2, %v8286_v46, %v8285_v3  ;;  %v6462_v2 = vmul.f32 %v6296_v8, %v6038_v53  ;;  %v1955_v59 = vmul.f32 %v6304_v62, %v923_v7  ;;  %v8291_v7 = vld [vmem:[#allocation22_spill] sm:$0xff] }
 0x29d   :  { %8282 = vst [vmem:[#allocation35_spill] sm:$0xff] %v6436_v5  ;;  %v1954_v41 = vmul.f32 %v6300_v26, %v922_v25  ;;  %v6468_v44 = vmul.f32 %v6296_v8, %v6080_v51  ;;  %v924_v34 = vsel %vm857_vm2, %v8290_v49, %v8289_v60  ;;  %v6479_v53 = vmul.f32 %v6296_v8, %v6085_v35  ;;  %v8292_v51 = vld [vmem:[#allocation118_spill] sm:$0xff]  ;;  %v8294_v35 = vld [vmem:[#allocation124_spill] sm:$0xff] }
 0x29e   :  { %8287 = vst [vmem:[#allocation38_spill] sm:$0xff] %v6462_v2  ;;  %v1956_v39 = vmul.f32 %v6324_v47, %v924_v34  ;;  %v925_v3 = vsel %vm857_vm2, %v8292_v51, %v8291_v7  ;;  %v6487_v46 = vmul.f32 %v6296_v8, %v6090_v55  ;;  %v8293_v49 = vld [vmem:[#allocation26_spill] sm:$0xff]  ;;  %v8295_v34 = vld [vmem:[#allocation27_spill] sm:$0xff] }
 0x29f   :  { %2343 = vrot.lane.b32.xlu1 %v6332_v21, %s4346_s24  ;;  %2359 = vrot.lane.b32.xlu0 %v6336_v23, %s4346_s24  ;;  %8288 = vst [vmem:[#allocation41_spill] sm:$0xff] %v6468_v44  ;;  %v2018_v6 = vadd.f32 %v1955_v59, %v1954_v41  ;;  %v1957_v25 = vmul.f32 %v6332_v21, %v925_v3  ;;  %v8296_v7 = vld [vmem:[#allocation126_spill] sm:$0xff] }
 0x2a0   :  { %v926_v26 = vsel %vm857_vm2, %v8294_v35, %v8293_v49  ;;  %v6499_v41 = vmul.f32 %v6296_v8, %v6125_v12  ;;  %v8297_v49 = vld [vmem:[#allocation29_spill] sm:$0xff]  ;;  %v8298_v12 = vld [vmem:[#allocation127_spill] sm:$0xff] }
 0x2a1   :  { %v2019_v60 = vadd.f32 %v2018_v6, %v1956_v39  ;;  %v1958_v55 = vmul.f32 %v6420_v15, %v926_v26  ;;  %v927_v39 = vsel %vm857_vm2, %v8296_v7, %v8295_v34  ;;  %v6507_v6 = vmul.f32 %v6296_v8, %v6130_v9  ;;  %v8299_v26 = vld [vmem:[#allocation75_spill] sm:$0xff]  ;;  %v8300_v34 = vld [vmem:[#allocation30_spill] sm:$0xff]  ;;  %v8301_v7 = vld [vmem:[#allocation128_spill] sm:$0xff] }
 0x2a2   :  { %v1959_v51 = vmul.f32 %v6432_v20, %v927_v39  ;;  %v928_v35 = vsel %vm857_vm2, %v8298_v12, %v8297_v49 }
 0x2a3   :  { %2345 = vrot.lane.b32.xlu1 %v6420_v15, %s4346_s24  ;;  %2361 = vrot.lane.b32.xlu0 %v6424_v27, %s4346_s24  ;;  %v2020_v59 = vadd.f32 %v2019_v60, %v1957_v25  ;;  %v6519_v25 = vmul.f32 %v6296_v8, %v8299_v26  ;;  %v1960_v9 = vmul.f32 %v6444_v17, %v928_v35  ;;  %v8304_v26 = vld [vmem:[#allocation129_spill] sm:$0xff] }
 0x2a5   :  { %v2021_v3 = vadd.f32 %v2020_v59, %v1958_v55  ;;  %v929_v55 = vsel %vm857_vm2, %v8301_v7, %v8300_v34  ;;  %v8302_v59 = vld [vmem:[#allocation94_spill] sm:$0xff]  ;;  %v8306_v7 = vld [vmem:[#allocation33_spill] sm:$0xff] }
 0x2a6   :  { %v6527_v39 = vmul.f32 %v6296_v8, %v8302_v59  ;;  %v1961_v49 = vmul.f32 %v6462_v2, %v929_v55  ;;  %v8307_v55 = vld [vmem:[#allocation130_spill] sm:$0xff] }
 0x2a7   :  { %2347 = vrot.lane.b32.xlu1 %v6432_v20, %s4346_s24  ;;  %2363 = vrot.lane.b32.xlu0 %v6436_v5, %s4346_s24  ;;  %v2022_v60 = vadd.f32 %v2021_v3, %v1959_v51  ;;  %v8303_v20 = vld [vmem:[#allocation32_spill] sm:$0xff]  ;;  %v8305_v51 = vld [vmem:[#allocation78_spill] sm:$0xff] }
 0x2a8   :  { %v930_v21 = vsel %vm857_vm2, %v8304_v26, %v8303_v20  ;;  %v6539_v3 = vmul.f32 %v6296_v8, %v8305_v51  ;;  %v8310_v51 = vld [vmem:[#allocation131_spill] sm:$0xff] }
 0x2a9   :  { %v2023_v12 = vadd.f32 %v2022_v60, %v1960_v9  ;;  %v1962_v35 = vmul.f32 %v6312_v22, %v930_v21  ;;  %v931_v9 = vsel %vm857_vm2, %v8307_v55, %v8306_v7  ;;  %v8308_v60 = vld [vmem:[#allocation85_spill] sm:$0xff] }
 0x2aa   :  { %v6547_v59 = vmul.f32 %v6296_v8, %v8308_v60  ;;  %v1963_v20 = vmul.f32 %v6316_v14, %v931_v9  ;;  %v8311_v21 = vld [vmem:[#allocation81_spill] sm:$0xff]  ;;  %v8314_v9 = vld [vmem:[#allocation132_spill] sm:$0xff] }
 0x2ab   :  { %2349 = vrot.lane.b32.xlu1 %v6444_v17, %s4346_s24  ;;  %2365 = vrot.lane.b32.xlu0 %v6448_v32, %s4346_s24  ;;  %v2024_v34 = vadd.f32 %v2023_v12, %v1961_v49  ;;  %v6559_v49 = vmul.f32 %v6296_v8, %v8311_v21  ;;  %v8313_v55 = vld [vmem:[#allocation37_spill] sm:$0xff] }
 0x2ac   :  { %v8316_v21 = vld [vmem:[#allocation133_spill] sm:$0xff] }
 0x2ad   :  { %v2025_v26 = vadd.f32 %v2024_v34, %v1962_v35  ;;  %8312 = vst [vmem:[#allocation44_spill] sm:$0xff] %v6559_v49  ;;  %v933_v35 = vsel %vm857_vm2, %v8314_v9, %v8313_v55  ;;  %v6567_v34 = vmul.f32 %v6296_v8, %v6145_v54  ;;  %v8319_v55 = vld [vmem:[#allocation40_spill] sm:$0xff]  ;;  %v8320_v9 = vld [vmem:[#allocation134_spill] sm:$0xff] }
 0x2af   :  { %2351 = vrot.lane.b32.xlu1 %v6462_v2, %s4346_s24  ;;  %2367 = vrot.lane.b32.xlu0 %v6468_v44, %s4346_s24  ;;  %v8309_v2 = vld [vmem:[#allocation36_spill] sm:$0xff]  ;;  %v2026_v7 = vadd.f32 %v2025_v26, %v1963_v20 }
 0x2b0   :  { %v932_v47 = vsel %vm857_vm2, %v8310_v51, %v8309_v2  ;;  %v1965_v2 = vmul.f32 %v6336_v23, %v933_v35  ;;  %v8315_v51 = vld [vmem:[#allocation39_spill] sm:$0xff] }
 0x2b1   :  { %v1964_v12 = vmul.f32 %v6328_v31, %v932_v47  ;;  %v934_v14 = vsel %vm857_vm2, %v8316_v21, %v8315_v51  ;;  %v8317_v47 = vld [vmem:[#allocation84_spill] sm:$0xff]  ;;  %v8322_v21 = vld [vmem:[#allocation42_spill] sm:$0xff] }
 0x2b2   :  { %v6579_v20 = vmul.f32 %v6296_v8, %v8317_v47  ;;  %v1966_v54 = vmul.f32 %v6424_v27, %v934_v14  ;;  %v8323_v47 = vld [vmem:[#allocation135_spill] sm:$0xff]  ;;  %v8324_v14 = vld [vmem:[#allocation88_spill] sm:$0xff] }
 0x2b3   :  { %2369 = vrot.lane.b32.xlu1 %v6479_v53, %s4346_s24  ;;  %2371 = vrot.lane.b32.xlu0 %v6487_v46, %s4346_s24  ;;  %v2027_v60 = vadd.f32 %v2026_v7, %v1964_v12  ;;  %v935_v12 = vsel %vm857_vm2, %v8320_v9, %v8319_v55  ;;  %v6587_v7 = vmul.f32 %v6296_v8, %v6150_v24  ;;  %v8326_v55 = vld [vmem:[#allocation43_spill] sm:$0xff]  ;;  %v8327_v9 = vld [vmem:[#allocation136_spill] sm:$0xff] }
 0x2b4   :  { %8318 = vst [vmem:[#allocation45_spill] sm:$0xff] %v6579_v20  ;;  %v1967_v35 = vmul.f32 %v6436_v5, %v935_v12  ;;  %v936_v23 = vsel %vm857_vm2, %v8323_v47, %v8322_v21  ;;  %v8328_v47 = vld [vmem:[#allocation46_spill] sm:$0xff] }
 0x2b5   :  { %v2028_v26 = vadd.f32 %v2027_v60, %v1965_v2  ;;  %8321 = vst [vmem:[#allocation48_spill] sm:$0xff] %v6587_v7  ;;  %v6599_v2 = vmul.f32 %v6296_v8, %v8324_v14  ;;  %v1968_v24 = vmul.f32 %v6448_v32, %v936_v23  ;;  %v8329_v14 = vld [vmem:[#allocation137_spill] sm:$0xff]  ;;  %v8330_v23 = vld [vmem:[#allocation91_spill] sm:$0xff] }
 0x2b6   :  { %v938_v5 = vsel %vm857_vm2, %v8329_v14, %v8328_v47  ;;  %v8335_v14 = vld [vmem:[#allocation49_spill] sm:$0xff] }
 0x2b7   :  { %2385 = vrot.lane.b32.xlu1 %v6499_v41, %s4346_s24  ;;  %2387 = vrot.lane.b32.xlu0 %v6507_v6, %s4346_s24  ;;  %v2029_v51 = vadd.f32 %v2028_v26, %v1966_v54  ;;  %8325 = vst [vmem:[#allocation51_spill] sm:$0xff] %v6599_v2  ;;  %v937_v54 = vsel %vm857_vm2, %v8327_v9, %v8326_v55  ;;  %v8332_v55 = vld [vmem:[#allocation47_spill] sm:$0xff]  ;;  %v8333_v9 = vld [vmem:[#allocation138_spill] sm:$0xff] }
 0x2b8   :  { %v6607_v26 = vmul.f32 %v6296_v8, %v6155_v16  ;;  %v1969_v12 = vmul.f32 %v6468_v44, %v937_v54  ;;  %v1970_v16 = vmul.f32 %v6479_v53, %v938_v5  ;;  %v6639_v5 = vmul.f32 %v6296_v8, %v6161_v43  ;;  %v8340_v43 = vld [vmem:[#allocation141_spill] sm:$0xff] }
 0x2b9   :  { %v2030_v60 = vadd.f32 %v2029_v51, %v1967_v35  ;;  %v6619_v35 = vmul.f32 %v6296_v8, %v8330_v23  ;;  %v8336_v23 = vld [vmem:[#allocation139_spill] sm:$0xff] }
 0x2ba   :  { %v940_v44 = vsel %vm857_vm2, %v8336_v23, %v8335_v14  ;;  %v8339_v14 = vld [vmem:[#allocation52_spill] sm:$0xff] }
 0x2bb   :  { %2373 = vrot.lane.b32.xlu1 %v6519_v25, %s4346_s24  ;;  %2389 = vrot.lane.b32.xlu0 %v6527_v39, %s4346_s24  ;;  %v2031_v21 = vadd.f32 %v2030_v60, %v1968_v24  ;;  %8331 = vst [vmem:[#allocation18_spill] sm:$0xff] %v6619_v35  ;;  %v939_v24 = vsel %vm857_vm2, %v8333_v9, %v8332_v55  ;;  %v8338_v55 = vld [vmem:[#allocation140_spill] sm:$0xff] }
 0x2bc   :  { %v6627_v60 = vmul.f32 %v6296_v8, %v6158_v0  ;;  %v1971_v54 = vmul.f32 %v6487_v46, %v939_v24  ;;  %v1972_v0 = vmul.f32 %v6519_v25, %v940_v44  ;;  %v942_v23 = vsel %vm857_vm2, %v8340_v43, %v8339_v14  ;;  %v8343_v14 = vld [vmem:[#allocation56_spill] sm:$0xff] }
 0x2bd   :  { %v2032_v51 = vadd.f32 %v2031_v21, %v1969_v12  ;;  %v8337_v21 = vld [vmem:[#allocation50_spill] sm:$0xff]  ;;  %v6659_v44 = vmul.f32 %v6296_v8, %v6209_v18  ;;  %v8344_v18 = vld [vmem:[#allocation143_spill] sm:$0xff] }
 0x2be   :  { %8334 = vst [vmem:[#allocation115_spill] sm:$0xff] %v6627_v60  ;;  %v944_v43 = vsel %vm857_vm2, %v8344_v18, %v8343_v14  ;;  %v8348_v18 = vld [vmem:[#allocation59_spill] sm:$0xff] }
 0x2bf   :  { %2375 = vrot.lane.b32.xlu1 %v6539_v3, %s4346_s24  ;;  %2391 = vrot.lane.b32.xlu0 %v6547_v59, %s4346_s24  ;;  %v2033_v47 = vadd.f32 %v2032_v51, %v1970_v16  ;;  %v941_v16 = vsel %vm857_vm2, %v8338_v55, %v8337_v21  ;;  %v6647_v51 = vmul.f32 %v6296_v8, %v6167_v29  ;;  %v8342_v21 = vld [vmem:[#allocation142_spill] sm:$0xff] }
 0x2c0   :  { %v1973_v9 = vmul.f32 %v6539_v3, %v941_v16  ;;  %v1974_v29 = vmul.f32 %v6559_v49, %v942_v23  ;;  %v8345_v23 = vld [vmem:[#allocation57_spill] sm:$0xff] }
 0x2c1   :  { %v2034_v12 = vadd.f32 %v2033_v47, %v1971_v54  ;;  %v8341_v47 = vld [vmem:[#allocation53_spill] sm:$0xff] }
 0x2c3   :  { %2377 = vrot.lane.b32.xlu1 %v6559_v49, %s4346_s24  ;;  %2393 = vrot.lane.b32.xlu0 %v6567_v34, %s4346_s24  ;;  %v2035_v24 = vadd.f32 %v2034_v12, %v1972_v0  ;;  %v943_v0 = vsel %vm857_vm2, %v8342_v21, %v8341_v47  ;;  %v6667_v12 = vmul.f32 %v6296_v8, %v6215_v28  ;;  %v8346_v47 = vld [vmem:[#allocation144_spill] sm:$0xff] }
 0x2c4   :  { %v1975_v55 = vmul.f32 %v6579_v20, %v943_v0  ;;  %v1976_v28 = vmul.f32 %v6599_v2, %v944_v43 }
 0x2c5   :  { %v2036_v54 = vadd.f32 %v2035_v24, %v1973_v9  ;;  %v6679_v9 = vmul.f32 %v6296_v8, %v6173_v1  ;;  %v8349_v1 = vld [vmem:[#allocation145_spill] sm:$0xff] }
 0x2c7   :  { %2379 = vrot.lane.b32.xlu1 %v6579_v20, %s4346_s24  ;;  %2395 = vrot.lane.b32.xlu0 %v6587_v7, %s4346_s24  ;;  %v2037_v16 = vadd.f32 %v2036_v54, %v1974_v29  ;;  %v945_v29 = vsel %vm857_vm2, %v8346_v47, %v8345_v23  ;;  %v8347_v54 = vld [vmem:[#allocation111_spill] sm:$0xff]  ;;  %v946_v20 = vsel %vm857_vm2, %v8349_v1, %v8348_v18  ;;  %v8351_v47 = vld [vmem:[#allocation60_spill] sm:$0xff]  ;;  %v8353_v18 = vld [vmem:[#allocation62_spill] sm:$0xff] }
 0x2c8   :  { %v6687_v21 = vmul.f32 %v6296_v8, %v8347_v54  ;;  %v1977_v0 = vmul.f32 %v6619_v35, %v945_v29  ;;  %v1978_v43 = vmul.f32 %v6499_v41, %v946_v20  ;;  %v8352_v29 = vld [vmem:[#allocation146_spill] sm:$0xff]  ;;  %v8354_v1 = vld [vmem:[#allocation147_spill] sm:$0xff] }
 0x2c9   :  { %v2038_v24 = vadd.f32 %v2037_v16, %v1975_v55  ;;  %v8350_v55 = vld [vmem:[#allocation98_spill] sm:$0xff] }
 0x2ca   :  { %v6699_v16 = vmul.f32 %v6296_v8, %v8350_v55  ;;  %v8355_v55 = vld [vmem:[#allocation101_spill] sm:$0xff] }
 0x2cb   :  { %2381 = vrot.lane.b32.xlu1 %v6599_v2, %s4346_s24  ;;  %2397 = vrot.lane.b32.xlu0 %v6607_v26, %s4346_s24  ;;  %v2039_v14 = vadd.f32 %v2038_v24, %v1976_v28  ;;  %v947_v28 = vsel %vm857_vm2, %v8352_v29, %v8351_v47  ;;  %v6715_v20 = vmul.f32 %v6296_v8, %v8355_v55  ;;  %v8356_v47 = vld [vmem:[#allocation63_spill] sm:$0xff]  ;;  %v8357_v29 = vld [vmem:[#allocation148_spill] sm:$0xff] }
 0x2cc   :  { %v1979_v24 = vmul.f32 %v6507_v6, %v947_v28  ;;  %v8360_v55 = vld [vmem:[#allocation104_spill] sm:$0xff] }
 0x2cd   :  { %v2040_v23 = vadd.f32 %v2039_v14, %v1977_v0 }
 0x2cf   :  { %2383 = vrot.lane.b32.xlu1 %v6619_v35, %s4346_s24  ;;  %2399 = vrot.lane.b32.xlu0 %v6627_v60, %s4346_s24  ;;  %v2041_v54 = vadd.f32 %v2040_v23, %v1978_v43  ;;  %v948_v35 = vsel %vm857_vm2, %v8354_v1, %v8353_v18  ;;  %v949_v43 = vsel %vm857_vm2, %v8357_v29, %v8356_v47  ;;  %v8358_v18 = vld [vmem:[#allocation66_spill] sm:$0xff]  ;;  %v8359_v1 = vld [vmem:[#allocation149_spill] sm:$0xff]  ;;  %v8361_v47 = vld [vmem:[#allocation67_spill] sm:$0xff] }
 0x2d0   :  { %v1980_v0 = vmul.f32 %v6527_v39, %v948_v35  ;;  %v1981_v23 = vmul.f32 %v6547_v59, %v949_v43  ;;  %v950_v2 = vsel %vm857_vm2, %v8359_v1, %v8358_v18  ;;  %v6731_v35 = vmul.f32 %v6296_v8, %v8360_v55  ;;  %v8362_v29 = vld [vmem:[#allocation150_spill] sm:$0xff]  ;;  %v8363_v18 = vld [vmem:[#allocation69_spill] sm:$0xff]  ;;  %v8364_v1 = vld [vmem:[#allocation151_spill] sm:$0xff] }
 0x2d1   :  { %v2042_v14 = vadd.f32 %v2041_v54, %v1979_v24  ;;  %v1982_v24 = vmul.f32 %v6567_v34, %v950_v2  ;;  %v952_v49 = vsel %vm857_vm2, %v8364_v1, %v8363_v18  ;;  %v8365_v55 = vld [vmem:[#allocation95_spill] sm:$0xff]  ;;  %v8368_v18 = vld [vmem:[#allocation72_spill] sm:$0xff]  ;;  %v8369_v1 = vld [vmem:[#allocation153_spill] sm:$0xff] }
 0x2d2   :  { %v6747_v2 = vmul.f32 %v6296_v8, %v8365_v55  ;;  %v8370_v55 = vld [vmem:[#allocation108_spill] sm:$0xff] }
 0x2d3   :  { %2401 = vrot.lane.b32.xlu1 %v6639_v5, %s4346_s24  ;;  %2403 = vrot.lane.b32.xlu0 %v6647_v51, %s4346_s24  ;;  %v2043_v28 = vadd.f32 %v2042_v14, %v1980_v0  ;;  %v951_v0 = vsel %vm857_vm2, %v8362_v29, %v8361_v47  ;;  %v8366_v47 = vld [vmem:[#allocation70_spill] sm:$0xff]  ;;  %v8367_v29 = vld [vmem:[#allocation152_spill] sm:$0xff] }
 0x2d4   :  { %v1983_v14 = vmul.f32 %v6587_v7, %v951_v0  ;;  %v954_v7 = vsel %vm857_vm2, %v8369_v1, %v8368_v18  ;;  %v8373_v18 = vld [vmem:[#allocation76_spill] sm:$0xff]  ;;  %v8374_v1 = vld [vmem:[#allocation155_spill] sm:$0xff] }
 0x2d5   :  { %v2044_v54 = vadd.f32 %v2043_v28, %v1981_v23  ;;  %v1984_v23 = vmul.f32 %v6607_v26, %v952_v49  ;;  %v6763_v49 = vmul.f32 %v6296_v8, %v8370_v55 }
 0x2d7   :  { %2417 = vrot.lane.b32.xlu1 %v6659_v44, %s4346_s24  ;;  %2419 = vrot.lane.b32.xlu0 %v6667_v12, %s4346_s24  ;;  %v2045_v43 = vadd.f32 %v2044_v54, %v1982_v24  ;;  %v953_v24 = vsel %vm857_vm2, %v8367_v29, %v8366_v47  ;;  %v8371_v47 = vld [vmem:[#allocation73_spill] sm:$0xff]  ;;  %v8372_v29 = vld [vmem:[#allocation154_spill] sm:$0xff] }
 0x2d8   :  { %v1985_v54 = vmul.f32 %v6627_v60, %v953_v24  ;;  %v956_v60 = vsel %vm857_vm2, %v8374_v1, %v8373_v18  ;;  %v8380_v18 = vld [vmem:[#allocation158_spill] sm:$0xff] }
 0x2d9   :  { %v2046_v28 = vadd.f32 %v2045_v43, %v1983_v14  ;;  %v1986_v14 = vmul.f32 %v6639_v5, %v954_v7  ;;  %v1988_v8 = vmul.f32 %v6679_v9, %v956_v60 }
 0x2db   :  { %2405 = vrot.lane.b32.xlu1 %v6679_v9, %s4346_s24  ;;  %2421 = vrot.lane.b32.xlu0 %v6687_v21, %s4346_s24  ;;  %v2047_v0 = vadd.f32 %v2046_v28, %v1984_v23  ;;  %v955_v23 = vsel %vm857_vm2, %v8372_v29, %v8371_v47  ;;  %v8378_v29 = vld [vmem:[#allocation157_spill] sm:$0xff] }
 0x2dc   :  { %v1987_v28 = vmul.f32 %v6647_v51, %v955_v23 }
 0x2dd   :  { %v2048_v43 = vadd.f32 %v2047_v0, %v1985_v54  ;;  %v8375_v54 = vld [vmem:[#allocation77_spill] sm:$0xff]  ;;  %v8376_v0 = vld [vmem:[#allocation156_spill] sm:$0xff] }
 0x2de   :  { %v957_v55 = vsel %vm857_vm2, %v8376_v0, %v8375_v54  ;;  %v8382_v0 = vld [vmem:[#allocation159_spill] sm:$0xff] }
 0x2df   :  { %2407 = vrot.lane.b32.xlu1 %v6699_v16, %s4346_s24  ;;  %2423 = vrot.lane.b32.xlu0 %v6340_v52, %s4346_s24  ;;  %v2049_v24 = vadd.f32 %v2048_v43, %v1986_v14  ;;  %v1989_v47 = vmul.f32 %v6699_v16, %v957_v55  ;;  %v8377_v43 = vld [vmem:[#allocation79_spill] sm:$0xff] }
 0x2e0   :  { %v958_v23 = vsel %vm857_vm2, %v8378_v29, %v8377_v43  ;;  %v8384_v29 = vld [vmem:[#allocation160_spill] sm:$0xff] }
 0x2e1   :  { %v2050_v7 = vadd.f32 %v2049_v24, %v1987_v28  ;;  %v1990_v60 = vmul.f32 %v6715_v20, %v958_v23  ;;  %v8379_v24 = vld [vmem:[#allocation80_spill] sm:$0xff] }
 0x2e2   :  { %v959_v1 = vsel %vm857_vm2, %v8380_v18, %v8379_v24  ;;  %v8386_v18 = vld [vmem:[#allocation161_spill] sm:$0xff] }
 0x2e3   :  { %2409 = vrot.lane.b32.xlu1 %v6715_v20, %s4346_s24  ;;  %2425 = vrot.lane.b32.xlu0 %v6346_v63, %s4346_s24  ;;  %v2051_v14 = vadd.f32 %v2050_v7, %v1988_v8  ;;  %v1991_v54 = vmul.f32 %v6731_v35, %v959_v1  ;;  %v8381_v7 = vld [vmem:[#allocation82_spill] sm:$0xff] }
 0x2e4   :  { %v960_v55 = vsel %vm857_vm2, %v8382_v0, %v8381_v7  ;;  %v8388_v0 = vld [vmem:[#allocation7_spill] sm:$0xff] }
 0x2e5   :  { %v2052_v28 = vadd.f32 %v2051_v14, %v1989_v47  ;;  %v1992_v43 = vmul.f32 %v6747_v2, %v960_v55  ;;  %v8383_v14 = vld [vmem:[#allocation83_spill] sm:$0xff] }
 0x2e6   :  { %v961_v23 = vsel %vm857_vm2, %v8384_v29, %v8383_v14  ;;  %v8390_v29 = vld [vmem:[#allocation8_spill] sm:$0xff] }
 0x2e7   :  { %2411 = vrot.lane.b32.xlu1 %v6731_v35, %s4346_s24  ;;  %2427 = vrot.lane.b32.xlu0 %v6350_v10, %s4346_s24  ;;  %v2053_v8 = vadd.f32 %v2052_v28, %v1990_v60  ;;  %v1993_v24 = vmul.f32 %v6763_v49, %v961_v23  ;;  %v8385_v28 = vld [vmem:[#allocation86_spill] sm:$0xff] }
 0x2e8   :  { %v962_v1 = vsel %vm857_vm2, %v8386_v18, %v8385_v28  ;;  %v8392_v18 = vld [vmem:[#allocation10_spill] sm:$0xff] }
 0x2e9   :  { %v2054_v47 = vadd.f32 %v2053_v8, %v1991_v54  ;;  %v1994_v7 = vmul.f32 %v6659_v44, %v962_v1  ;;  %v8387_v8 = vld [vmem:[#allocation87_spill] sm:$0xff] }
 0x2ea   :  { %v963_v55 = vsel %vm857_vm2, %v8388_v0, %v8387_v8  ;;  %v8394_v0 = vld [vmem:[#allocation162_spill] sm:$0xff] }
 0x2eb   :  { %2413 = vrot.lane.b32.xlu1 %v6747_v2, %s4346_s24  ;;  %2429 = vrot.lane.b32.xlu0 %v6354_v45, %s4346_s24  ;;  %v2055_v60 = vadd.f32 %v2054_v47, %v1992_v43  ;;  %v1995_v14 = vmul.f32 %v6667_v12, %v963_v55  ;;  %v8389_v47 = vld [vmem:[#allocation89_spill] sm:$0xff] }
 0x2ec   :  { %v964_v23 = vsel %vm857_vm2, %v8390_v29, %v8389_v47  ;;  %v8396_v29 = vld [vmem:[#allocation12_spill] sm:$0xff] }
 0x2ed   :  { %v2056_v54 = vadd.f32 %v2055_v60, %v1993_v24  ;;  %v1996_v28 = vmul.f32 %v6687_v21, %v964_v23  ;;  %v8391_v60 = vld [vmem:[#allocation90_spill] sm:$0xff] }
 0x2ee   :  { %v965_v1 = vsel %vm857_vm2, %v8392_v18, %v8391_v60 }
 0x2ef   :  { %2415 = vrot.lane.b32.xlu1 %v6763_v49, %s4346_s24  ;;  %2431 = vrot.lane.b32.xlu0 %v6358_v4, %s4346_s24  ;;  %v2057_v43 = vadd.f32 %v2056_v54, %v1994_v7  ;;  %v1997_v8 = vmul.f32 %v6340_v52, %v965_v1  ;;  %v8393_v54 = vld [vmem:[#allocation92_spill] sm:$0xff] }
 0x2f0   :  { %v966_v55 = vsel %vm857_vm2, %v8394_v0, %v8393_v54  ;;  %v8397_v1 = vld [vmem:[#allocation96_spill] sm:$0xff]  ;;  %v8398_v54 = vld [vmem:[#allocation13_spill] sm:$0xff] }
 0x2f1   :  { %v2058_v24 = vadd.f32 %v2057_v43, %v1995_v14  ;;  %v1998_v47 = vmul.f32 %v6346_v63, %v966_v55  ;;  %v8395_v43 = vld [vmem:[#allocation93_spill] sm:$0xff]  ;;  %v968_v0 = vsel %vm857_vm2, %v8398_v54, %v8397_v1 }
 0x2f2   :  { %v967_v23 = vsel %vm857_vm2, %v8396_v29, %v8395_v43 }
 0x2f3   :  { %2433 = vrot.lane.b32.xlu1 %v6364_v56, %s4346_s24  ;;  %2435 = vrot.lane.b32.xlu0 %v6368_v38, %s4346_s24  ;;  %v2059_v7 = vadd.f32 %v2058_v24, %v1996_v28  ;;  %v1999_v24 = vmul.f32 %v6350_v10, %v967_v23 }
 0x2f5   :  { %v2060_v14 = vadd.f32 %v2059_v7, %v1997_v8  ;;  %v2000_v8 = vmul.f32 %v6354_v45, %v968_v0 }
 0x2f7   :  { %2449 = vrot.lane.b32.xlu1 %v6391_v13, %s4346_s24  ;;  %2451 = vrot.lane.b32.xlu0 %v6394_v33, %s4346_s24  ;;  %v2061_v18 = vadd.f32 %v2060_v14, %v1998_v47 }
 0x2f9   :  { %v2062_v7 = vadd.f32 %v2061_v18, %v1999_v24 }
 0x2fb   :  { %2437 = vrot.lane.b32.xlu1 %v6372_v57, %s4346_s24  ;;  %2453 = vrot.lane.b32.xlu0 %v6397_v50, %s4346_s24  ;;  %v6856_v43 = vadd.f32 %v2062_v7, %v2000_v8 }
 0x2fd   :  { %8399 = vst [vmem:[#allocation21_spill] sm:$0xff] %v6856_v43 }
 0x2ff   :  { %2439 = vrot.lane.b32.xlu1 %v6376_v40, %s4346_s24  ;;  %2455 = vrot.lane.b32.xlu0 %v6400_v58, %s4346_s24 }
 0x303   :  { %2457 = vrot.lane.b32.xlu1 %v6405_v30, %s4346_s24  ;;  %2441 = vrot.lane.b32.xlu0 %v6379_v48, %s4346_s24 }
 0x305   :  { %v6841_v60 = vpop.permute.xlu1 %2339  ;;  %v6843_v28 = vpop.permute.xlu0 %2337 }
 0x307   :  { %2445 = vrot.lane.b32.xlu1 %v6385_v11, %s4346_s24  ;;  %2443 = vrot.lane.b32.xlu0 %v6382_v19, %s4346_s24 }
 0x309   :  { %v6854_v55 = vpop.permute.xlu0 %2355  ;;  %v6858_v29 = vpop.permute.xlu1 %2353 }
 0x30b   :  { %2459 = vrot.lane.b32.xlu0 %v6408_v37, %s4346_s24 }
 0x30d   :  { %v6862_v47 = vpop.permute.xlu0 %2357  ;;  %v6866_v14 = vpop.permute.xlu1 %2341 }
 0x30f   :  { %2461 = vrot.lane.b32.xlu0 %v6411_v36, %s4346_s24 }
 0x311   :  { %v6868_v23 = vpop.permute.xlu0 %2359  ;;  %v6874_v18 = vpop.permute.xlu1 %2343 }
 0x312   :  { %8400 = vst [vmem:[#allocation120_spill] sm:$0xff] %v6868_v23  ;;  %8402 = vst [vmem:[#allocation122_spill] sm:$0xff] %v6874_v18  ;;  %v2093_v18 = vsel %vm857_vm2, %v6420_v15, 0.0  ;;  %v8412_v15 = vld [vmem:[#allocation9_spill] sm:$0xff] }
 0x313   :  { %2447 = vrot.lane.b32.xlu0 %v6388_v61, %s4346_s24 }
 0x315   :  { %v6872_v24 = vpop.permute.xlu0 %2361  ;;  %v6880_v54 = vpop.permute.xlu1 %2345 }
 0x316   :  { %8401 = vst [vmem:[#allocation24_spill] sm:$0xff] %v6872_v24  ;;  %8404 = vst [vmem:[#allocation118_spill] sm:$0xff] %v6880_v54  ;;  %v2084_v24 = vsel %vm857_vm2, %v6304_v62, 0.0 }
 0x317   :  { %2463 = vrot.lane.b32.xlu0 %v6414_v42, %s4346_s24 }
 0x319   :  { %v6878_v1 = vpop.permute.xlu0 %2363  ;;  %v6884_v8 = vpop.permute.xlu1 %2347 }
 0x31a   :  { %8403 = vst [vmem:[#allocation22_spill] sm:$0xff] %v6878_v1 }
 0x31d   :  { %v6882_v0 = vpop.permute.xlu0 %2365  ;;  %v6888_v43 = vpop.permute.xlu1 %2349 }
 0x31e   :  { %8405 = vst [vmem:[#allocation26_spill] sm:$0xff] %v6882_v0  ;;  %8407 = vst [vmem:[#allocation27_spill] sm:$0xff] %v6888_v43  ;;  %v2099_v0 = vsel %vm857_vm2, %v6444_v17, 0.0 }
 0x321   :  { %v6886_v7 = vpop.permute.xlu0 %2367  ;;  %v6896_v1 = vpop.permute.xlu1 %2351 }
 0x322   :  { %8406 = vst [vmem:[#allocation124_spill] sm:$0xff] %v6886_v7 }
 0x325   :  { %v6890_v23 = vpop.permute.xlu0 %2371  ;;  %v6902_v7 = vpop.permute.xlu1 %2369 }
 0x326   :  { %8408 = vst [vmem:[#allocation126_spill] sm:$0xff] %v6890_v23  ;;  %v8411_v23 = vld [vmem:[#allocation105_spill] sm:$0xff] }
 0x327   :  { %v2081_v62 = vsel %vm857_vm2, %v8411_v23, 0.0 }
 0x329   :  { %v6898_v54 = vpop.permute.xlu0 %2387  ;;  %v6914_v17 = vpop.permute.xlu1 %2385 }
 0x32a   :  { %8409 = vst [vmem:[#allocation29_spill] sm:$0xff] %v6898_v54  ;;  %v2111_v54 = vsel %vm857_vm2, %v6328_v31, 0.0 }
 0x32b   :  { %2085 = vadd.xlane.f32.xlu1 %v2084_v24  ;;  %v2105_v24 = vsel %vm857_vm2, %v6312_v22, 0.0  ;;  %v2117_v22 = vsel %vm857_vm2, %v6424_v27, 0.0 }
 0x32d   :  { %v6904_v43 = vpop.permute.xlu0 %2389 }
 0x32e   :  { %8410 = vst [vmem:[#allocation127_spill] sm:$0xff] %v6904_v43  ;;  %v8414_v43 = vld [vmem:[#allocation11_spill] sm:$0xff] }
 0x32f   :  { %2094 = vadd.xlane.f32.xlu1 %v2093_v18  ;;  %v2087_v18 = vsel %vm857_vm2, %v8412_v15, 0.0  ;;  %v2090_v23 = vsel %vm857_vm2, %v8414_v43, 0.0  ;;  %v8417_v15 = vld [vmem:[#allocation34_spill] sm:$0xff] }
 0x330   :  { %v2096_v31 = vsel %vm857_vm2, %v8417_v15, 0.0 }
 0x333   :  { %2100 = vadd.xlane.f32.xlu1 %v2099_v0  ;;  %v6916_v0 = vpop.permute.xlu0 %2391 }
 0x334   :  { %8413 = vst [vmem:[#allocation75_spill] sm:$0xff] %v6916_v0  ;;  %v8419_v0 = vld [vmem:[#allocation38_spill] sm:$0xff] }
 0x335   :  { %v2102_v27 = vsel %vm857_vm2, %v8419_v0, 0.0 }
 0x336   :  { %2082 = vadd.xlane.f32.xlu0 %v2081_v62  ;;  %v6922_v62 = vpop.permute.xlu1 %2373 }
 0x337   :  { %2106 = vadd.xlane.f32.xlu1 %v2105_v24  ;;  %8415 = vst [vmem:[#allocation30_spill] sm:$0xff] %v6922_v62  ;;  %v6924_v24 = vpop.permute.xlu0 %2393  ;;  %v8421_v62 = vld [vmem:[#allocation41_spill] sm:$0xff] }
 0x338   :  { %8416 = vst [vmem:[#allocation128_spill] sm:$0xff] %v6924_v24  ;;  %v8420_v24 = vld [vmem:[#allocation14_spill] sm:$0xff] }
 0x339   :  { %v2114_v15 = vsel %vm857_vm2, %v8420_v24, 0.0  ;;  %v2132_v24 = vsel %vm857_vm2, %v6487_v46, 0.0 }
 0x33a   :  { %2088 = vadd.xlane.f32.xlu0 %v2087_v18  ;;  %v8418_v18 = vld [vmem:[#allocation114_spill] sm:$0xff] }
 0x33b   :  { %2112 = vadd.xlane.f32.xlu1 %v2111_v54  ;;  %v2123_v54 = vsel %vm857_vm2, %v6448_v32, 0.0  ;;  %v2108_v43 = vsel %vm857_vm2, %v8418_v18, 0.0  ;;  %v2126_v32 = vsel %vm857_vm2, %v8421_v62, 0.0  ;;  %v8422_v18 = vld [vmem:[#allocation35_spill] sm:$0xff]  ;;  %v2153_v62 = vsel %vm857_vm2, %v6499_v41, 0.0 }
 0x33c   :  { %v2120_v0 = vsel %vm857_vm2, %v8422_v18, 0.0  ;;  %v2159_v41 = vsel %vm857_vm2, %v6527_v39, 0.0  ;;  %v2165_v39 = vsel %vm857_vm2, %v6567_v34, 0.0  ;;  %v2171_v34 = vsel %vm857_vm2, %v6607_v26, 0.0 }
 0x33e   :  { %2091 = vadd.xlane.f32.xlu0 %v2090_v23  ;;  %v6934_v23 = vpop.permute.xlu1 %2375 }
 0x33f   :  { %2118 = vadd.xlane.f32.xlu1 %v2117_v22  ;;  %v6936_v22 = vpop.permute.xlu0 %2395 }
 0x342   :  { %2097 = vadd.xlane.f32.xlu0 %v2096_v31  ;;  %v6942_v31 = vpop.permute.xlu1 %2377 }
 0x343   :  { %2124 = vadd.xlane.f32.xlu1 %v2123_v54  ;;  %v6944_v54 = vpop.permute.xlu0 %2397 }
 0x346   :  { %2109 = vadd.xlane.f32.xlu0 %v2108_v43  ;;  %v2129_v43 = vsel %vm857_vm2, %v6479_v53, 0.0  ;;  %v2135_v53 = vsel %vm857_vm2, %v6519_v25, 0.0 }
 0x347   :  { %2103 = vadd.xlane.f32.xlu1 %v2102_v27  ;;  %v6954_v27 = vpop.permute.xlu1 %2379 }
 0x34a   :  { %2115 = vadd.xlane.f32.xlu0 %v2114_v15  ;;  %v6956_v15 = vpop.permute.xlu0 %2399 }
 0x34b   :  { %2127 = vadd.xlane.f32.xlu1 %v2126_v32  ;;  %v2156_v32 = vsel %vm857_vm2, %v6507_v6, 0.0  ;;  %v6962_v18 = vpop.permute.xlu1 %2381  ;;  %v2162_v6 = vsel %vm857_vm2, %v6547_v59, 0.0 }
 0x34e   :  { %2121 = vadd.xlane.f32.xlu0 %v2120_v0  ;;  %v6964_v46 = vpop.permute.xlu0 %2403  ;;  %v2138_v0 = vsel %vm857_vm2, %v6539_v3, 0.0 }
 0x34f   :  { %2130 = vadd.xlane.f32.xlu1 %v2129_v43  ;;  %v8423_v43 = vld [vmem:[#allocation44_spill] sm:$0xff] }
 0x350   :  { %v2141_v25 = vsel %vm857_vm2, %v8423_v43, 0.0 }
 0x352   :  { %2133 = vadd.xlane.f32.xlu0 %v2132_v24  ;;  %v6974_v24 = vpop.permute.xlu1 %2383 }
 0x353   :  { %2154 = vadd.xlane.f32.xlu1 %v2153_v62  ;;  %v6976_v62 = vpop.permute.xlu0 %2419 }
 0x356   :  { %2157 = vadd.xlane.f32.xlu0 %v2156_v32  ;;  %v8424_v32 = vld [vmem:[#allocation45_spill] sm:$0xff] }
 0x357   :  { %2136 = vadd.xlane.f32.xlu1 %v2135_v53  ;;  %v2144_v3 = vsel %vm857_vm2, %v8424_v32, 0.0  ;;  %v6982_v53 = vpop.permute.xlu1 %2401  ;;  %v6984_v59 = vpop.permute.xlu0 %2421 }
 0x358   :  { %8425 = vst [vmem:[#allocation94_spill] sm:$0xff] %v6984_v59  ;;  %v8429_v59 = vld [vmem:[#allocation115_spill] sm:$0xff] }
 0x35a   :  { %2160 = vadd.xlane.f32.xlu0 %v2159_v41  ;;  %v8426_v41 = vld [vmem:[#allocation48_spill] sm:$0xff] }
 0x35b   :  { %2139 = vadd.xlane.f32.xlu1 %v2138_v0  ;;  %v2168_v0 = vsel %vm857_vm2, %v8426_v41, 0.0  ;;  %v2174_v41 = vsel %vm857_vm2, %v8429_v59, 0.0  ;;  %v2204_v59 = vsel %vm857_vm2, %v6667_v12, 0.0 }
 0x35e   :  { %2163 = vadd.xlane.f32.xlu0 %v2162_v6  ;;  %v8427_v6 = vld [vmem:[#allocation51_spill] sm:$0xff] }
 0x35f   :  { %2142 = vadd.xlane.f32.xlu1 %v2141_v25  ;;  %v2147_v43 = vsel %vm857_vm2, %v8427_v6, 0.0  ;;  %v8428_v25 = vld [vmem:[#allocation18_spill] sm:$0xff]  ;;  %v2177_v6 = vsel %vm857_vm2, %v6639_v5, 0.0  ;;  %v2183_v5 = vsel %vm857_vm2, %v6679_v9, 0.0  ;;  %v2210_v9 = vsel %vm857_vm2, %v6340_v52, 0.0 }
 0x360   :  { %v2150_v32 = vsel %vm857_vm2, %v8428_v25, 0.0  ;;  %v2216_v52 = vsel %vm857_vm2, %v6350_v10, 0.0  ;;  %v2222_v10 = vsel %vm857_vm2, %v6358_v4, 0.0 }
 0x362   :  { %2166 = vadd.xlane.f32.xlu0 %v2165_v39  ;;  %v6994_v39 = vpop.permute.xlu1 %2417 }
 0x363   :  { %2145 = vadd.xlane.f32.xlu1 %v2144_v3  ;;  %v6996_v3 = vpop.permute.xlu0 %2423 }
 0x366   :  { %2169 = vadd.xlane.f32.xlu0 %v2168_v0  ;;  %v7002_v0 = vpop.permute.xlu1 %2405 }
 0x367   :  { %2148 = vadd.xlane.f32.xlu1 %v2147_v43  ;;  %v7004_v26 = vpop.permute.xlu0 %2425  ;;  %v2180_v43 = vsel %vm857_vm2, %v6647_v51, 0.0  ;;  %v2207_v51 = vsel %vm857_vm2, %v6687_v21, 0.0  ;;  %v2213_v21 = vsel %vm857_vm2, %v6346_v63, 0.0 }
 0x36a   :  { %2172 = vadd.xlane.f32.xlu0 %v2171_v34  ;;  %v2201_v34 = vsel %vm857_vm2, %v6659_v44, 0.0  ;;  %v7014_v25 = vpop.permute.xlu1 %2407  ;;  %v2186_v44 = vsel %vm857_vm2, %v6699_v16, 0.0  ;;  %v2192_v16 = vsel %vm857_vm2, %v6731_v35, 0.0  ;;  %v2219_v35 = vsel %vm857_vm2, %v6354_v45, 0.0 }
 0x36b   :  { %2151 = vadd.xlane.f32.xlu1 %v2150_v32  ;;  %v7016_v32 = vpop.permute.xlu0 %2427  ;;  %v2228_v45 = vsel %vm857_vm2, %v6368_v38, 0.0 }
 0x36e   :  { %2175 = vadd.xlane.f32.xlu0 %v2174_v41  ;;  %v7022_v41 = vpop.permute.xlu1 %2409 }
 0x36f   :  { %2178 = vadd.xlane.f32.xlu1 %v2177_v6  ;;  %v7024_v12 = vpop.permute.xlu0 %2429  ;;  %v2189_v6 = vsel %vm857_vm2, %v6715_v20, 0.0  ;;  %v2195_v20 = vsel %vm857_vm2, %v6747_v2, 0.0  ;;  %v2225_v2 = vsel %vm857_vm2, %v6364_v56, 0.0 }
 0x372   :  { %2181 = vadd.xlane.f32.xlu0 %v2180_v43  ;;  %v7034_v43 = vpop.permute.xlu1 %2411 }
 0x373   :  { %2202 = vadd.xlane.f32.xlu1 %v2201_v34  ;;  %v7036_v34 = vpop.permute.xlu0 %2431 }
 0x376   :  { %2205 = vadd.xlane.f32.xlu0 %v2204_v59  ;;  %v7042_v59 = vpop.permute.xlu1 %2413 }
 0x377   :  { %2184 = vadd.xlane.f32.xlu1 %v2183_v5  ;;  %v7044_v63 = vpop.permute.xlu0 %2435  ;;  %v2198_v5 = vsel %vm857_vm2, %v6763_v49, 0.0  ;;  %v2249_v49 = vsel %vm857_vm2, %v6391_v13, 0.0 }
 0x37a   :  { %2208 = vadd.xlane.f32.xlu0 %v2207_v51  ;;  %v7054_v51 = vpop.permute.xlu1 %2415 }
 0x37b   :  { %2187 = vadd.xlane.f32.xlu1 %v2186_v44  ;;  %v7056_v44 = vpop.permute.xlu0 %2451 }
 0x37e   :  { %2211 = vadd.xlane.f32.xlu0 %v2210_v9  ;;  %v7062_v9 = vpop.permute.xlu1 %2433 }
 0x37f   :  { %2190 = vadd.xlane.f32.xlu1 %v2189_v6  ;;  %v7064_v6 = vpop.permute.xlu0 %2453 }
 0x380   :  { %8430 = vst [vmem:[#allocation32_spill] sm:$0xff] %v7064_v6 }
 0x382   :  { %2214 = vadd.xlane.f32.xlu0 %v2213_v21  ;;  %v2252_v21 = vsel %vm857_vm2, %v6394_v33, 0.0 }
 0x383   :  { %2193 = vadd.xlane.f32.xlu1 %v2192_v16  ;;  %v2231_v16 = vsel %vm857_vm2, %v6372_v57, 0.0 }
 0x386   :  { %2217 = vadd.xlane.f32.xlu0 %v2216_v52  ;;  %v2255_v52 = vsel %vm857_vm2, %v6397_v50, 0.0  ;;  %v8449_v50 = vld [vmem:[#allocation126_spill] sm:$0xff] }
 0x387   :  { %2196 = vadd.xlane.f32.xlu1 %v2195_v20  ;;  %v2234_v20 = vsel %vm857_vm2, %v6376_v40, 0.0 }
 0x38a   :  { %2220 = vadd.xlane.f32.xlu0 %v2219_v35  ;;  %v7074_v35 = vpop.permute.xlu1 %2449 }
 0x38b   :  { %2199 = vadd.xlane.f32.xlu1 %v2198_v5  ;;  %v7076_v5 = vpop.permute.xlu0 %2455 }
 0x38c   :  { %8431 = vst [vmem:[#allocation129_spill] sm:$0xff] %v7076_v5 }
 0x38e   :  { %2223 = vadd.xlane.f32.xlu0 %v2222_v10  ;;  %v2258_v10 = vsel %vm857_vm2, %v6400_v58, 0.0  ;;  %v2246_v58 = vsel %vm857_vm2, %v6388_v61, 0.0 }
 0x38f   :  { %2226 = vadd.xlane.f32.xlu1 %v2225_v2  ;;  %v2237_v2 = vsel %vm857_vm2, %v6379_v48, 0.0 }
 0x392   :  { %2229 = vadd.xlane.f32.xlu0 %v2228_v45  ;;  %v7082_v45 = vpop.permute.xlu1 %2437 }
 0x393   :  { %2250 = vadd.xlane.f32.xlu1 %v2249_v49  ;;  %v7084_v49 = vpop.permute.xlu0 %2441 }
 0x394   :  { %8432 = vst [vmem:[#allocation78_spill] sm:$0xff] %v7084_v49 }
 0x396   :  { %2253 = vadd.xlane.f32.xlu0 %v2252_v21  ;;  %v2261_v21 = vsel %vm857_vm2, %v6405_v30, 0.0  ;;  %v2267_v30 = vsel %vm857_vm2, %v6411_v36, 0.0  ;;  %v2532_v36 = vsel %vm857_vm2, %v6841_v60, 0.0  ;;  %v2559_v60 = vsel %vm857_vm2, %v6862_v47, 0.0  ;;  %v8444_v47 = vld [vmem:[#allocation24_spill] sm:$0xff] }
 0x397   :  { %2232 = vadd.xlane.f32.xlu1 %v2231_v16  ;;  %v2240_v16 = vsel %vm857_vm2, %v6382_v19, 0.0 }
 0x39a   :  { %2256 = vadd.xlane.f32.xlu0 %v2255_v52  ;;  %v2264_v52 = vsel %vm857_vm2, %v6408_v37, 0.0  ;;  %v2553_v37 = vsel %vm857_vm2, %v6858_v29, 0.0 }
 0x39b   :  { %2235 = vadd.xlane.f32.xlu1 %v2234_v20  ;;  %v2243_v20 = vsel %vm857_vm2, %v6385_v11, 0.0 }
 0x39e   :  { %2259 = vadd.xlane.f32.xlu0 %v2258_v10  ;;  %v7094_v10 = vpop.permute.xlu1 %2439 }
 0x39f   :  { %2238 = vadd.xlane.f32.xlu1 %v2237_v2  ;;  %8433 = vst [vmem:[#allocation33_spill] sm:$0xff] %v7094_v10  ;;  %v7096_v2 = vpop.permute.xlu0 %2443 }
 0x3a0   :  { %8434 = vst [vmem:[#allocation130_spill] sm:$0xff] %v7096_v2  ;;  %v8447_v2 = vld [vmem:[#allocation26_spill] sm:$0xff] }
 0x3a2   :  { %2262 = vadd.xlane.f32.xlu0 %v2261_v21  ;;  %v7102_v21 = vpop.permute.xlu1 %2457 }
 0x3a3   :  { %2241 = vadd.xlane.f32.xlu1 %v2240_v16  ;;  %8435 = vst [vmem:[#allocation85_spill] sm:$0xff] %v7102_v21  ;;  %v7104_v16 = vpop.permute.xlu0 %2459  ;;  %v8448_v21 = vld [vmem:[#allocation124_spill] sm:$0xff] }
 0x3a4   :  { %8436 = vst [vmem:[#allocation36_spill] sm:$0xff] %v7104_v16 }
 0x3a6   :  { %2265 = vadd.xlane.f32.xlu0 %v2264_v52  ;;  %v2270_v52 = vsel %vm857_vm2, %v6414_v42, 0.0  ;;  %v2556_v42 = vsel %vm857_vm2, %v6854_v55, 0.0 }
 0x3a7   :  { %2244 = vadd.xlane.f32.xlu1 %v2243_v20  ;;  %v2529_v20 = vsel %vm857_vm2, %v6843_v28, 0.0  ;;  %v2535_v28 = vsel %vm857_vm2, %v6866_v14, 0.0 }
 0x3aa   :  { %2268 = vadd.xlane.f32.xlu0 %v2267_v30  ;;  %v7116_v30 = vpop.permute.xlu0 %2461 }
 0x3ab   :  { %2247 = vadd.xlane.f32.xlu1 %v2246_v58  ;;  %v7114_v58 = vpop.permute.xlu1 %2445  ;;  %8438 = vst [vmem:[#allocation81_spill] sm:$0xff] %v7116_v30  ;;  %v8441_v30 = vld [vmem:[#allocation120_spill] sm:$0xff] }
 0x3ac   :  { %8437 = vst [vmem:[#allocation131_spill] sm:$0xff] %v7114_v58  ;;  %v2562_v55 = vsel %vm857_vm2, %v8441_v30, 0.0  ;;  %v8442_v58 = vld [vmem:[#allocation118_spill] sm:$0xff] }
 0x3ad   :  { %v8445_v30 = vld [vmem:[#allocation22_spill] sm:$0xff] }
 0x3ae   :  { %2271 = vadd.xlane.f32.xlu0 %v2270_v52  ;;  %v2568_v16 = vsel %vm857_vm2, %v8445_v30, 0.0  ;;  %v2574_v30 = vsel %vm857_vm2, %v8448_v21, 0.0 }
 0x3af   :  { %2530 = vadd.xlane.f32.xlu1 %v2529_v20  ;;  %v7122_v20 = vpop.permute.xlu0 %2447 }
 0x3b0   :  { %8439 = vst [vmem:[#allocation37_spill] sm:$0xff] %v7122_v20  ;;  %v2565_v20 = vsel %vm857_vm2, %v8444_v47, 0.0  ;;  %v2571_v47 = vsel %vm857_vm2, %v8447_v2, 0.0  ;;  %v2580_v2 = vsel %vm857_vm2, %v8449_v50, 0.0 }
 0x3b2   :  { %2533 = vadd.xlane.f32.xlu0 %v2532_v36  ;;  %v8440_v36 = vld [vmem:[#allocation122_spill] sm:$0xff] }
 0x3b3   :  { %2554 = vadd.xlane.f32.xlu1 %v2553_v37  ;;  %v2538_v37 = vsel %vm857_vm2, %v8440_v36, 0.0  ;;  %v7134_v14 = vpop.permute.xlu0 %2463 }
 0x3b4   :  { %8443 = vst [vmem:[#allocation132_spill] sm:$0xff] %v7134_v14 }
 0x3b6   :  { %2557 = vadd.xlane.f32.xlu0 %v2556_v42  ;;  %v2541_v42 = vsel %vm857_vm2, %v8442_v58, 0.0  ;;  %v8446_v58 = vld [vmem:[#allocation27_spill] sm:$0xff] }
 0x3b7   :  { %2536 = vadd.xlane.f32.xlu1 %v2535_v28 }
 0x3b8   :  { %v2086_v52 = vpop.xlane.xlu1 %2085 }
 0x3ba   :  { %2560 = vadd.xlane.f32.xlu0 %v2559_v60  ;;  %v2544_v60 = vsel %vm857_vm2, %v6884_v8, 0.0  ;;  %v2550_v8 = vsel %vm857_vm2, %v6896_v1, 0.0  ;;  %v2601_v1 = vsel %vm857_vm2, %v6914_v17, 0.0  ;;  %v8451_v17 = vld [vmem:[#allocation29_spill] sm:$0xff] }
 0x3bb   :  { %2539 = vadd.xlane.f32.xlu1 %v2538_v37 }
 0x3bc   :  { %v7128_v29 = vpop.xlane.xlu1 %2094 }
 0x3be   :  { %2563 = vadd.xlane.f32.xlu0 %v2562_v55  ;;  %v2547_v55 = vsel %vm857_vm2, %v8446_v58, 0.0  ;;  %v2577_v58 = vsel %vm857_vm2, %v6902_v7, 0.0 }
 0x3bf   :  { %2542 = vadd.xlane.f32.xlu1 %v2541_v42 }
 0x3c0   :  { %v7136_v28 = vpop.xlane.xlu1 %2100 }
 0x3c2   :  { %2566 = vadd.xlane.f32.xlu0 %v2565_v20 }
 0x3c3   :  { %2545 = vadd.xlane.f32.xlu1 %v2544_v60  ;;  %v2083_v36 = vpop.xlane.xlu0 %2082 }
 0x3c4   :  { %v2107_v37 = vpop.xlane.xlu1 %2106 }
 0x3c6   :  { %2569 = vadd.xlane.f32.xlu0 %v2568_v16 }
 0x3c7   :  { %2548 = vadd.xlane.f32.xlu1 %v2547_v55  ;;  %v2089_v42 = vpop.xlane.xlu0 %2088 }
 0x3c8   :  { %v2113_v14 = vpop.xlane.xlu1 %2112 }
 0x3ca   :  { %2572 = vadd.xlane.f32.xlu0 %v2571_v47  ;;  %v8450_v47 = vld [vmem:[#allocation5_spill] sm:$0xff] }
 0x3cb   :  { %2551 = vadd.xlane.f32.xlu1 %v2550_v8  ;;  %v2092_v20 = vpop.xlane.xlu0 %2091  ;;  %v2790_v8 = vrot.slane %v2083_v36, %v8450_v47  ;;  %v2798_v21 = vrot.slane %v2089_v42, %v8450_v47  ;;  %v2604_v36 = vsel %vm857_vm2, %v8451_v17, 0.0 }
 0x3cc   :  { %v2119_v60 = vpop.xlane.xlu1 %2118  ;;  %v2802_v5 = vrot.slane %v2092_v20, %v8450_v47 }
 0x3ce   :  { %2575 = vadd.xlane.f32.xlu0 %v2574_v30  ;;  %v2794_v30 = vrot.slane %v2086_v52, %v8450_v47 }
 0x3cf   :  { %2578 = vadd.xlane.f32.xlu1 %v2577_v58  ;;  %v2098_v16 = vpop.xlane.xlu0 %2097  ;;  %v2822_v58 = vrot.slane %v2107_v37, %v8450_v47  ;;  %v2830_v37 = vrot.slane %v2113_v14, %v8450_v47  ;;  %v2586_v14 = vsel %vm857_vm2, %v6934_v23, 0.0 }
 0x3d0   :  { %v2125_v55 = vpop.xlane.xlu1 %2124  ;;  %v3044_v33 = vsel %vm3043_vm3, %v2794_v30, %v2790_v8  ;;  %v2806_v30 = vrot.slane %v7128_v29, %v8450_v47 }
 0x3d1   :  { %v3046_v52 = vsel %vm3045_vm4, %v2798_v21, %v3044_v33 }
 0x3d2   :  { %2581 = vadd.xlane.f32.xlu0 %v2580_v2  ;;  %v8452_v2 = vld [vmem:[#allocation30_spill] sm:$0xff]  ;;  %v3048_v17 = vsel %vm3047_vm5, %v2802_v5, %v3046_v52  ;;  %v2814_v52 = vrot.slane %v7136_v28, %v8450_v47 }
 0x3d3   :  { %2602 = vadd.xlane.f32.xlu1 %v2601_v1  ;;  %v2110_v49 = vpop.xlane.xlu0 %2109  ;;  %v2583_v1 = vsel %vm857_vm2, %v8452_v2, 0.0  ;;  %v2810_v2 = vrot.slane %v2098_v16, %v8450_v47  ;;  %v2838_v16 = vrot.slane %v2119_v60, %v8450_v47  ;;  %v2846_v60 = vrot.slane %v2125_v55, %v8450_v47 }
 0x3d4   :  { %v2104_v7 = vpop.xlane.xlu1 %2103  ;;  %v2826_v50 = vrot.slane %v2110_v49, %v8450_v47  ;;  %v8453_v49 = vld [vmem:[#allocation127_spill] sm:$0xff] }
 0x3d5   :  { %v2607_v6 = vsel %vm857_vm2, %v8453_v49, 0.0 }
 0x3d6   :  { %v3057_v42 = vsel %vm3043_vm3, %v2826_v50, %v2822_v58  ;;  %2605 = vadd.xlane.f32.xlu0 %v2604_v36  ;;  %v8454_v58 = vld [vmem:[#allocation75_spill] sm:$0xff]  ;;  %v3050_v50 = vsel %vm3049_vm6, %v2806_v30, %v3048_v17  ;;  %v8457_v30 = vld [vmem:[#allocation128_spill] sm:$0xff] }
 0x3d7   :  { %2584 = vadd.xlane.f32.xlu1 %v2583_v1  ;;  %v2116_v20 = vpop.xlane.xlu0 %2115  ;;  %v3058_v33 = vsel %vm3045_vm4, %v2830_v37, %v3057_v42  ;;  %v2610_v5 = vsel %vm857_vm2, %v8454_v58, 0.0  ;;  %v2589_v1 = vsel %vm857_vm2, %v6942_v31, 0.0  ;;  %v3052_v23 = vsel %vm3051_vm7, %v2810_v2, %v3050_v50 }
 0x3d8   :  { %v2128_v10 = vpop.xlane.xlu1 %2127  ;;  %v2834_v8 = vrot.slane %v2116_v20, %v8450_v47  ;;  %v3054_v31 = vsel %vm3053_vm8, %v2814_v52, %v3052_v23  ;;  %v2595_v50 = vsel %vm857_vm2, %v6962_v18, 0.0  ;;  %v2598_v23 = vsel %vm857_vm2, %v6974_v24, 0.0  ;;  %v8459_v52 = vld [vmem:[#allocation97_spill] sm:$0xff] }
 0x3d9   :  { %v2850_v20 = vrot.slane %v2128_v10, %v8450_v47  ;;  %v2622_v18 = vsel %vm857_vm2, %v6956_v15, 0.0  ;;  %v2649_v15 = vsel %vm857_vm2, %v6994_v39, 0.0  ;;  %v2652_v39 = vsel %vm857_vm2, %v6976_v62, 0.0  ;;  %v8513_v10 = vld [vmem:[#allocation6_spill] sm:$0xff] }
 0x3da   :  { %v3059_v21 = vsel %vm3047_vm5, %v2834_v8, %v3058_v33  ;;  %2608 = vadd.xlane.f32.xlu0 %v2607_v6  ;;  %v2818_v6 = vrot.slane %v2104_v7, %v8450_v47  ;;  %v2613_v33 = vsel %vm857_vm2, %v8457_v30, 0.0  ;;  %v8464_v30 = vld [vmem:[#allocation100_spill] sm:$0xff] }
 0x3db   :  { %2587 = vadd.xlane.f32.xlu1 %v2586_v14  ;;  %v2122_v36 = vpop.xlane.xlu0 %2121  ;;  %v3060_v37 = vsel %vm3049_vm6, %v2838_v16, %v3059_v21  ;;  %v2592_v14 = vsel %vm857_vm2, %v6954_v27, 0.0  ;;  %v2616_v16 = vsel %vm857_vm2, %v6936_v22, 0.0  ;;  %v2619_v27 = vsel %vm857_vm2, %v6944_v54, 0.0 }
 0x3dc   :  { %v7187_v29 = vpop.xlane.xlu1 %2130  ;;  %v2842_v42 = vrot.slane %v2122_v36, %v8450_v47  ;;  %v3056_v28 = vsel %vm3055_vm9, %v2818_v6, %v3054_v31 }
 0x3de   :  { %v3061_v49 = vsel %vm3051_vm7, %v2842_v42, %v3060_v37  ;;  %2611 = vadd.xlane.f32.xlu0 %v2610_v5  ;;  %v8458_v5 = vmov 0.0|0.0   ;;  %v2625_v37 = vsel %vm857_vm2, %v6982_v53, 0.0  ;;  %v8465_v53 = vld [vmem:[#allocation163_spill] sm:$0xff] }
 0x3df   :  { %2590 = vadd.xlane.f32.xlu1 %v2589_v1  ;;  %v3062_v7 = vsel %vm3053_vm8, %v2846_v60, %v3061_v49  ;;  %v7202_v17 = vpop.xlane.xlu0 %2133  ;;  %v8460_v60 = vld [vmem:[#allocation17_spill] sm:$0xff] }
 0x3e0   :  { %v7204_v2 = vpop.xlane.xlu1 %2154  ;;  %v3063_v55 = vsel %vm3055_vm9, %v2850_v20, %v3062_v7  ;;  %v969_v22 = vsel %vm857_vm2, %v8460_v60, %v8459_v52  ;;  %v8461_v49 = vld [vmem:[#allocation21_spill] sm:$0xff]  ;;  %v8462_v7 = vld [vmem:[#allocation99_spill] sm:$0xff]  ;;  %v2854_v52 = vrot.slane %v7187_v29, %v8450_v47 }
 0x3e1   :  { %v4135_v8 = vpack.c.bf16 %v3063_v55, %v3056_v28  ;;  %v2001_v20 = vmul.f32 %v6358_v4, %v969_v22  ;;  %v8463_v28 = vld [vmem:[#allocation23_spill] sm:$0xff]  ;;  %v971_v4 = vsel %vm857_vm2, %v8465_v53, %v8464_v30  ;;  %v2886_v22 = vrot.slane %v7204_v2, %v8450_v47 }
 0x3e2   :  { %2614 = vadd.xlane.f32.xlu0 %v2613_v33  ;;  %v970_v55 = vsel %vm857_vm2, %v8463_v28, %v8462_v7 }
 0x3e3   :  { %2593 = vadd.xlane.f32.xlu1 %v2592_v14  ;;  %4137 = vmatpush3.bf16.xpose.msk.msra.mxu0 %vm7210_vm11, %v4135_v8  ;;  %v2158_v21 = vpop.xlane.xlu0 %2157  ;;  %v2064_v31 = vadd.f32 %v8461_v49, %v2001_v20  ;;  %v2628_v8 = vsel %vm857_vm2, %v6964_v46, 0.0  ;;  %v2002_v33 = vmul.f32 %v6364_v56, %v970_v55  ;;  %v2003_v14 = vmul.f32 %v6368_v38, %v971_v4  ;;  %v8467_v55 = vld [vmem:[#allocation102_spill] sm:$0xff] }
 0x3e4   :  { %v2137_v58 = vpop.xlane.xlu1 %2136  ;;  %4138 = vmatprep.subr.bf16.mxu0 %v8458_v5  ;;  %v2890_v46 = vrot.slane %v2158_v21, %v8450_v47  ;;  %v2631_v38 = vsel %vm857_vm2, %v7002_v0, 0.0  ;;  %v2634_v0 = vsel %vm857_vm2, %v7014_v25, 0.0 }
 0x3e5   :  { %v2862_v56 = vrot.slane %v2137_v58, %v8450_v47 }
 0x3e6   :  { %2617 = vadd.xlane.f32.xlu0 %v2616_v16 }
 0x3e7   :  { %2596 = vadd.xlane.f32.xlu1 %v2595_v50  ;;  %v2161_v36 = vpop.xlane.xlu0 %2160 }
 0x3e8   :  { %v2140_v1 = vpop.xlane.xlu1 %2139  ;;  %v2894_v60 = vrot.slane %v2161_v36, %v8450_v47 }
 0x3ea   :  { %2620 = vadd.xlane.f32.xlu0 %v2619_v27  ;;  %v2065_v27 = vadd.f32 %v2064_v31, %v2002_v33 }
 0x3eb   :  { %2599 = vadd.xlane.f32.xlu1 %v2598_v23  ;;  %v2164_v6 = vpop.xlane.xlu0 %2163  ;;  %v2858_v23 = vrot.slane %v7202_v17, %v8450_v47  ;;  %v2866_v17 = vrot.slane %v2140_v1, %v8450_v47  ;;  %v3071_v1 = vsel %vm3043_vm3, %v2890_v46, %v2886_v22 }
 0x3ec   :  { %v2143_v42 = vpop.xlane.xlu1 %2142  ;;  %v2898_v21 = vrot.slane %v2164_v6, %v8450_v47  ;;  %v2066_v33 = vadd.f32 %v2065_v27, %v2003_v14 }
 0x3ed   :  { %v2870_v62 = vrot.slane %v2143_v42, %v8450_v47  ;;  %v3064_v2 = vsel %vm3043_vm3, %v2858_v23, %v2854_v52  ;;  %v2658_v52 = vsel %vm857_vm2, %v6996_v3, 0.0 }
 0x3ee   :  { %2623 = vadd.xlane.f32.xlu0 %v2622_v18  ;;  %v3065_v42 = vsel %vm3045_vm4, %v2862_v56, %v3064_v2  ;;  %v2637_v56 = vsel %vm857_vm2, %v7022_v41, 0.0  ;;  %v2640_v41 = vsel %vm857_vm2, %v7034_v43, 0.0  ;;  %v8472_v2 = vld [vmem:[#allocation166_spill] sm:$0xff]  ;;  %v2643_v43 = vsel %vm857_vm2, %v7042_v59, 0.0 }
 0x3ef   :  { %2626 = vadd.xlane.f32.xlu1 %v2625_v37  ;;  %v2167_v54 = vpop.xlane.xlu0 %2166  ;;  %v8466_v37 = vld [vmem:[#allocation94_spill] sm:$0xff]  ;;  %v3066_v7 = vsel %vm3047_vm5, %v2866_v17, %v3065_v42 }
 0x3f0   :  { %v2146_v24 = vpop.xlane.xlu1 %2145  ;;  %v2902_v29 = vrot.slane %v2167_v54, %v8450_v47  ;;  %v2655_v36 = vsel %vm857_vm2, %v8466_v37, 0.0  ;;  %v3072_v54 = vsel %vm3045_vm4, %v2894_v60, %v3071_v1 }
 0x3f1   :  { %v2874_v6 = vrot.slane %v2146_v24, %v8450_v47  ;;  %v3073_v25 = vsel %vm3047_vm5, %v2898_v21, %v3072_v54  ;;  %v8468_v24 = vld [vmem:[#allocation164_spill] sm:$0xff]  ;;  %v8473_v54 = vld [vmem:[#allocation107_spill] sm:$0xff] }
 0x3f2   :  { %2629 = vadd.xlane.f32.xlu0 %v2628_v8  ;;  %v972_v8 = vsel %vm857_vm2, %v8468_v24, %v8467_v55  ;;  %v3074_v30 = vsel %vm3049_vm6, %v2902_v29, %v3073_v25  ;;  %v8470_v29 = vld [vmem:[#allocation165_spill] sm:$0xff]  ;;  %v8476_v24 = vld [vmem:[#allocation168_spill] sm:$0xff] }
 0x3f3   :  { %2650 = vadd.xlane.f32.xlu1 %v2649_v15  ;;  %v2170_v16 = vpop.xlane.xlu0 %2169  ;;  %v3067_v15 = vsel %vm3049_vm6, %v2870_v62, %v3066_v7  ;;  %v2004_v60 = vmul.f32 %v6372_v57, %v972_v8  ;;  %v8469_v62 = vld [vmem:[#allocation103_spill] sm:$0xff]  ;;  %v2661_v57 = vsel %vm857_vm2, %v7004_v26, 0.0  ;;  %v2664_v26 = vsel %vm857_vm2, %v7016_v32, 0.0  ;;  %v8475_v55 = vld [vmem:[#allocation109_spill] sm:$0xff] }
 0x3f4   :  { %v2149_v50 = vpop.xlane.xlu1 %2148  ;;  %v2906_v20 = vrot.slane %v2170_v16, %v8450_v47  ;;  %v3068_v16 = vsel %vm3051_vm7, %v2874_v6, %v3067_v15  ;;  %v973_v3 = vsel %vm857_vm2, %v8470_v29, %v8469_v62  ;;  %v2667_v7 = vsel %vm857_vm2, %v7024_v12, 0.0 }
 0x3f5   :  { %v2878_v49 = vrot.slane %v2149_v50, %v8450_v47  ;;  %v2067_v21 = vadd.f32 %v2066_v33, %v2004_v60  ;;  %v2646_v32 = vsel %vm857_vm2, %v7054_v51, 0.0  ;;  %v976_v8 = vsel %vm857_vm2, %v8476_v24, %v8475_v55  ;;  %v8477_v33 = vld [vmem:[#allocation110_spill] sm:$0xff] }
 0x3f6   :  { %2653 = vadd.xlane.f32.xlu0 %v2652_v39  ;;  %v3075_v50 = vsel %vm3051_vm7, %v2906_v20, %v3074_v30  ;;  %v2670_v15 = vsel %vm857_vm2, %v7036_v34, 0.0  ;;  %v2673_v12 = vsel %vm857_vm2, %v7062_v9, 0.0  ;;  %v2008_v30 = vmul.f32 %v6385_v11, %v976_v8 }
 0x3f7   :  { %2632 = vadd.xlane.f32.xlu1 %v2631_v38  ;;  %v2173_v18 = vpop.xlane.xlu0 %2172  ;;  %v3069_v46 = vsel %vm3053_vm8, %v2878_v49, %v3068_v16  ;;  %v8474_v49 = vld [vmem:[#allocation167_spill] sm:$0xff]  ;;  %v8478_v16 = vld [vmem:[#allocation54_spill] sm:$0xff]  ;;  %v2697_v34 = vsel %vm857_vm2, %v7074_v35, 0.0  ;;  %v2700_v35 = vsel %vm857_vm2, %v7056_v44, 0.0 }
 0x3f8   :  { %v2152_v58 = vpop.xlane.xlu1 %2151  ;;  %v2910_v31 = vrot.slane %v2173_v18, %v8450_v47  ;;  %v2005_v18 = vmul.f32 %v6376_v40, %v973_v3 }
 0x3f9   :  { %v2882_v28 = vrot.slane %v2152_v58, %v8450_v47 }
 0x3fa   :  { %2656 = vadd.xlane.f32.xlu0 %v2655_v36  ;;  %v3076_v39 = vsel %vm3053_vm8, %v2910_v31, %v3075_v50  ;;  %v2068_v36 = vadd.f32 %v2067_v21, %v2005_v18  ;;  %v975_v31 = vsel %vm857_vm2, %v8474_v49, %v8473_v54  ;;  %v977_v50 = vsel %vm857_vm2, %v8478_v16, %v8477_v33  ;;  %v8484_v54 = vld [vmem:[#allocation58_spill] sm:$0xff] }
 0x3fb   :  { %2635 = vadd.xlane.f32.xlu1 %v2634_v0  ;;  %v2176_v53 = vpop.xlane.xlu0 %2175  ;;  %v3070_v14 = vsel %vm3055_vm9, %v2882_v28, %v3069_v46  ;;  %v8471_v0 = vld [vmem:[#allocation106_spill] sm:$0xff]  ;;  %v2007_v25 = vmul.f32 %v6382_v19, %v975_v31  ;;  %v8479_v46 = vld [vmem:[#allocation112_spill] sm:$0xff]  ;;  %v2009_v11 = vmul.f32 %v6388_v61, %v977_v50  ;;  %v2679_v21 = vsel %vm857_vm2, %v7082_v45, 0.0 }
 0x3fc   :  { %v7287_v4 = vpop.xlane.xlu1 %2178  ;;  %v2914_v23 = vrot.slane %v2176_v53, %v8450_v47  ;;  %v974_v1 = vsel %vm857_vm2, %v8472_v2, %v8471_v0 }
 0x3fd   :  { %v2006_v40 = vmul.f32 %v6379_v48, %v974_v1 }
 0x3fe   :  { %v3077_v27 = vsel %vm3055_vm9, %v2914_v23, %v3076_v39  ;;  %2659 = vadd.xlane.f32.xlu0 %v2658_v52  ;;  %v2676_v23 = vsel %vm857_vm2, %v7044_v63, 0.0  ;;  %v8480_v39 = vld [vmem:[#allocation55_spill] sm:$0xff] }
 0x3ff   :  { %2638 = vadd.xlane.f32.xlu1 %v2637_v56  ;;  %v4139_v38 = vpack.c.bf16 %v3077_v27, %v3070_v14  ;;  %v7301_v22 = vpop.xlane.xlu0 %2181  ;;  %v2069_v42 = vadd.f32 %v2068_v36, %v2006_v40  ;;  %v978_v9 = vsel %vm857_vm2, %v8480_v39, %v8479_v46  ;;  %v8488_v39 = vld [vmem:[#allocation116_spill] sm:$0xff] }
 0x400   :  { %v7303_v17 = vpop.xlane.xlu1 %2202  ;;  %v2010_v52 = vmul.f32 %v6391_v13, %v978_v9  ;;  %v2922_v27 = vrot.slane %v7301_v22, %v8450_v47  ;;  %v8489_v9 = vld [vmem:[#allocation61_spill] sm:$0xff] }
 0x401   :  { %4141 = vmatpush3.bf16.xpose.msk.msra.mxu0 %vm7210_vm11, %v4139_v38  ;;  %v2070_v28 = vadd.f32 %v2069_v42, %v2007_v25  ;;  %v2918_v38 = vrot.slane %v7287_v4, %v8450_v47  ;;  %v2950_v22 = vrot.slane %v7303_v17, %v8450_v47  ;;  %v8483_v42 = vld [vmem:[#allocation113_spill] sm:$0xff] }
 0x402   :  { %2662 = vadd.xlane.f32.xlu0 %v2661_v57  ;;  %4142 = vmatprep.subr.bf16.mxu0 %v8458_v5  ;;  %v979_v49 = vsel %vm857_vm2, %v8484_v54, %v8483_v42  ;;  %v8503_v42 = vld [vmem:[#allocation121_spill] sm:$0xff]  ;;  %v8504_v54 = vld [vmem:[#allocation68_spill] sm:$0xff] }
 0x403   :  { %2641 = vadd.xlane.f32.xlu1 %v2640_v41  ;;  %v7315_v58 = vpop.xlane.xlu0 %2205  ;;  %v2071_v53 = vadd.f32 %v2070_v28, %v2008_v30  ;;  %v8481_v41 = vld [vmem:[#allocation32_spill] sm:$0xff]  ;;  %v3078_v17 = vsel %vm3043_vm3, %v2922_v27, %v2918_v38  ;;  %v8486_v30 = vld [vmem:[#allocation129_spill] sm:$0xff]  ;;  %v8492_v27 = vld [vmem:[#allocation130_spill] sm:$0xff] }
 0x404   :  { %v7317_v37 = vpop.xlane.xlu1 %2184  ;;  %v2954_v63 = vrot.slane %v7315_v58, %v8450_v47  ;;  %v2703_v18 = vsel %vm857_vm2, %v8481_v41, 0.0  ;;  %v8482_v58 = vld [vmem:[#allocation33_spill] sm:$0xff] }
 0x405   :  { %v2072_v14 = vadd.f32 %v2071_v53, %v2009_v11  ;;  %v2926_v61 = vrot.slane %v7317_v37, %v8450_v47  ;;  %v2682_v45 = vsel %vm857_vm2, %v8482_v58, 0.0  ;;  %v980_v11 = vsel %vm857_vm2, %v8489_v9, %v8488_v39  ;;  %v8512_v9 = vld [vmem:[#allocation31_spill] sm:$0xff] }
 0x406   :  { %2665 = vadd.xlane.f32.xlu0 %v2664_v26  ;;  %v3085_v37 = vsel %vm3043_vm3, %v2954_v63, %v2950_v22  ;;  %v2688_v63 = vsel %vm857_vm2, %v8492_v27, 0.0 }
 0x407   :  { %2644 = vadd.xlane.f32.xlu1 %v2643_v43  ;;  %v2209_v6 = vpop.xlane.xlu0 %2208  ;;  %v3079_v2 = vsel %vm3045_vm4, %v2926_v61, %v3078_v17  ;;  %v2073_v31 = vadd.f32 %v2072_v14, %v2010_v52  ;;  %v8490_v52 = vld [vmem:[#allocation16_spill] sm:$0xff]  ;;  %v8499_v17 = vld [vmem:[#allocation65_spill] sm:$0xff] }
 0x408   :  { %v2188_v20 = vpop.xlane.xlu1 %2187  ;;  %v2958_v13 = vrot.slane %v2209_v6, %v8450_v47 }
 0x409   :  { %v2930_v62 = vrot.slane %v2188_v20, %v8450_v47 }
 0x40a   :  { %2668 = vadd.xlane.f32.xlu0 %v2667_v7  ;;  %v3086_v1 = vsel %vm3045_vm4, %v2958_v13, %v3085_v37  ;;  %v8493_v13 = vld [vmem:[#allocation117_spill] sm:$0xff] }
 0x40b   :  { %2647 = vadd.xlane.f32.xlu1 %v2646_v32  ;;  %v2212_v48 = vpop.xlane.xlu0 %2211  ;;  %v3080_v40 = vsel %vm3047_vm5, %v2930_v62, %v3079_v2  ;;  %v8495_v62 = vld [vmem:[#allocation19_spill] sm:$0xff]  ;;  %v8501_v2 = vld [vmem:[#allocation81_spill] sm:$0xff] }
 0x40c   :  { %v2191_v59 = vpop.xlane.xlu1 %2190  ;;  %v2962_v29 = vrot.slane %v2212_v48, %v8450_v47 }
 0x40d   :  { %v2934_v44 = vrot.slane %v2191_v59, %v8450_v47  ;;  %v8485_v59 = vld [vmem:[#allocation15_spill] sm:$0xff] }
 0x40e   :  { %2671 = vadd.xlane.f32.xlu0 %v2670_v15  ;;  %v3087_v6 = vsel %vm3047_vm5, %v2962_v29, %v3086_v1  ;;  %v2011_v28 = vmul.f32 %v8485_v59, %v979_v49  ;;  %v2715_v1 = vsel %vm857_vm2, %v8501_v2, 0.0  ;;  %v983_v49 = vsel %vm857_vm2, %v8504_v54, %v8503_v42 }
 0x40f   :  { %2674 = vadd.xlane.f32.xlu1 %v2673_v12  ;;  %v2215_v19 = vpop.xlane.xlu0 %2214  ;;  %v3081_v7 = vsel %vm3049_vm6, %v2934_v44, %v3080_v40  ;;  %v8496_v44 = vld [vmem:[#allocation36_spill] sm:$0xff] }
 0x410   :  { %v2194_v51 = vpop.xlane.xlu1 %2193  ;;  %v2966_v4 = vrot.slane %v2215_v19, %v8450_v47  ;;  %v2706_v19 = vsel %vm857_vm2, %v8486_v30, 0.0  ;;  %v2074_v50 = vadd.f32 %v2073_v31, %v2011_v28  ;;  %v8505_v31 = vld [vmem:[#allocation25_spill] sm:$0xff] }
 0x411   :  { %v2938_v36 = vrot.slane %v2194_v51, %v8450_v47  ;;  %v8487_v51 = vld [vmem:[#allocation78_spill] sm:$0xff] }
 0x412   :  { %2677 = vadd.xlane.f32.xlu0 %v2676_v23  ;;  %v3088_v32 = vsel %vm3049_vm6, %v2966_v4, %v3087_v6  ;;  %v2685_v53 = vsel %vm857_vm2, %v8487_v51, 0.0  ;;  %v2712_v4 = vsel %vm857_vm2, %v8496_v44, 0.0 }
 0x413   :  { %2698 = vadd.xlane.f32.xlu1 %v2697_v34  ;;  %v2218_v56 = vpop.xlane.xlu0 %2217  ;;  %v3082_v55 = vsel %vm3051_vm7, %v2938_v36, %v3081_v7  ;;  %v8500_v36 = vld [vmem:[#allocation20_spill] sm:$0xff]  ;;  %v2015_v7 = vmul.f32 %v8505_v31, %v983_v49 }
 0x414   :  { %v2197_v60 = vpop.xlane.xlu1 %2196  ;;  %v2970_v0 = vrot.slane %v2218_v56, %v8450_v47  ;;  %v2012_v56 = vmul.f32 %v8490_v52, %v980_v11 }
 0x415   :  { %v2942_v26 = vrot.slane %v2197_v60, %v8450_v47  ;;  %v8491_v60 = vld [vmem:[#allocation85_spill] sm:$0xff] }
 0x416   :  { %2701 = vadd.xlane.f32.xlu0 %v2700_v35  ;;  %v3089_v24 = vsel %vm3051_vm7, %v2970_v0, %v3088_v32  ;;  %v2709_v14 = vsel %vm857_vm2, %v8491_v60, 0.0  ;;  %v2075_v35 = vadd.f32 %v2074_v50, %v2012_v56  ;;  %v8506_v32 = vld [vmem:[#allocation132_spill] sm:$0xff] }
 0x417   :  { %2680 = vadd.xlane.f32.xlu1 %v2679_v21  ;;  %v2221_v3 = vpop.xlane.xlu0 %2220  ;;  %v3083_v15 = vsel %vm3053_vm8, %v2942_v26, %v3082_v55  ;;  %v8494_v21 = vld [vmem:[#allocation64_spill] sm:$0xff]  ;;  %v8502_v26 = vld [vmem:[#allocation37_spill] sm:$0xff] }
 0x418   :  { %v2200_v57 = vpop.xlane.xlu1 %2199  ;;  %v2974_v43 = vrot.slane %v2221_v3, %v8450_v47  ;;  %v981_v22 = vsel %vm857_vm2, %v8494_v21, %v8493_v13  ;;  %v8497_v3 = vld [vmem:[#allocation131_spill] sm:$0xff] }
 0x419   :  { %v2946_v20 = vrot.slane %v2200_v57, %v8450_v47  ;;  %v2013_v29 = vmul.f32 %v8495_v62, %v981_v22  ;;  %v2691_v57 = vsel %vm857_vm2, %v8497_v3, 0.0 }
 0x41a   :  { %2704 = vadd.xlane.f32.xlu0 %v2703_v18  ;;  %v3090_v12 = vsel %vm3053_vm8, %v2974_v43, %v3089_v24  ;;  %v2694_v43 = vsel %vm857_vm2, %v8502_v26, 0.0  ;;  %v8507_v24 = vld [vmem:[#allocation123_spill] sm:$0xff] }
 0x41b   :  { %2683 = vadd.xlane.f32.xlu1 %v2682_v45  ;;  %v2224_v25 = vpop.xlane.xlu0 %2223  ;;  %v3084_v33 = vsel %vm3055_vm9, %v2946_v20, %v3083_v15  ;;  %v2076_v41 = vadd.f32 %v2075_v35, %v2013_v29  ;;  %v8498_v45 = vld [vmem:[#allocation119_spill] sm:$0xff] }
 0x41c   :  { %v7395_v48 = vpop.xlane.xlu1 %2226  ;;  %v2978_v8 = vrot.slane %v2224_v25, %v8450_v47  ;;  %v982_v37 = vsel %vm857_vm2, %v8499_v17, %v8498_v45  ;;  %v2718_v25 = vsel %vm857_vm2, %v8506_v32, 0.0 }
 0x41d   :  { %v2014_v0 = vmul.f32 %v8500_v36, %v982_v37  ;;  %v2982_v60 = vrot.slane %v7395_v48, %v8450_v47 }
 0x41e   :  { %v3091_v16 = vsel %vm3055_vm9, %v2978_v8, %v3090_v12  ;;  %2707 = vadd.xlane.f32.xlu0 %v2706_v19  ;;  %v8508_v8 = vld [vmem:[#allocation71_spill] sm:$0xff]  ;;  %v8509_v12 = vld [vmem:[#allocation28_spill] sm:$0xff] }
 0x41f   :  { %2686 = vadd.xlane.f32.xlu1 %v2685_v53  ;;  %v4143_v23 = vpack.c.bf16 %v3091_v16, %v3084_v33  ;;  %v2230_v34 = vpop.xlane.xlu0 %2229  ;;  %v2077_v40 = vadd.f32 %v2076_v41, %v2014_v0  ;;  %v984_v15 = vsel %vm857_vm2, %v8508_v8, %v8507_v24  ;;  %v8510_v33 = vld [vmem:[#allocation125_spill] sm:$0xff]  ;;  %v8511_v16 = vld [vmem:[#allocation74_spill] sm:$0xff] }
 0x420   :  { %v2251_v46 = vpop.xlane.xlu1 %2250  ;;  %v2016_v30 = vmul.f32 %v8509_v12, %v984_v15  ;;  %v985_v50 = vsel %vm857_vm2, %v8511_v16, %v8510_v33 }
 0x421   :  { %4145 = vmatpush3.bf16.xpose.msk.msra.mxu0 %vm7210_vm11, %v4143_v23  ;;  %v2078_v59 = vadd.f32 %v2077_v40, %v2015_v7  ;;  %v2986_v23 = vrot.slane %v2230_v34, %v8450_v47  ;;  %v2017_v11 = vmul.f32 %v8512_v9, %v985_v50 }
 0x422   :  { %2710 = vadd.xlane.f32.xlu0 %v2709_v14  ;;  %4146 = vmatprep.subr.bf16.mxu0 %v8458_v5  ;;  %v3014_v14 = vrot.slane %v2251_v46, %v8450_v47 }
 0x423   :  { %2689 = vadd.xlane.f32.xlu1 %v2688_v63  ;;  %v2254_v38 = vpop.xlane.xlu0 %2253  ;;  %v2079_v19 = vadd.f32 %v2078_v59, %v2016_v30 }
 0x424   :  { %v2233_v61 = vpop.xlane.xlu1 %2232  ;;  %v3018_v39 = vrot.slane %v2254_v38, %v8450_v47 }
 0x425   :  { %v2990_v52 = vrot.slane %v2233_v61, %v8450_v47  ;;  %v7459_v35 = vadd.f32 %v2079_v19, %v2017_v11  ;;  %v3092_v61 = vsel %vm3043_vm3, %v2986_v23, %v2982_v60 }
 0x426   :  { %2713 = vadd.xlane.f32.xlu0 %v2712_v4  ;;  %v3099_v22 = vsel %vm3043_vm3, %v3018_v39, %v3014_v14 }
 0x427   :  { %2692 = vadd.xlane.f32.xlu1 %v2691_v57  ;;  %v2257_v18 = vpop.xlane.xlu0 %2256  ;;  %v3093_v62 = vsel %vm3045_vm4, %v2990_v52, %v3092_v61 }
 0x428   :  { %v2236_v58 = vpop.xlane.xlu1 %2235  ;;  %v3022_v56 = vrot.slane %v2257_v18, %v8450_v47 }
 0x429   :  { %v2994_v27 = vrot.slane %v2236_v58, %v8450_v47 }
 0x42a   :  { %2716 = vadd.xlane.f32.xlu0 %v2715_v1  ;;  %v3100_v29 = vsel %vm3045_vm4, %v3022_v56, %v3099_v22 }
 0x42b   :  { %2695 = vadd.xlane.f32.xlu1 %v2694_v43  ;;  %v2260_v6 = vpop.xlane.xlu0 %2259  ;;  %v3094_v3 = vsel %vm3047_vm5, %v2994_v27, %v3093_v62 }
 0x42c   :  { %v2239_v20 = vpop.xlane.xlu1 %2238  ;;  %v3026_v63 = vrot.slane %v2260_v6, %v8450_v47 }
 0x42d   :  { %v2998_v34 = vrot.slane %v2239_v20, %v8450_v47 }
 0x42e   :  { %2719 = vadd.xlane.f32.xlu0 %v2718_v25  ;;  %v3101_v57 = vsel %vm3047_vm5, %v3026_v63, %v3100_v29 }
 0x42f   :  { %v2263_v28 = vpop.xlane.xlu0 %2262  ;;  %v3095_v18 = vsel %vm3049_vm6, %v2998_v34, %v3094_v3 }
 0x430   :  { %v2242_v55 = vpop.xlane.xlu1 %2241  ;;  %v3030_v38 = vrot.slane %v2263_v28, %v8450_v47 }
 0x431   :  { %v3002_v48 = vrot.slane %v2242_v55, %v8450_v47 }
 0x432   :  { %v3102_v58 = vsel %vm3049_vm6, %v3030_v38, %v3101_v57 }
 0x433   :  { %v2266_v51 = vpop.xlane.xlu0 %2265  ;;  %v3096_v37 = vsel %vm3051_vm7, %v3002_v48, %v3095_v18 }
 0x434   :  { %v2245_v53 = vpop.xlane.xlu1 %2244  ;;  %v3034_v46 = vrot.slane %v2266_v51, %v8450_v47 }
 0x435   :  { %v3006_v44 = vrot.slane %v2245_v53, %v8450_v47 }
 0x436   :  { %v3103_v36 = vsel %vm3051_vm7, %v3034_v46, %v3102_v58 }
 0x437   :  { %v2269_v13 = vpop.xlane.xlu0 %2268  ;;  %v3097_v2 = vsel %vm3053_vm8, %v3006_v44, %v3096_v37 }
 0x438   :  { %v2248_v21 = vpop.xlane.xlu1 %2247  ;;  %v3038_v4 = vrot.slane %v2269_v13, %v8450_v47 }
 0x439   :  { %v3010_v41 = vrot.slane %v2248_v21, %v8450_v47 }
 0x43a   :  { %v3104_v1 = vsel %vm3053_vm8, %v3038_v4, %v3103_v36 }
 0x43b   :  { %v2272_v45 = vpop.xlane.xlu0 %2271  ;;  %v3098_v26 = vsel %vm3055_vm9, %v3010_v41, %v3097_v2 }
 0x43c   :  { %v2531_v17 = vpop.xlane.xlu1 %2530  ;;  %3596 = vrot.lane.b32.xlu1 %v7459_v35, %s4346_s24  ;;  %v3042_v0 = vrot.slane %v2272_v45, %v8450_v47 }
 0x43d   :  { %v3173_v30 = vrot.slane %v2531_v17, %v8450_v47 }
 0x43e   :  { %v3105_v43 = vsel %vm3055_vm9, %v3042_v0, %v3104_v1 }
 0x43f   :  { %v4147_v40 = vpack.c.bf16 %v3105_v43, %v3098_v26  ;;  %v2534_v6 = vpop.xlane.xlu0 %2533 }
 0x440   :  { %v2555_v20 = vpop.xlane.xlu1 %2554  ;;  %v3177_v24 = vrot.slane %v2534_v6, %v8450_v47 }
 0x441   :  { %4149 = vmatpush3.bf16.xpose.msk.msra.mxu0 %vm7210_vm11, %v4147_v40  ;;  %v3205_v19 = vrot.slane %v2555_v20, %v8450_v47 }
 0x442   :  { %4150 = vmatprep.subr.bf16.mxu0 %v8458_v5  ;;  %v3426_v39 = vsel %vm3043_vm3, %v3177_v24, %v3173_v30 }
 0x443   :  { %v2558_v42 = vpop.xlane.xlu0 %2557 }
 0x444   :  { %v2537_v54 = vpop.xlane.xlu1 %2536  ;;  %v3209_v8 = vrot.slane %v2558_v42, %v8450_v47 }
 0x445   :  { %v3181_v15 = vrot.slane %v2537_v54, %v8450_v47 }
 0x446   :  { %v3433_v9 = vsel %vm3043_vm3, %v3209_v8, %v3205_v19 }
 0x447   :  { %v2561_v49 = vpop.xlane.xlu0 %2560  ;;  %v3427_v56 = vsel %vm3045_vm4, %v3181_v15, %v3426_v39 }
 0x448   :  { %v2540_v31 = vpop.xlane.xlu1 %2539  ;;  %v3213_v12 = vrot.slane %v2561_v49, %v8450_v47 }
 0x449   :  { %v3185_v51 = vrot.slane %v2540_v31, %v8450_v47 }
 0x44a   :  { %v3434_v60 = vsel %vm3045_vm4, %v3213_v12, %v3433_v9 }
 0x44b   :  { %v2564_v7 = vpop.xlane.xlu0 %2563  ;;  %v3428_v63 = vsel %vm3047_vm5, %v3185_v51, %v3427_v56 }
 0x44c   :  { %v2543_v32 = vpop.xlane.xlu1 %2542  ;;  %v3217_v53 = vrot.slane %v2564_v7, %v8450_v47 }
 0x44d   :  { %v3189_v33 = vrot.slane %v2543_v32, %v8450_v47 }
 0x44e   :  { %v3435_v34 = vsel %vm3047_vm5, %v3217_v53, %v3434_v60 }
 0x44f   :  { %v2567_v25 = vpop.xlane.xlu0 %2566  ;;  %v3429_v13 = vsel %vm3049_vm6, %v3189_v33, %v3428_v63 }
 0x450   :  { %v2546_v59 = vpop.xlane.xlu1 %2545  ;;  %v3221_v16 = vrot.slane %v2567_v25, %v8450_v47 }
 0x451   :  { %v3193_v11 = vrot.slane %v2546_v59, %v8450_v47 }
 0x452   :  { %v3436_v21 = vsel %vm3049_vm6, %v3221_v16, %v3435_v34 }
 0x453   :  { %v2570_v28 = vpop.xlane.xlu0 %2569  ;;  %v3430_v48 = vsel %vm3051_vm7, %v3193_v11, %v3429_v13 }
 0x454   :  { %v2549_v55 = vpop.xlane.xlu1 %2548  ;;  %v3225_v52 = vrot.slane %v2570_v28, %v8450_v47 }
 0x455   :  { %v3197_v14 = vrot.slane %v2549_v55, %v8450_v47 }
 0x456   :  { %v3437_v46 = vsel %vm3051_vm7, %v3225_v52, %v3436_v21 }
 0x457   :  { %v2573_v50 = vpop.xlane.xlu0 %2572  ;;  %v3431_v29 = vsel %vm3053_vm8, %v3197_v14, %v3430_v48 }
 0x458   :  { %v2552_v23 = vpop.xlane.xlu1 %2551  ;;  %v3229_v27 = vrot.slane %v2573_v50, %v8450_v47 }
 0x459   :  { %v3201_v38 = vrot.slane %v2552_v23, %v8450_v47 }
 0x45a   :  { %v3438_v44 = vsel %vm3053_vm8, %v3229_v27, %v3437_v46 }
 0x45b   :  { %v2576_v61 = vpop.xlane.xlu0 %2575  ;;  %v3432_v4 = vsel %vm3055_vm9, %v3201_v38, %v3431_v29 }
 0x45c   :  { %v2579_v22 = vpop.xlane.xlu1 %2578  ;;  %v3233_v62 = vrot.slane %v2576_v61, %v8450_v47 }
 0x45d   :  { %v3237_v54 = vrot.slane %v2579_v22, %v8450_v47 }
 0x45e   :  { %v3439_v3 = vsel %vm3055_vm9, %v3233_v62, %v3438_v44 }
 0x45f   :  { %v4151_v57 = vpack.c.bf16 %v3439_v3, %v3432_v4  ;;  %v2582_v41 = vpop.xlane.xlu0 %2581 }
 0x460   :  { %v2603_v18 = vpop.xlane.xlu1 %2602  ;;  %v3241_v40 = vrot.slane %v2582_v41, %v8450_v47 }
 0x461   :  { %4153 = vmatpush3.bf16.xpose.msk.msra.mxu0 %vm7210_vm11, %v4151_v57  ;;  %v3269_v49 = vrot.slane %v2603_v18, %v8450_v47 }
 0x462   :  { %4154 = vmatprep.subr.bf16.mxu0 %v8458_v5  ;;  %v3440_v55 = vsel %vm3043_vm3, %v3241_v40, %v3237_v54 }
 0x463   :  { %v2606_v58 = vpop.xlane.xlu0 %2605 }
 0x464   :  { %v2585_v45 = vpop.xlane.xlu1 %2584  ;;  %v3273_v6 = vrot.slane %v2606_v58, %v8450_v47 }
 0x465   :  { %v3245_v20 = vrot.slane %v2585_v45, %v8450_v47 }
 0x466   :  { %v3447_v24 = vsel %vm3043_vm3, %v3273_v6, %v3269_v49 }
 0x467   :  { %v2609_v17 = vpop.xlane.xlu0 %2608  ;;  %v3441_v12 = vsel %vm3045_vm4, %v3245_v20, %v3440_v55 }
 0x468   :  { %v2588_v37 = vpop.xlane.xlu1 %2587  ;;  %v3277_v42 = vrot.slane %v2609_v17, %v8450_v47 }
 0x469   :  { %v3249_v31 = vrot.slane %v2588_v37, %v8450_v47 }
 0x46a   :  { %v3448_v30 = vsel %vm3045_vm4, %v3277_v42, %v3447_v24 }
 0x46b   :  { %v2612_v36 = vpop.xlane.xlu0 %2611  ;;  %v3442_v53 = vsel %vm3047_vm5, %v3249_v31, %v3441_v12 }
 0x46c   :  { %v2591_v0 = vpop.xlane.xlu1 %2590  ;;  %v3281_v7 = vrot.slane %v2612_v36, %v8450_v47 }
 0x46d   :  { %v3253_v32 = vrot.slane %v2591_v0, %v8450_v47 }
 0x46e   :  { %v3449_v33 = vsel %vm3047_vm5, %v3281_v7, %v3448_v30 }
 0x46f   :  { %v2615_v2 = vpop.xlane.xlu0 %2614  ;;  %v3443_v50 = vsel %vm3049_vm6, %v3253_v32, %v3442_v53 }
 0x470   :  { %v2594_v1 = vpop.xlane.xlu1 %2593  ;;  %v3285_v25 = vrot.slane %v2615_v2, %v8450_v47 }
 0x471   :  { %v3257_v8 = vrot.slane %v2594_v1, %v8450_v47 }
 0x472   :  { %v3450_v23 = vsel %vm3049_vm6, %v3285_v25, %v3449_v33 }
 0x473   :  { %v2618_v26 = vpop.xlane.xlu0 %2617  ;;  %v3444_v11 = vsel %vm3051_vm7, %v3257_v8, %v3443_v50 }
 0x474   :  { %v2597_v43 = vpop.xlane.xlu1 %2596  ;;  %v3289_v15 = vrot.slane %v2618_v26, %v8450_v47 }
 0x475   :  { %v3261_v19 = vrot.slane %v2597_v43, %v8450_v47 }
 0x476   :  { %v3451_v52 = vsel %vm3051_vm7, %v3289_v15, %v3450_v23 }
 0x477   :  { %v2621_v59 = vpop.xlane.xlu0 %2620  ;;  %v3445_v60 = vsel %vm3053_vm8, %v3261_v19, %v3444_v11 }
 0x478   :  { %v2600_v28 = vpop.xlane.xlu1 %2599  ;;  %v3293_v51 = vrot.slane %v2621_v59, %v8450_v47 }
 0x479   :  { %v3265_v16 = vrot.slane %v2600_v28, %v8450_v47 }
 0x47a   :  { %v3452_v14 = vsel %vm3053_vm8, %v3293_v51, %v3451_v52 }
 0x47b   :  { %v2624_v39 = vpop.xlane.xlu0 %2623  ;;  %v3446_v27 = vsel %vm3055_vm9, %v3265_v16, %v3445_v60 }
 0x47c   :  { %v2627_v9 = vpop.xlane.xlu1 %2626  ;;  %v3297_v56 = vrot.slane %v2624_v39, %v8450_v47 }
 0x47d   :  { %v3301_v45 = vrot.slane %v2627_v9, %v8450_v47 }
 0x47e   :  { %v3453_v63 = vsel %vm3055_vm9, %v3297_v56, %v3452_v14 }
 0x47f   :  { %v4155_v34 = vpack.c.bf16 %v3453_v63, %v3446_v27  ;;  %v2630_v38 = vpop.xlane.xlu0 %2629 }
 0x480   :  { %v2651_v13 = vpop.xlane.xlu1 %2650  ;;  %v3305_v57 = vrot.slane %v2630_v38, %v8450_v47 }
 0x481   :  { %4157 = vmatpush3.bf16.xpose.msk.msra.mxu0 %vm7210_vm11, %v4155_v34  ;;  %v3333_v17 = vrot.slane %v2651_v13, %v8450_v47 }
 0x482   :  { %4158 = vmatprep.subr.bf16.mxu0 %v8458_v5  ;;  %v3454_v43 = vsel %vm3043_vm3, %v3305_v57, %v3301_v45 }
 0x483   :  { %v2654_v21 = vpop.xlane.xlu0 %2653 }
 0x484   :  { %v2633_v61 = vpop.xlane.xlu1 %2632  ;;  %v3337_v41 = vrot.slane %v2654_v21, %v8450_v47 }
 0x485   :  { %v3309_v18 = vrot.slane %v2633_v61, %v8450_v47 }
 0x486   :  { %v3461_v40 = vsel %vm3043_vm3, %v3337_v41, %v3333_v17 }
 0x487   :  { %v2657_v22 = vpop.xlane.xlu0 %2656  ;;  %v3455_v42 = vsel %vm3045_vm4, %v3309_v18, %v3454_v43  ;;  %v3598_v43 = vld [vmem:[%s7674_s6] sm:$0xff] }
 0x488   :  { %v2636_v48 = vpop.xlane.xlu1 %2635  ;;  %v3341_v58 = vrot.slane %v2657_v22, %v8450_v47 }
 0x489   :  { %v3313_v37 = vrot.slane %v2636_v48, %v8450_v47 }
 0x48a   :  { %v3462_v54 = vsel %vm3045_vm4, %v3341_v58, %v3461_v40  ;;  %v3599_v40 = vld [vmem:[%s7674_s6 + $0x8] sm:$0xff] }
 0x48b   :  { %v2660_v46 = vpop.xlane.xlu0 %2659  ;;  %v3456_v7 = vsel %vm3047_vm5, %v3313_v37, %v3455_v42 }
 0x48c   :  { %v2639_v62 = vpop.xlane.xlu1 %2638  ;;  %v3345_v36 = vrot.slane %v2660_v46, %v8450_v47 }
 0x48d   :  { %v3317_v0 = vrot.slane %v2639_v62, %v8450_v47 }
 0x48e   :  { %v3463_v32 = vsel %vm3047_vm5, %v3345_v36, %v3462_v54 }
 0x48f   :  { %v2663_v29 = vpop.xlane.xlu0 %2662  ;;  %v3457_v59 = vsel %vm3049_vm6, %v3317_v0, %v3456_v7 }
 0x490   :  { %v2642_v44 = vpop.xlane.xlu1 %2641  ;;  %v3349_v2 = vrot.slane %v2663_v29, %v8450_v47 }
 0x491   :  { %v3321_v6 = vrot.slane %v2642_v44, %v8450_v47 }
 0x492   :  { %v3464_v28 = vsel %vm3049_vm6, %v3349_v2, %v3463_v32  ;;  %v4166_v32 = vpack.c.bf16 %v3599_v40, %v3598_v43 }
 0x493   :  { %v2666_v4 = vpop.xlane.xlu0 %2665  ;;  %v3458_v8 = vsel %vm3051_vm7, %v3321_v6, %v3457_v59  ;;  %v3600_v59 = vld [vmem:[%s7674_s6 + $0x10] sm:$0xff] }
 0x494   :  { %v2645_v3 = vpop.xlane.xlu1 %2644  ;;  %v3353_v20 = vrot.slane %v2666_v4, %v8450_v47 }
 0x495   :  { %v3325_v49 = vrot.slane %v2645_v3, %v8450_v47 }
 0x496   :  { %v3465_v15 = vsel %vm3051_vm7, %v3353_v20, %v3464_v28 }
 0x497   :  { %v2669_v1 = vpop.xlane.xlu0 %2668  ;;  %v3459_v30 = vsel %vm3053_vm8, %v3325_v49, %v3458_v8 }
 0x498   :  { %v2648_v26 = vpop.xlane.xlu1 %2647  ;;  %v3357_v31 = vrot.slane %v2669_v1, %v8450_v47 }
 0x499   :  { %v3329_v25 = vrot.slane %v2648_v26, %v8450_v47 }
 0x49a   :  { %v3466_v19 = vsel %vm3053_vm8, %v3357_v31, %v3465_v15  ;;  %v3604_v15 = vld [vmem:[%s7674_s6 + $0x30] sm:$0xff] }
 0x49b   :  { %v2672_v55 = vpop.xlane.xlu0 %2671  ;;  %v3460_v51 = vsel %vm3055_vm9, %v3329_v25, %v3459_v30 }
 0x49c   :  { %v2675_v24 = vpop.xlane.xlu1 %2674  ;;  %v3361_v12 = vrot.slane %v2672_v55, %v8450_v47  ;;  %v3602_v55 = vld [vmem:[%s7674_s6 + $0x20] sm:$0xff] }
 0x49e   :  { %v3467_v53 = vsel %vm3055_vm9, %v3361_v12, %v3466_v19  ;;  %v3605_v12 = vld [vmem:[%s7674_s6 + $0x38] sm:$0xff] }
 0x49f   :  { %v4159_v33 = vpack.c.bf16 %v3467_v53, %v3460_v51  ;;  %v2678_v16 = vpop.xlane.xlu0 %2677  ;;  %v4178_v30 = vpack.c.bf16 %v3605_v12, %v3604_v15 }
 0x4a0   :  { %v2699_v50 = vpop.xlane.xlu1 %2698  ;;  %v3369_v34 = vrot.slane %v2678_v16, %v8450_v47 }
 0x4a1   :  { %4161 = vmatpush3.bf16.xpose.msk.msra.mxu0 %vm7210_vm11, %v4159_v33  ;;  %v3397_v61 = vrot.slane %v2699_v50, %v8450_v47  ;;  %v3734_v33 = vld [vmem:[%s7675_s7] ss:$0 sm:$0xff] }
 0x4a2   :  { %4162 = vmatprep.subr.bf16.mxu0 %v8458_v5  ;;  %v3365_v5 = vrot.slane %v2675_v24, %v8450_v47  ;;  %v3603_v24 = vld [vmem:[%s7674_s6 + $0x28] sm:$0xff] }
 0x4a3   :  { %v2702_v23 = vpop.xlane.xlu0 %2701  ;;  %v4174_v8 = vpack.c.bf16 %v3603_v24, %v3602_v55 }
 0x4a4   :  { %v2681_v39 = vpop.xlane.xlu1 %2680  ;;  %v3401_v38 = vrot.slane %v2702_v23, %v8450_v47  ;;  %v3468_v4 = vsel %vm3043_vm3, %v3369_v34, %v3365_v5 }
 0x4a5   :  { %v3373_v13 = vrot.slane %v2681_v39, %v8450_v47 }
 0x4a6   :  { %v3475_v3 = vsel %vm3043_vm3, %v3401_v38, %v3397_v61 }
 0x4a7   :  { %v2705_v9 = vpop.xlane.xlu0 %2704  ;;  %v3469_v18 = vsel %vm3045_vm4, %v3373_v13, %v3468_v4 }
 0x4a8   :  { %v2684_v11 = vpop.xlane.xlu1 %2683  ;;  %v3405_v21 = vrot.slane %v2705_v9, %v8450_v47 }
 0x4a9   :  { %v3377_v22 = vrot.slane %v2684_v11, %v8450_v47 }
 0x4aa   :  { %v3476_v58 = vsel %vm3045_vm4, %v3405_v21, %v3475_v3 }
 0x4ab   :  { %v2708_v52 = vpop.xlane.xlu0 %2707  ;;  %v3470_v37 = vsel %vm3047_vm5, %v3377_v22, %v3469_v18 }
 0x4ac   :  { %v2687_v56 = vpop.xlane.xlu1 %2686  ;;  %v3409_v48 = vrot.slane %v2708_v52, %v8450_v47 }
 0x4ad   :  { %v3381_v46 = vrot.slane %v2687_v56, %v8450_v47 }
 0x4ae   :  { %v3477_v36 = vsel %vm3047_vm5, %v3409_v48, %v3476_v58 }
 0x4af   :  { %v2711_v60 = vpop.xlane.xlu0 %2710  ;;  %v3471_v2 = vsel %vm3049_vm6, %v3381_v46, %v3470_v37 }
 0x4b0   :  { %v2690_v14 = vpop.xlane.xlu1 %2689  ;;  %v3413_v62 = vrot.slane %v2711_v60, %v8450_v47 }
 0x4b1   :  { %v3385_v57 = vrot.slane %v2690_v14, %v8450_v47 }
 0x4b2   :  { %v3478_v1 = vsel %vm3049_vm6, %v3413_v62, %v3477_v36 }
 0x4b3   :  { %v2714_v27 = vpop.xlane.xlu0 %2713  ;;  %v3472_v6 = vsel %vm3051_vm7, %v3385_v57, %v3471_v2 }
 0x4b4   :  { %v2693_v63 = vpop.xlane.xlu1 %2692  ;;  %v3417_v41 = vrot.slane %v2714_v27, %v8450_v47 }
 0x4b5   :  { %v3389_v45 = vrot.slane %v2693_v63, %v8450_v47 }
 0x4b6   :  { %v3479_v20 = vsel %vm3051_vm7, %v3417_v41, %v3478_v1 }
 0x4b7   :  { %v2717_v29 = vpop.xlane.xlu0 %2716  ;;  %v3473_v54 = vsel %vm3053_vm8, %v3389_v45, %v3472_v6 }
 0x4b8   :  { %v2696_v44 = vpop.xlane.xlu1 %2695  ;;  %v3421_v17 = vrot.slane %v2717_v29, %v8450_v47 }
 0x4b9   :  { %v3393_v0 = vrot.slane %v2696_v44, %v8450_v47 }
 0x4ba   :  { %v3480_v49 = vsel %vm3053_vm8, %v3421_v17, %v3479_v20 }
 0x4bb   :  { %v2720_v26 = vpop.xlane.xlu0 %2719  ;;  %v3474_v31 = vsel %vm3055_vm9, %v3393_v0, %v3473_v54 }
 0x4bc   :  { %v3425_v42 = vrot.slane %v2720_v26, %v8450_v47  ;;  %v3601_v47 = vld [vmem:[%s7674_s6 + $0x18] sm:$0xff]  ;;  %v3597_v19 = vpop.permute.xlu1 %3596  ;;  %s4347_s6 = smov [#allocation2]  }
 0x4bd   :  { %v4170_v28 = vpack.c.bf16 %v3601_v47, %v3600_v59  ;;  %s3699_s21 = sshll.u32 %s4347_s6, 4  ;;  %s3700_s21 = int_to_ptr.vmem [resolvable:$true] %s3699_s21 }
 0x4be   :  { %v3481_v7 = vsel %vm3055_vm9, %v3425_v42, %v3480_v49  ;;  %s4319_s22 = scalar_lea.vmem %s3700_s21, 256  ;;  %p4324_p1 = scmp.lt.s32.totalorder %s3700_s21, %s3700_s21 }
 0x4bf   :  { %v4163_v25 = vpack.c.bf16 %v3481_v7, %v3474_v31  ;;  %p4320_p0 = scmp.ne.s32.totalorder %s3700_s21, %s4319_s22  ;;  %p4325_p2 = scmp.lt.s32.totalorder %s4319_s22, %s4319_s22 }
 0x4c1   :  { %4165 = vmatpush3.bf16.xpose.msk.msra.mxu0 %vm7210_vm11, %v4163_v25  ;;  %p4326_p3 = por %p4325_p2, %p4324_p1 }
 0x4c2   :  { %4167 = vmatprep.subr.bf16.mxu0 %v4166_v32 }
 0x4c3   :  { %p4327_p4 = pnand %p4326_p3, %p4320_p0 }
 0x4c8   :  { %4057 = vmatmul.mubr.msk.f32.vlgmr.msra.gmra.mrb[2].mxu0 %vm3487_vm10, %v8513_v10 }
 0x4c9   :  { %4169 = vmatpush3.bf16.msra.mxu0 %v4166_v32  ;;  %4075 = vmatprep.mubr.msk.f32.mxu0 %vm857_vm2, %v7459_v35 }
 0x4ca   :  { %4171 = vmatprep.subr.bf16.mxu0 %v4170_v28 }
 0x4cd   :  { %4173 = vmatpush3.bf16.msra.mxu0 %v4170_v28 }
 0x4ce   :  { %4175 = vmatprep.subr.bf16.mxu0 %v4174_v8 }
 0x4d1   :  { %4177 = vmatpush3.bf16.msra.mxu0 %v4174_v8 }
 0x4d2   :  { %4179 = vmatprep.subr.bf16.mxu0 %v4178_v30 }
 0x4d5   :  { %4181 = vmatpush3.bf16.msra.mxu0 %v4178_v30 }
 0x4d8   :  { %4076 = vmatmul.mubr.msk.f32.vlgmr.msra.gmra.mrb[4].mxu0 %vm857_vm2, %v3597_v19 }
 0x59b   :  { %v3589_v35 = vpop.f32.mrb[2].mxu0 }
 0x59c   :  { %v3593_v51 = vmul.f32 0.015625, %v3589_v35  ;;  %v4058_v53 = vpop.f32.mrb[3].mxu0 }
 0x59e   :  { %3594 = vst [vmem:[%s7678_s10] sm:$0xff] %v3593_v51 }
 0x5ab   :  { %v4077_v16 = vpop.f32.mrb[4].mxu0 }
 0x5ac   :  { %v3689_v50 = vadd.f32 %v4077_v16, %v3734_v33  ;;  %v3683_v23 = vpop.f32.mrb[5].mxu0 }
 0x5ad   :  { %v3684_v39 = vadd.f32 %v3734_v33, %v3683_v23 }
 0x5ae   :  { %3693 = vst.msk [vmem:[#allocation2 + $0x8] sm:$0xff] %vm857_vm2, %v3689_v50 }
 0x5af   :  { %3692 = vst.msk [vmem:[#allocation2] sm:$0xff] %vm857_vm2, %v3684_v39 }
 0x5b0   :  { %4330 = shalt.err (!%p4327_p4)
}
 0x5b1   :  { %s4331_s1 = scalar_lea.hbm %s7677_s9, 256 }
 0x5b2   :  { %p4332_p5 = scmp.ne.s32.totalorder %s7677_s9, %s4331_s1  ;;  %p4335_p6 = scmp.lt.u32.totalorder %s4331_s1, %s7677_s9 }
 0x5b4   :  { %p4337_p7 = pnand %p4335_p6, %p4332_p5 }
 0x5b6   :  { %4340 = shalt.err (!%p4337_p7)
}
 0x5b7   :  { %s4348_s3 = smov 128   ;;  %s4349_s8 = smov 8  }
 0x5b8   :  { %3705 = dma.vmem_to_hbm [thread:$0]  %s3700_s21, 256, %s7677_s9, [#allocation3], %s4348_s3, %s4348_s3, %s4349_s8  }
 0x5b9   :  { %4341 = dma.done.wait [#allocation3], 256  }
 0x5ba   :  { %4342 = vsyncadd [#allocation3], 4294967040 }
 0x5bb   :  { %3713 = vsyncpa [#allocation3], 1 }

</bundles_post_ra>
